<compile_context>
chip_gen: v5e
topology: v5e:2x2
jax: 0.10.0
libtpu: 0.0.40
codegen_flags: <defaults>
</compile_context>

<pallas_src>
import jax
import jax.numpy as jnp
from jax.experimental import pallas as pl
from jax.experimental.pallas import tpu as pltpu


def _conv1x1_matmul_kernel(w_ref, x_ref, o_ref):
    # Single MXU matmul per grid step: [Cout_blk, Cin] @ [Cin, H*W] -> f32.
    o_ref[...] = jnp.dot(
        w_ref[...], x_ref[...], preferred_element_type=jnp.float32
    ).astype(o_ref.dtype)


def _cout_splits() -> int:
    """Split Cout across TensorCores only on chips that have 2 TCs per chip."""
    try:
        kind = jax.devices()[0].device_kind.lower()
    except Exception:
        return 1
    if "v7" in kind or "v4" in kind or "v5p" in kind:
        return 2
    return 1


def conv2d_1x1(x_nchw: jax.Array, weight_oi11: jax.Array) -> jax.Array:
    """1x1 conv, stride 1, no bias.  x: [1, Cin, H, W], weight: [Cout, Cin, 1, 1]."""
    n, cin, h, w = x_nchw.shape
    cout = weight_oi11.shape[0]
    assert weight_oi11.shape == (cout, cin, 1, 1)
    assert n == 1, "NCHW-native free-view matmul path assumes batch == 1"

    hw = h * w

    # Free views (no HBM copies) + bf16 operand cast (halves kernel DMA bytes).
    x_mat = x_nchw.reshape(cin, hw).astype(jnp.bfloat16)          # [Cin, H*W]
    w_mat = weight_oi11.reshape(cout, cin).astype(jnp.bfloat16)   # [Cout, Cin]

    splits = _cout_splits()
    assert cout % splits == 0 and (cout // splits) % 8 == 0

    cost = pl.CostEstimate(
        flops=2 * cout * cin * hw,
        transcendentals=0,
        bytes_accessed=x_mat.size * 2 + w_mat.size * 2 + cout * hw * 4,
    )

    out_mat = pl.pallas_call(
        _conv1x1_matmul_kernel,
        out_shape=jax.ShapeDtypeStruct((cout, hw), jnp.float32),
        grid_spec=pltpu.PrefetchScalarGridSpec(
            num_scalar_prefetch=0,
            grid=(splits,),
            in_specs=[
                # W block: [Cout/splits, Cin]  (sublane 112/224 is a mult. of 8,
                # lane dim 1344 is the full extent).
                pl.BlockSpec((cout // splits, cin), lambda i: (i, 0)),
                # X block: full [Cin, H*W]; same block every step, so the
                # pipeline does not re-DMA it on single-TC chips.
                pl.BlockSpec((cin, hw), lambda i: (0, 0)),
            ],
            out_specs=pl.BlockSpec((cout // splits, hw), lambda i: (i, 0)),
        ),
        compiler_params=pltpu.CompilerParams(
            dimension_semantics=("parallel",),
        ),
        cost_estimate=cost,
    )(w_mat, x_mat)

    # Free view back to NCHW.
    return out_mat.reshape(n, cout, h, w)


if __name__ == "__main__":
    key = jax.random.PRNGKey(0)
    kx, kw = jax.random.split(key)

    # Shapes implied by the module's forward pass.
    N, CIN, H, W = 1, 1344, 14, 14
    COUT = 224

    x = jax.random.normal(kx, (N, CIN, H, W), dtype=jnp.float32)
    # Deterministic Kaiming-uniform-style init (Conv2d default bound 1/sqrt(fan_in)).
    bound = 1.0 / (CIN ** 0.5)
    weight = jax.random.uniform(
        kw, (COUT, CIN, 1, 1), dtype=jnp.float32, minval=-bound, maxval=bound
    )

    out = conv2d_1x1(x, weight)
    out = jax.block_until_ready(out)

    # Sanity check against a plain-JAX f32 reference.  Tolerance is relaxed
    # because the kernel uses bf16 operands (f32 accumulation).
    ref = jax.lax.conv_general_dilated(
        x, weight, window_strides=(1, 1), padding="VALID",
        dimension_numbers=("NCHW", "OIHW", "NCHW"),
    )
    assert out.shape == (N, COUT, H, W), out.shape
    assert jnp.allclose(out, ref, atol=5e-2, rtol=5e-2)

    print("KERNEL_OK")
</pallas_src>

<mosaic_0001>
module attributes {stable_mosaic.version = 11 : i64} {
  func.func @_conv1x1_matmul_kernel(%arg0: i32, %arg1: memref<224x1344xbf16, #tpu.memory_space<vmem>>, %arg2: memref<1344x196xbf16, #tpu.memory_space<vmem>>, %arg3: memref<224x196xf32, #tpu.memory_space<vmem>>) attributes {dimension_semantics = [#tpu.dimension_semantics<parallel>], iteration_bounds = array<i64: 1>, scalar_prefetch = 0 : i64, scratch_operands = 0 : i64, tpu.core_type = #tpu.core_type<tc>, window_params = [{transform_indices = @transform_0, window_bounds = array<i64: 224, 1344>}, {pipeline_mode = #tpu.pipeline_mode<synchronous>, transform_indices = @transform_1, window_bounds = array<i64: 1344, 196>}, {transform_indices = @transform_2, window_bounds = array<i64: 224, 196>}]} {
    %c0 = arith.constant 0 : index
    %c0_0 = arith.constant 0 : index
    %0 = vector.load %arg1[%c0, %c0_0] : memref<224x1344xbf16, #tpu.memory_space<vmem>>, vector<224x1344xbf16>
    %c0_1 = arith.constant 0 : index
    %c0_2 = arith.constant 0 : index
    %1 = vector.load %arg2[%c0_1, %c0_2] : memref<1344x196xbf16, #tpu.memory_space<vmem>>, vector<1344x196xbf16>
    %cst = arith.constant dense<0.000000e+00> : vector<224x196xf32>
    %2 = tpu.matmul %0, %1, %cst {dimension_numbers = #tpu.dot_dimension_numbers<[1], [0], [0], [1], [0, 0, 1, 1], [], []>} : vector<224x1344xbf16>, vector<1344x196xbf16>, vector<224x196xf32> -> vector<224x196xf32>
    %c0_3 = arith.constant 0 : index
    %c0_4 = arith.constant 0 : index
    %3 = vector.load %arg3[%c0_3, %c0_4] : memref<224x196xf32, #tpu.memory_space<vmem>>, vector<224x196xf32>
    tpu.vector_store %arg3[%c0_3, %c0_4], %2 {strides = array<i32>} : memref<224x196xf32, #tpu.memory_space<vmem>>, vector<224x196xf32>,
    return
  }
  func.func @transform_0(%arg0: i32) -> (i32, i32) {
    %c0_i32 = arith.constant 0 : i32
    %c0_i32_0 = arith.constant 0 : i32
    return %arg0, %c0_i32 : i32, i32
  }
  func.func @transform_1(%arg0: i32) -> (i32, i32) {
    %c0_i32 = arith.constant 0 : i32
    %c0_i32_0 = arith.constant 0 : i32
    %c0_i32_1 = arith.constant 0 : i32
    return %c0_i32, %c0_i32_0 : i32, i32
  }
  func.func @transform_2(%arg0: i32) -> (i32, i32) {
    %c0_i32 = arith.constant 0 : i32
    %c0_i32_0 = arith.constant 0 : i32
    return %arg0, %c0_i32 : i32, i32
  }
}

</mosaic_0001>

<bundles_post_ra>
// kernel: tpu_custom_call.1
= control target key start
LH: loop header
LB: loop body
LE: loop exit
PB: predicated region body
PF: predicated region fallthrough
CT: control target
= control target key end

     0   :  { %vm1958_vm0 = vcmask 523264   ;;  %vm3740_vm1 = vcmask 556032   ;;  %s8661_s1 = inlined_call_operand.vmem [shape: bf16[1344,196], index: 1, kind: input, shape index: {}]   ;;  %s8662_s0 = inlined_call_operand.vmem [shape: bf16[224,1344], index: 0, kind: input, shape index: {}]   ;;  %s8663_s2 = inlined_call_operand.vmem [shape: f32[224,196], index: 2, kind: output, shape index: {}]  }
   0x1   :  { %v4474_v0 = vld [vmem:[%s8661_s1 + $0x70] sm:$0xf]  ;;  %v5285_v1 = vld [vmem:[%s8661_s1 + $0x74] sm:$0xf0]  ;;  %v4466_v5 = vld [vmem:[%s8661_s1 + $0x60] sm:$0xf] }
   0x2   :  { %v4538_v2 = vld [vmem:[%s8661_s1 + $0xf0] sm:$0xf]  ;;  %v4475_v3 = vor.u32 %v5285_v1, %v4474_v0  ;;  %v5301_v4 = vld [vmem:[%s8661_s1 + $0xf4] sm:$0xf0]  ;;  %v5283_v6 = vld [vmem:[%s8661_s1 + $0x64] sm:$0xf0] }
   0x3   :  { %v4539_v7 = vor.u32 %v5301_v4, %v4538_v2  ;;  %v4530_v8 = vld [vmem:[%s8661_s1 + $0xe0] sm:$0xf]  ;;  %v5299_v9 = vld [vmem:[%s8661_s1 + $0xe4] sm:$0xf0]  ;;  %v4467_v10 = vor.u32 %v5283_v6, %v4466_v5  ;;  %v4458_v12 = vld [vmem:[%s8661_s1 + $0x50] sm:$0xf] }
   0x4   :  { %5438 = vmatpush.bf16.msra.mxu2 %v4475_v3  ;;  %2001 = vmatpush.bf16.msra.mxu0 %v4475_v3  ;;  %v4531_v11 = vor.u32 %v5299_v9, %v4530_v8  ;;  %v5281_v13 = vld [vmem:[%s8661_s1 + $0x54] sm:$0xf0]  ;;  %v4522_v14 = vld [vmem:[%s8661_s1 + $0xd0] sm:$0xf]  ;;  %v4450_v18 = vld [vmem:[%s8661_s1 + $0x40] sm:$0xf] }
   0x5   :  { %5446 = vmatpush.bf16.msra.mxu3 %v4539_v7  ;;  %2080 = vmatpush.bf16.msra.mxu1 %v4539_v7  ;;  %v5297_v15 = vld [vmem:[%s8661_s1 + $0xd4] sm:$0xf0]  ;;  %v4459_v16 = vor.u32 %v5281_v13, %v4458_v12  ;;  %v5279_v19 = vld [vmem:[%s8661_s1 + $0x44] sm:$0xf0]  ;;  %v4514_v20 = vld [vmem:[%s8661_s1 + $0xc0] sm:$0xf] }
   0x6   :  { %v4523_v17 = vor.u32 %v5297_v15, %v4522_v14  ;;  %v5295_v21 = vld [vmem:[%s8661_s1 + $0xc4] sm:$0xf0]  ;;  %v4451_v22 = vor.u32 %v5279_v19, %v4450_v18  ;;  %v4442_v24 = vld [vmem:[%s8661_s1 + $0x30] sm:$0xf]  ;;  %v5277_v25 = vld [vmem:[%s8661_s1 + $0x34] sm:$0xf0] }
   0x7   :  { %v4515_v23 = vor.u32 %v5295_v21, %v4514_v20  ;;  %v4506_v26 = vld [vmem:[%s8661_s1 + $0xb0] sm:$0xf]  ;;  %v5293_v27 = vld [vmem:[%s8661_s1 + $0xb4] sm:$0xf0]  ;;  %v4443_v28 = vor.u32 %v5277_v25, %v4442_v24  ;;  %v4434_v30 = vld [vmem:[%s8661_s1 + $0x20] sm:$0xf] }
   0x8   :  { %5439 = vmatpush.bf16.msra.mxu2 %v4467_v10  ;;  %2002 = vmatpush.bf16.msra.mxu0 %v4467_v10  ;;  %v4507_v29 = vor.u32 %v5293_v27, %v4506_v26  ;;  %v5275_v31 = vld [vmem:[%s8661_s1 + $0x24] sm:$0xf0]  ;;  %v4498_v32 = vld [vmem:[%s8661_s1 + $0xa0] sm:$0xf]  ;;  %v4426_v36 = vld [vmem:[%s8661_s1 + $0x10] sm:$0xf] }
   0x9   :  { %5447 = vmatpush.bf16.msra.mxu3 %v4531_v11  ;;  %2081 = vmatpush.bf16.msra.mxu1 %v4531_v11  ;;  %v5291_v33 = vld [vmem:[%s8661_s1 + $0xa4] sm:$0xf0]  ;;  %v4435_v34 = vor.u32 %v5275_v31, %v4434_v30  ;;  %v5273_v37 = vld [vmem:[%s8661_s1 + $0x14] sm:$0xf0]  ;;  %v4490_v38 = vld [vmem:[%s8661_s1 + $0x90] sm:$0xf] }
   0xa   :  { %v4499_v35 = vor.u32 %v5291_v33, %v4498_v32  ;;  %v5289_v39 = vld [vmem:[%s8661_s1 + $0x94] sm:$0xf0]  ;;  %v4427_v40 = vor.u32 %v5273_v37, %v4426_v36  ;;  %v4418_v41 = vld [vmem:[%s8661_s1] sm:$0xf]  ;;  %v5271_v43 = vld [vmem:[%s8661_s1 + $0x4] sm:$0xf0] }
   0xb   :  { %v4491_v42 = vor.u32 %v5289_v39, %v4490_v38  ;;  %v4482_v44 = vld [vmem:[%s8661_s1 + $0x80] sm:$0xf]  ;;  %v5287_v45 = vld [vmem:[%s8661_s1 + $0x84] sm:$0xf0]  ;;  %v5198_v47 = vld [vmem:[%s8662_s0 + $0x290] sm:$0xf0]  ;;  %v4419_v54 = vor.u32 %v5271_v43, %v4418_v41 }
   0xc   :  { %5440 = vmatpush.bf16.msra.mxu2 %v4459_v16  ;;  %2003 = vmatpush.bf16.msra.mxu0 %v4459_v16  ;;  %v4110_v46 = vld [vmem:[%s8662_s0 + $0x268] sm:$0xf]  ;;  %v4602_v48 = vld [vmem:[%s8661_s1 + $0x170] sm:$0xf]  ;;  %v5193_v49 = vld [vmem:[%s8662_s0 + $0x26c] sm:$0xf]  ;;  %v4483_v58 = vor.u32 %v5287_v45, %v4482_v44 }
   0xd   :  { %5448 = vmatpush.bf16.msra.mxu3 %v4523_v17  ;;  %2082 = vmatpush.bf16.msra.mxu1 %v4523_v17  ;;  %v4112_v50 = vld [vmem:[%s8662_s0 + $0x294] sm:$0xf0]  ;;  %v4666_v52 = vld [vmem:[%s8661_s1 + $0x1f0] sm:$0xf]  ;;  %v3802_v55 = vld [vmem:[%s8662_s0] sm:$0xf]  ;;  %v5616_v3 = vor.u32 %v5198_v47, %v4110_v46 }
   0xe   :  { %v5317_v51 = vld [vmem:[%s8661_s1 + $0x174] sm:$0xf0]  ;;  %v5121_v56 = vld [vmem:[%s8662_s0 + $0x28] sm:$0xf0]  ;;  %v5116_v57 = vld [vmem:[%s8662_s0 + $0x4] sm:$0xf]  ;;  %v5629_v8 = vor.u32 %v5193_v49, %v4112_v50 }
   0xf   :  { %v5333_v53 = vld [vmem:[%s8661_s1 + $0x1f4] sm:$0xf0]  ;;  %v3804_v59 = vld [vmem:[%s8662_s0 + $0x2c] sm:$0xf0]  ;;  %v4603_v62 = vor.u32 %v5317_v51, %v4602_v48  ;;  %v4594_v2 = vld [vmem:[%s8661_s1 + $0x160] sm:$0xf]  ;;  %v5618_v4 = vor.u32 %v5121_v56, %v3802_v55 }
  0x10   :  { %5441 = vmatpush.bf16.msra.mxu2 %v4451_v22  ;;  %2004 = vmatpush.bf16.msra.mxu0 %v4451_v22  ;;  %v4730_v60 = vld [vmem:[%s8661_s1 + $0x270] sm:$0xf]  ;;  %v5349_v61 = vld [vmem:[%s8661_s1 + $0x274] sm:$0xf0]  ;;  %v4667_v63 = vor.u32 %v5333_v53, %v4666_v52  ;;  %8790 = vst [vmem:[#allocation2_spill] sm:$0xff] %v5616_v3  ;;  %v5631_v9 = vor.u32 %v5116_v57, %v3804_v59 }
  0x11   :  { %5449 = vmatpush.bf16.msra.mxu3 %v4515_v23  ;;  %2083 = vmatpush.bf16.msra.mxu1 %v4515_v23  ;;  %v4794_v0 = vld [vmem:[%s8661_s1 + $0x2f0] sm:$0xf]  ;;  %v5365_v1 = vld [vmem:[%s8661_s1 + $0x2f4] sm:$0xf0]  ;;  %v5315_v5 = vld [vmem:[%s8661_s1 + $0x164] sm:$0xf0]  ;;  %v4731_v10 = vor.u32 %v5349_v61, %v4730_v60 }
  0x12   :  { %v4658_v6 = vld [vmem:[%s8661_s1 + $0x1e0] sm:$0xf]  ;;  %v5331_v7 = vld [vmem:[%s8661_s1 + $0x1e4] sm:$0xf0]  ;;  %8791 = vst [vmem:[#allocation3_spill] sm:$0xff] %v5629_v8  ;;  %v4795_v11 = vor.u32 %v5365_v1, %v4794_v0  ;;  %v4595_v14 = vor.u32 %v5315_v5, %v4594_v2 }
  0x13   :  { %v4722_v12 = vld [vmem:[%s8661_s1 + $0x260] sm:$0xf]  ;;  %v5347_v13 = vld [vmem:[%s8661_s1 + $0x264] sm:$0xf0]  ;;  %v4659_v15 = vor.u32 %v5331_v7, %v4658_v6  ;;  %v4586_v18 = vld [vmem:[%s8661_s1 + $0x150] sm:$0xf] }
  0x14   :  { %5442 = vmatpush.bf16.msra.mxu2 %v4443_v28  ;;  %2005 = vmatpush.bf16.msra.mxu0 %v4443_v28  ;;  %v4786_v16 = vld [vmem:[%s8661_s1 + $0x2e0] sm:$0xf]  ;;  %v5363_v17 = vld [vmem:[%s8661_s1 + $0x2e4] sm:$0xf0]  ;;  %v5313_v19 = vld [vmem:[%s8661_s1 + $0x154] sm:$0xf0]  ;;  %v4723_v22 = vor.u32 %v5347_v13, %v4722_v12 }
  0x15   :  { %5450 = vmatpush.bf16.msra.mxu3 %v4507_v29  ;;  %2084 = vmatpush.bf16.msra.mxu1 %v4507_v29  ;;  %v4650_v20 = vld [vmem:[%s8661_s1 + $0x1d0] sm:$0xf]  ;;  %v5329_v21 = vld [vmem:[%s8661_s1 + $0x1d4] sm:$0xf0]  ;;  %v4787_v23 = vor.u32 %v5363_v17, %v4786_v16  ;;  %v4587_v26 = vor.u32 %v5313_v19, %v4586_v18  ;;  %v4578_v30 = vld [vmem:[%s8661_s1 + $0x140] sm:$0xf] }
  0x16   :  { %v4714_v24 = vld [vmem:[%s8661_s1 + $0x250] sm:$0xf]  ;;  %v5345_v25 = vld [vmem:[%s8661_s1 + $0x254] sm:$0xf0]  ;;  %v4651_v27 = vor.u32 %v5329_v21, %v4650_v20  ;;  %v5311_v31 = vld [vmem:[%s8661_s1 + $0x144] sm:$0xf0] }
  0x17   :  { %v4778_v28 = vld [vmem:[%s8661_s1 + $0x2d0] sm:$0xf]  ;;  %v5361_v29 = vld [vmem:[%s8661_s1 + $0x2d4] sm:$0xf0]  ;;  %v4642_v32 = vld [vmem:[%s8661_s1 + $0x1c0] sm:$0xf]  ;;  %v4579_v36 = vor.u32 %v5311_v31, %v4578_v30 }
  0x18   :  { %5443 = vmatpush.bf16.msra.mxu2 %v4435_v34  ;;  %2006 = vmatpush.bf16.msra.mxu0 %v4435_v34  ;;  %v5327_v33 = vld [vmem:[%s8661_s1 + $0x1c4] sm:$0xf0]  ;;  %v4715_v34 = vor.u32 %v5345_v25, %v4714_v24  ;;  %v4154_v38 = vld [vmem:[%s8662_s0 + $0x2c0] sm:$0xf]  ;;  %v5209_v39 = vld [vmem:[%s8662_s0 + $0x2e8] sm:$0xf0] }
  0x19   :  { %5451 = vmatpush.bf16.msra.mxu3 %v4499_v35  ;;  %2085 = vmatpush.bf16.msra.mxu1 %v4499_v35  ;;  %v4779_v35 = vor.u32 %v5361_v29, %v4778_v28  ;;  %v4643_v37 = vor.u32 %v5327_v33, %v4642_v32  ;;  %v3846_v41 = vld [vmem:[%s8662_s0 + $0x58] sm:$0xf]  ;;  %v4156_v43 = vld [vmem:[%s8662_s0 + $0x2ec] sm:$0xf0]  ;;  %v5127_v44 = vld [vmem:[%s8662_s0 + $0x5c] sm:$0xf]  ;;  %v5709_v46 = vor.u32 %v5209_v39, %v4154_v38 }
  0x1a   :  { %v3848_v45 = vld [vmem:[%s8662_s0 + $0x84] sm:$0xf0]  ;;  %v4706_v50 = vld [vmem:[%s8661_s1 + $0x240] sm:$0xf]  ;;  %v4570_v55 = vld [vmem:[%s8661_s1 + $0x130] sm:$0xf] }
  0x1b   :  { %8792 = vst [vmem:[#allocation4_spill] sm:$0xff] %v5709_v46  ;;  %v5715_v49 = vor.u32 %v5127_v44, %v3848_v45  ;;  %v5343_v51 = vld [vmem:[%s8661_s1 + $0x244] sm:$0xf0]  ;;  %v4770_v53 = vld [vmem:[%s8661_s1 + $0x2c0] sm:$0xf] }
  0x1c   :  { %5444 = vmatpush.bf16.msra.mxu2 %v4427_v40  ;;  %2007 = vmatpush.bf16.msra.mxu0 %v4427_v40  ;;  %v5204_v40 = vld [vmem:[%s8662_s0 + $0x2c4] sm:$0xf]  ;;  %v4707_v52 = vor.u32 %v5343_v51, %v4706_v50  ;;  %v5309_v57 = vld [vmem:[%s8661_s1 + $0x134] sm:$0xf0]  ;;  %v5215_v0 = vld [vmem:[%s8662_s0 + $0x31c] sm:$0xf] }
  0x1d   :  { %5452 = vmatpush.bf16.msra.mxu3 %v4491_v42  ;;  %2086 = vmatpush.bf16.msra.mxu1 %v4491_v42  ;;  %v5132_v42 = vld [vmem:[%s8662_s0 + $0x80] sm:$0xf0]  ;;  %v5713_v48 = vor.u32 %v5204_v40, %v4156_v43  ;;  %v5325_v59 = vld [vmem:[%s8661_s1 + $0x1b4] sm:$0xf0]  ;;  %v4571_v60 = vor.u32 %v5309_v57, %v4570_v55  ;;  %v3890_v1 = vld [vmem:[%s8662_s0 + $0xb0] sm:$0xf] }
  0x1e   :  { %v5711_v47 = vor.u32 %v5132_v42, %v3846_v41  ;;  %v5143_v2 = vld [vmem:[%s8662_s0 + $0xd8] sm:$0xf0]  ;;  %v4200_v5 = vld [vmem:[%s8662_s0 + $0x344] sm:$0xf0]  ;;  %v5138_v6 = vld [vmem:[%s8662_s0 + $0xb4] sm:$0xf] }
  0x1f   :  { %8793 = vst [vmem:[#allocation5_spill] sm:$0xff] %v5713_v48  ;;  %v3892_v7 = vld [vmem:[%s8662_s0 + $0xdc] sm:$0xf0]  ;;  %v5773_v12 = vor.u32 %v5215_v0, %v4200_v5  ;;  %v4762_v17 = vld [vmem:[%s8661_s1 + $0x2b0] sm:$0xf] }
  0x20   :  { %5445 = vmatpush.bf16.msra.mxu2 %v4419_v54  ;;  %2008 = vmatpush.bf16.msra.mxu0 %v4419_v54  ;;  %v5359_v54 = vld [vmem:[%s8661_s1 + $0x2c4] sm:$0xf0]  ;;  %v5775_v13 = vor.u32 %v5138_v6, %v3892_v7  ;;  %v5357_v18 = vld [vmem:[%s8661_s1 + $0x2b4] sm:$0xf0]  ;;  %v4562_v19 = vld [vmem:[%s8661_s1 + $0x120] sm:$0xf] }
  0x21   :  { %5453 = vmatpush.bf16.msra.mxu3 %v4483_v58  ;;  %2087 = vmatpush.bf16.msra.mxu1 %v4483_v58  ;;  %v4771_v56 = vor.u32 %v5359_v54, %v4770_v53  ;;  %v4634_v58 = vld [vmem:[%s8661_s1 + $0x1b0] sm:$0xf]  ;;  %8795 = vst [vmem:[#allocation7_spill] sm:$0xff] %v5773_v12  ;;  %v4763_v20 = vor.u32 %v5357_v18, %v4762_v17  ;;  %v5307_v21 = vld [vmem:[%s8661_s1 + $0x124] sm:$0xf0] }
  0x22   :  { %v4635_v61 = vor.u32 %v5325_v59, %v4634_v58  ;;  %v4563_v24 = vor.u32 %v5307_v21, %v4562_v19  ;;  %v5226_v28 = vld [vmem:[%s8662_s0 + $0x374] sm:$0xf]  ;;  %v3934_v29 = vld [vmem:[%s8662_s0 + $0x108] sm:$0xf]  ;;  %v4244_v31 = vld [vmem:[%s8662_s0 + $0x39c] sm:$0xf0] }
  0x23   :  { %2044 = vmatmul.bf16.vlgmr.msra.gmra.mxu2 %v5616_v3  ;;  %2009 = vmatmul.bf16.vlgmr.msra.gmra.mxu0 %v5618_v4  ;;  %v5154_v30 = vld [vmem:[%s8662_s0 + $0x130] sm:$0xf0]  ;;  %v5149_v32 = vld [vmem:[%s8662_s0 + $0x10c] sm:$0xf]  ;;  %v3936_v33 = vld [vmem:[%s8662_s0 + $0x134] sm:$0xf0] }
  0x24   :  { %2159 = vmatpush.bf16.msrb.mxu2 %v4603_v62  ;;  %2123 = vmatmul.bf16.vlgmr.msra.gmra.mxu3 %v5629_v8  ;;  %v4198_v62 = vld [vmem:[%s8662_s0 + $0x318] sm:$0xf]  ;;  %v4690_v38 = vld [vmem:[%s8661_s1 + $0x220] sm:$0xf]  ;;  %v5339_v39 = vld [vmem:[%s8661_s1 + $0x224] sm:$0xf0] }
  0x25   :  { %2238 = vmatpush.bf16.msrb.mxu3 %v4667_v63  ;;  %2088 = vmatmul.bf16.vlgmr.msra.gmra.mxu1 %v5631_v9  ;;  %v5220_v63 = vld [vmem:[%s8662_s0 + $0x340] sm:$0xf0]  ;;  %v4691_v40 = vor.u32 %v5339_v39, %v4690_v38  ;;  %v4754_v41 = vld [vmem:[%s8661_s1 + $0x2a0] sm:$0xf]  ;;  %v5355_v42 = vld [vmem:[%s8661_s1 + $0x2a4] sm:$0xf0] }
  0x26   :  { %2317 = vmatpush.bf16.msrb.mxu0 %v4731_v10  ;;  %2396 = vmatpush.bf16.msrb.mxu1 %v4795_v11  ;;  %v5769_v10 = vor.u32 %v5220_v63, %v4198_v62  ;;  %v5771_v11 = vor.u32 %v5143_v2, %v3890_v1  ;;  %v4554_v43 = vld [vmem:[%s8661_s1 + $0x110] sm:$0xf]  ;;  %v4755_v44 = vor.u32 %v5355_v42, %v4754_v41  ;;  %v5305_v45 = vld [vmem:[%s8661_s1 + $0x114] sm:$0xf0]  ;;  %v4286_v57 = vld [vmem:[%s8662_s0 + $0x3c8] sm:$0xf] }
  0x27   :  { %v4618_v50 = vld [vmem:[%s8661_s1 + $0x190] sm:$0xf]  ;;  %v5321_v51 = vld [vmem:[%s8661_s1 + $0x194] sm:$0xf0]  ;;  %v5242_v58 = vld [vmem:[%s8662_s0 + $0x3f0] sm:$0xf0] }
  0x28   :  { %2160 = vmatpush.bf16.msrb.mxu2 %v4595_v14  ;;  %8794 = vst [vmem:[#allocation6_spill] sm:$0xff] %v5769_v10  ;;  %v4698_v14 = vld [vmem:[%s8661_s1 + $0x230] sm:$0xf]  ;;  %v4619_v53 = vor.u32 %v5321_v51, %v4618_v50  ;;  %v5337_v55 = vld [vmem:[%s8661_s1 + $0x214] sm:$0xf0]  ;;  %v5895_v1 = vor.u32 %v5242_v58, %v4286_v57 }
  0x29   :  { %2239 = vmatpush.bf16.msrb.mxu3 %v4659_v15  ;;  %v5341_v15 = vld [vmem:[%s8661_s1 + $0x234] sm:$0xf0]  ;;  %v4682_v54 = vld [vmem:[%s8661_s1 + $0x210] sm:$0xf]  ;;  %v5237_v59 = vld [vmem:[%s8662_s0 + $0x3cc] sm:$0xf] }
  0x2a   :  { %2318 = vmatpush.bf16.msrb.mxu0 %v4723_v22  ;;  %2397 = vmatpush.bf16.msrb.mxu1 %v4787_v23  ;;  %v4699_v16 = vor.u32 %v5341_v15, %v4698_v14  ;;  %v4626_v22 = vld [vmem:[%s8661_s1 + $0x1a0] sm:$0xf]  ;;  %v5323_v23 = vld [vmem:[%s8661_s1 + $0x1a4] sm:$0xf0]  ;;  %v4288_v62 = vld [vmem:[%s8662_s0 + $0x3f4] sm:$0xf0] }
  0x2b   :  { %v4627_v25 = vor.u32 %v5323_v23, %v4626_v22  ;;  %v5160_v63 = vld [vmem:[%s8662_s0 + $0x164] sm:$0xf]  ;;  %v3980_v0 = vld [vmem:[%s8662_s0 + $0x18c] sm:$0xf0]  ;;  %8799 = vst [vmem:[#allocation11_spill] sm:$0xff] %v5895_v1  ;;  %v5899_v5 = vor.u32 %v5237_v59, %v4288_v62 }
  0x2c   :  { %2161 = vmatpush.bf16.msrb.mxu2 %v4587_v26  ;;  %v4242_v26 = vld [vmem:[%s8662_s0 + $0x370] sm:$0xf]  ;;  %v5901_v6 = vor.u32 %v5160_v63, %v3980_v0  ;;  %v5353_v14 = vld [vmem:[%s8661_s1 + $0x294] sm:$0xf0]  ;;  %v5303_v17 = vld [vmem:[%s8661_s1 + $0x104] sm:$0xf0] }
  0x2d   :  { %2240 = vmatpush.bf16.msrb.mxu3 %v4651_v27  ;;  %v5231_v27 = vld [vmem:[%s8662_s0 + $0x398] sm:$0xf0]  ;;  %8801 = vst [vmem:[#allocation13_spill] sm:$0xff] %v5899_v5  ;;  %v4746_v7 = vld [vmem:[%s8661_s1 + $0x290] sm:$0xf] }
  0x2e   :  { %2319 = vmatpush.bf16.msrb.mxu0 %v4715_v34  ;;  %2398 = vmatpush.bf16.msrb.mxu1 %v4779_v35  ;;  %v5829_v34 = vor.u32 %v5231_v27, %v4242_v26  ;;  %v5831_v35 = vor.u32 %v5154_v30, %v3934_v29  ;;  %8802 = vst [vmem:[#allocation14_spill] sm:$0xff] %v5901_v6  ;;  %v4610_v18 = vld [vmem:[%s8661_s1 + $0x180] sm:$0xf]  ;;  %v5335_v22 = vld [vmem:[%s8661_s1 + $0x204] sm:$0xf0] }
  0x2f   :  { %v4747_v15 = vor.u32 %v5353_v14, %v4746_v7  ;;  %v4674_v21 = vld [vmem:[%s8661_s1 + $0x200] sm:$0xf]  ;;  %v5351_v26 = vld [vmem:[%s8661_s1 + $0x284] sm:$0xf0]  ;;  %v5253_v29 = vld [vmem:[%s8662_s0 + $0x448] sm:$0xf0] }
  0x30   :  { %2162 = vmatpush.bf16.msrb.mxu2 %v4579_v36  ;;  %8796 = vst [vmem:[#allocation8_spill] sm:$0xff] %v5829_v34  ;;  %v5833_v36 = vor.u32 %v5226_v28, %v4244_v31  ;;  %v4330_v28 = vld [vmem:[%s8662_s0 + $0x420] sm:$0xf]  ;;  %v5248_v30 = vld [vmem:[%s8662_s0 + $0x424] sm:$0xf] }
  0x31   :  { %2241 = vmatpush.bf16.msrb.mxu3 %v4643_v37  ;;  %8797 = vst [vmem:[#allocation9_spill] sm:$0xff] %v5831_v35  ;;  %v5835_v37 = vor.u32 %v5149_v32, %v3936_v33  ;;  %v4022_v31 = vld [vmem:[%s8662_s0 + $0x1b8] sm:$0xf]  ;;  %v5176_v32 = vld [vmem:[%s8662_s0 + $0x1e0] sm:$0xf0] }
  0x32   :  { %2320 = vmatpush.bf16.msrb.mxu0 %v4707_v52  ;;  %2399 = vmatpush.bf16.msrb.mxu1 %v4771_v56  ;;  %8798 = vst [vmem:[#allocation10_spill] sm:$0xff] %v5833_v36  ;;  %v4555_v52 = vor.u32 %v5305_v45, %v4554_v43  ;;  %v4683_v56 = vor.u32 %v5337_v55, %v4682_v54  ;;  %v4332_v33 = vld [vmem:[%s8662_s0 + $0x44c] sm:$0xf0]  ;;  %v5171_v38 = vld [vmem:[%s8662_s0 + $0x1bc] sm:$0xf] }
  0x33   :  { %2049 = vmatmul.bf16.gmra.mxu2 %v5709_v46  ;;  %2014 = vmatmul.bf16.gmra.mxu0 %v5711_v47  ;;  %v4024_v39 = vld [vmem:[%s8662_s0 + $0x1e4] sm:$0xf0]  ;;  %v5963_v41 = vor.u32 %v5176_v32, %v4022_v31  ;;  %v5965_v42 = vor.u32 %v5248_v30, %v4332_v33  ;;  %v5381_v45 = vld [vmem:[%s8661_s1 + $0x374] sm:$0xf0]  ;;  %v4922_v50 = vld [vmem:[%s8661_s1 + $0x3f0] sm:$0xf] }
  0x34   :  { %2128 = vmatmul.bf16.gmra.mxu3 %v5713_v48  ;;  %2163 = vmatpush.bf16.msrb.mxu2 %v4571_v60  ;;  %v3978_v60 = vld [vmem:[%s8662_s0 + $0x160] sm:$0xf]  ;;  %v5967_v43 = vor.u32 %v5171_v38, %v4024_v39  ;;  %v4986_v54 = vld [vmem:[%s8661_s1 + $0x470] sm:$0xf]  ;;  %v5413_v55 = vld [vmem:[%s8661_s1 + $0x474] sm:$0xf0] }
  0x35   :  { %2093 = vmatmul.bf16.gmra.mxu1 %v5715_v49  ;;  %2242 = vmatpush.bf16.msrb.mxu3 %v4635_v61  ;;  %v5165_v61 = vld [vmem:[%s8662_s0 + $0x188] sm:$0xf0]  ;;  %8804 = vst [vmem:[#allocation16_spill] sm:$0xff] %v5963_v41  ;;  %v4987_v57 = vor.u32 %v5413_v55, %v4986_v54  ;;  %v5429_v58 = vld [vmem:[%s8661_s1 + $0x4f4] sm:$0xf0] }
  0x36   :  { %2321 = vmatpush.bf16.msrb.mxu0 %v4699_v16  ;;  %2400 = vmatpush.bf16.msrb.mxu1 %v4763_v20  ;;  %v5897_v2 = vor.u32 %v5165_v61, %v3978_v60  ;;  %v4546_v16 = vld [vmem:[%s8661_s1 + $0x100] sm:$0xf]  ;;  %v5319_v20 = vld [vmem:[%s8661_s1 + $0x184] sm:$0xf0]  ;;  %8805 = vst [vmem:[#allocation17_spill] sm:$0xff] %v5965_v42 }
  0x37   :  { %v4547_v19 = vor.u32 %v5303_v17, %v4546_v16  ;;  %v4611_v23 = vor.u32 %v5319_v20, %v4610_v18  ;;  %8806 = vst [vmem:[#allocation18_spill] sm:$0xff] %v5967_v43  ;;  %v4374_v60 = vld [vmem:[%s8662_s0 + $0x478] sm:$0xf]  ;;  %v5264_v61 = vld [vmem:[%s8662_s0 + $0x4a0] sm:$0xf0] }
  0x38   :  { %2164 = vmatpush.bf16.msrb.mxu2 %v4563_v24  ;;  %8800 = vst [vmem:[#allocation12_spill] sm:$0xff] %v5897_v2  ;;  %v4675_v24 = vor.u32 %v5335_v22, %v4674_v21  ;;  %v5259_v62 = vld [vmem:[%s8662_s0 + $0x47c] sm:$0xf]  ;;  %v4066_v63 = vld [vmem:[%s8662_s0 + $0x210] sm:$0xf]  ;;  %v6021_v16 = vor.u32 %v5264_v61, %v4374_v60 }
  0x39   :  { %2243 = vmatpush.bf16.msrb.mxu3 %v4627_v25  ;;  %v4738_v25 = vld [vmem:[%s8661_s1 + $0x280] sm:$0xf]  ;;  %v5187_v0 = vld [vmem:[%s8662_s0 + $0x238] sm:$0xf0]  ;;  %v4376_v7 = vld [vmem:[%s8662_s0 + $0x4a4] sm:$0xf0] }
  0x3a   :  { %2322 = vmatpush.bf16.msrb.mxu0 %v4691_v40  ;;  %2401 = vmatpush.bf16.msrb.mxu1 %v4755_v44  ;;  %v4739_v27 = vor.u32 %v5351_v26, %v4738_v25  ;;  %v5961_v40 = vor.u32 %v5253_v29, %v4330_v28  ;;  %v4858_v44 = vld [vmem:[%s8661_s1 + $0x370] sm:$0xf]  ;;  %v5182_v14 = vld [vmem:[%s8662_s0 + $0x214] sm:$0xf]  ;;  %8807 = vst [vmem:[#allocation19_spill] sm:$0xff] %v6021_v16 }
  0x3b   :  { %v4859_v51 = vor.u32 %v5381_v45, %v4858_v44  ;;  %v6023_v17 = vor.u32 %v5187_v0, %v4066_v63  ;;  %v6025_v18 = vor.u32 %v5259_v62, %v4376_v7  ;;  %v3810_v20 = vld [vmem:[%s8662_s0 + $0x8] sm:$0xf]  ;;  %v5122_v21 = vld [vmem:[%s8662_s0 + $0x30] sm:$0xf0]  ;;  %v5117_v22 = vld [vmem:[%s8662_s0 + $0xc] sm:$0xf] }
  0x3c   :  { %2165 = vmatpush.bf16.msrb.mxu2 %v4555_v52  ;;  %8803 = vst [vmem:[#allocation15_spill] sm:$0xff] %v5961_v40  ;;  %v5397_v52 = vld [vmem:[%s8661_s1 + $0x3f4] sm:$0xf0]  ;;  %v5118_v26 = vld [vmem:[%s8662_s0 + $0x14] sm:$0xf]  ;;  %v6057_v28 = vor.u32 %v5122_v21, %v3810_v20 }
  0x3d   :  { %2244 = vmatpush.bf16.msrb.mxu3 %v4619_v53  ;;  %v4923_v53 = vor.u32 %v5397_v52, %v4922_v50  ;;  %8808 = vst [vmem:[#allocation20_spill] sm:$0xff] %v6023_v17  ;;  %v3812_v25 = vld [vmem:[%s8662_s0 + $0x34] sm:$0xf0]  ;;  %v4850_v32 = vld [vmem:[%s8661_s1 + $0x360] sm:$0xf] }
  0x3e   :  { %2323 = vmatpush.bf16.msrb.mxu0 %v4683_v56  ;;  %2402 = vmatpush.bf16.msrb.mxu1 %v4747_v15  ;;  %v5050_v56 = vld [vmem:[%s8661_s1 + $0x4f0] sm:$0xf]  ;;  %v4068_v15 = vld [vmem:[%s8662_s0 + $0x23c] sm:$0xf0]  ;;  %8809 = vst [vmem:[#allocation21_spill] sm:$0xff] %v6025_v18  ;;  %v6061_v30 = vor.u32 %v5117_v22, %v3812_v25 }
  0x3f   :  { %v5051_v59 = vor.u32 %v5429_v58, %v5050_v56  ;;  %v5379_v33 = vld [vmem:[%s8661_s1 + $0x364] sm:$0xf0]  ;;  %v4914_v38 = vld [vmem:[%s8661_s1 + $0x3e0] sm:$0xf]  ;;  %v5133_v56 = vld [vmem:[%s8662_s0 + $0x88] sm:$0xf0] }
  0x40   :  { %2166 = vmatpush.bf16.msrb.mxu2 %v4547_v19  ;;  %v6027_v19 = vor.u32 %v5182_v14, %v4068_v15  ;;  %8812 = vst [vmem:[#allocation24_spill] sm:$0xff] %v6061_v30  ;;  %v4851_v39 = vor.u32 %v5379_v33, %v4850_v32  ;;  %v5395_v44 = vld [vmem:[%s8661_s1 + $0x3e4] sm:$0xf0]  ;;  %v4978_v50 = vld [vmem:[%s8661_s1 + $0x460] sm:$0xf] }
  0x41   :  { %2245 = vmatpush.bf16.msrb.mxu3 %v4611_v23  ;;  %v3818_v23 = vld [vmem:[%s8662_s0 + $0x10] sm:$0xf]  ;;  %v4915_v45 = vor.u32 %v5395_v44, %v4914_v38  ;;  %v5427_v54 = vld [vmem:[%s8661_s1 + $0x4e4] sm:$0xf0]  ;;  %v3854_v55 = vld [vmem:[%s8662_s0 + $0x60] sm:$0xf] }
  0x42   :  { %2324 = vmatpush.bf16.msrb.mxu0 %v4675_v24  ;;  %2403 = vmatpush.bf16.msrb.mxu1 %v4739_v27  ;;  %8810 = vst [vmem:[#allocation22_spill] sm:$0xff] %v6027_v19  ;;  %v5123_v24 = vld [vmem:[%s8662_s0 + $0x38] sm:$0xf0]  ;;  %v3820_v27 = vld [vmem:[%s8662_s0 + $0x3c] sm:$0xf0]  ;;  %v6117_v0 = vor.u32 %v5133_v56, %v3854_v55 }
  0x43   :  { %2054 = vmatmul.bf16.gmra.mxu2 %v5769_v10  ;;  %2019 = vmatmul.bf16.gmra.mxu0 %v5771_v11  ;;  %v6059_v29 = vor.u32 %v5123_v24, %v3818_v23  ;;  %v6063_v31 = vor.u32 %v5118_v26, %v3820_v27  ;;  %v5128_v58 = vld [vmem:[%s8662_s0 + $0x64] sm:$0xf]  ;;  %v5134_v60 = vld [vmem:[%s8662_s0 + $0x90] sm:$0xf0]  ;;  %v3856_v61 = vld [vmem:[%s8662_s0 + $0x8c] sm:$0xf0] }
  0x44   :  { %2133 = vmatmul.bf16.gmra.mxu3 %v5773_v12  ;;  %2475 = vmatpush.bf16.msra.mxu2 %v4859_v51  ;;  %v5411_v51 = vld [vmem:[%s8661_s1 + $0x464] sm:$0xf0]  ;;  %v5129_v62 = vld [vmem:[%s8662_s0 + $0x6c] sm:$0xf]  ;;  %v3864_v63 = vld [vmem:[%s8662_s0 + $0x94] sm:$0xf0]  ;;  %v6121_v15 = vor.u32 %v5128_v58, %v3856_v61 }
  0x45   :  { %2098 = vmatmul.bf16.gmra.mxu1 %v5775_v13  ;;  %2554 = vmatpush.bf16.msra.mxu3 %v4923_v53  ;;  %8811 = vst [vmem:[#allocation23_spill] sm:$0xff] %v6059_v29  ;;  %v4979_v52 = vor.u32 %v5411_v51, %v4978_v50  ;;  %v5042_v53 = vld [vmem:[%s8661_s1 + $0x4e0] sm:$0xf]  ;;  %v6123_v20 = vor.u32 %v5129_v62, %v3864_v63  ;;  %v4842_v33 = vld [vmem:[%s8661_s1 + $0x350] sm:$0xf] }
  0x46   :  { %2633 = vmatpush.bf16.msra.mxu0 %v4987_v57  ;;  %2712 = vmatpush.bf16.msra.mxu1 %v5051_v59  ;;  %8813 = vst [vmem:[#allocation25_spill] sm:$0xff] %v6063_v31  ;;  %v5043_v57 = vor.u32 %v5427_v54, %v5042_v53  ;;  %v3862_v59 = vld [vmem:[%s8662_s0 + $0x68] sm:$0xf]  ;;  %v5377_v38 = vld [vmem:[%s8661_s1 + $0x354] sm:$0xf0] }
  0x47   :  { %v6119_v7 = vor.u32 %v5134_v60, %v3862_v59  ;;  %8815 = vst [vmem:[#allocation27_spill] sm:$0xff] %v6121_v15  ;;  %v3898_v44 = vld [vmem:[%s8662_s0 + $0xb8] sm:$0xf]  ;;  %v4843_v50 = vor.u32 %v5377_v38, %v4842_v33  ;;  %v3906_v53 = vld [vmem:[%s8662_s0 + $0xc0] sm:$0xf] }
  0x48   :  { %2476 = vmatpush.bf16.msra.mxu2 %v4851_v39  ;;  %8816 = vst [vmem:[#allocation28_spill] sm:$0xff] %v6123_v20  ;;  %v4906_v39 = vld [vmem:[%s8661_s1 + $0x3d0] sm:$0xf]  ;;  %v5393_v51 = vld [vmem:[%s8661_s1 + $0x3d4] sm:$0xf0] }
  0x49   :  { %2555 = vmatpush.bf16.msra.mxu3 %v4915_v45  ;;  %8814 = vst [vmem:[#allocation26_spill] sm:$0xff] %v6119_v7  ;;  %v5144_v45 = vld [vmem:[%s8662_s0 + $0xe0] sm:$0xf0]  ;;  %v5145_v54 = vld [vmem:[%s8662_s0 + $0xe8] sm:$0xf0]  ;;  %v4907_v55 = vor.u32 %v5393_v51, %v4906_v39 }
  0x4a   :  { %2634 = vmatpush.bf16.msra.mxu0 %v4979_v52  ;;  %2713 = vmatpush.bf16.msra.mxu1 %v5043_v57  ;;  %v5139_v52 = vld [vmem:[%s8662_s0 + $0xbc] sm:$0xf]  ;;  %v3900_v56 = vld [vmem:[%s8662_s0 + $0xe4] sm:$0xf0]  ;;  %v5140_v57 = vld [vmem:[%s8662_s0 + $0xc4] sm:$0xf]  ;;  %v6171_v61 = vor.u32 %v5144_v45, %v3898_v44  ;;  %v6173_v62 = vor.u32 %v5145_v54, %v3906_v53 }
  0x4b   :  { %v3908_v58 = vld [vmem:[%s8662_s0 + $0xec] sm:$0xf0]  ;;  %v5409_v33 = vld [vmem:[%s8661_s1 + $0x454] sm:$0xf0] }
  0x4c   :  { %2477 = vmatpush.bf16.msra.mxu2 %v4843_v50  ;;  %8817 = vst [vmem:[#allocation29_spill] sm:$0xff] %v6173_v62  ;;  %v5034_v51 = vld [vmem:[%s8661_s1 + $0x4d0] sm:$0xf] }
  0x4d   :  { %2556 = vmatpush.bf16.msra.mxu3 %v4907_v55 }
  0x53   :  { %2059 = vmatmul.bf16.gmra.mxu2 %v5829_v34  ;;  %2024 = vmatmul.bf16.gmra.mxu0 %v5831_v35  ;;  %v5018_v34 = vld [vmem:[%s8661_s1 + $0x4b0] sm:$0xf] }
  0x54   :  { %2138 = vmatmul.bf16.gmra.mxu3 %v5833_v36 }
  0x55   :  { %2103 = vmatmul.bf16.gmra.mxu1 %v5835_v37 }
  0x63   :  { %2064 = vmatmul.bf16.gmra.mxu2 %v5895_v1  ;;  %2029 = vmatmul.bf16.gmra.mxu0 %v5897_v2 }
  0x64   :  { %2143 = vmatmul.bf16.gmra.mxu3 %v5899_v5 }
  0x65   :  { %2108 = vmatmul.bf16.gmra.mxu1 %v5901_v6 }
  0x73   :  { %2069 = vmatmul.bf16.gmra.mxu2 %v5961_v40  ;;  %2034 = vmatmul.bf16.gmra.mxu0 %v5963_v41 }
  0x74   :  { %2148 = vmatmul.bf16.gmra.mxu3 %v5965_v42 }
  0x75   :  { %2113 = vmatmul.bf16.gmra.mxu1 %v5967_v43 }
  0x83   :  { %2074 = vmatmul.bf16.gmra.mxu2 %v6021_v16  ;;  %2039 = vmatmul.bf16.gmra.mxu0 %v6023_v17 }
  0x84   :  { %2153 = vmatmul.bf16.gmra.mxu3 %v6025_v18 }
  0x85   :  { %2118 = vmatmul.bf16.gmra.mxu1 %v6027_v19 }
  0x93   :  { %2167 = vmatmul.bf16.vlgmr.msrb.gmra.mxu2 %v6057_v28  ;;  %2325 = vmatmul.bf16.vlgmr.msrb.gmra.mxu0 %v6059_v29 }
  0x94   :  { %2246 = vmatmul.bf16.vlgmr.msrb.gmra.mxu3 %v6061_v30 }
  0x95   :  { %2404 = vmatmul.bf16.vlgmr.msrb.gmra.mxu1 %v6063_v31 }
  0xa0   :  { %v2010_v14 = vpop.f32.mrf.mxu0 }
  0xa2   :  { %v2089_v21 = vpop.f32.mrf.mxu1 }
  0xa3   :  { %v6125_v22 = vadd.f32 %v2089_v21, %v2010_v14  ;;  %2172 = vmatmul.bf16.gmra.mxu2 %v6117_v0  ;;  %2330 = vmatmul.bf16.gmra.mxu0 %v6119_v7  ;;  %v6177_v21 = vor.u32 %v5139_v52, %v3900_v56  ;;  %v5425_v52 = vld [vmem:[%s8661_s1 + $0x4d4] sm:$0xf0]  ;;  %v3942_v56 = vld [vmem:[%s8662_s0 + $0x110] sm:$0xf] }
  0xa4   :  { %2251 = vmatmul.bf16.gmra.mxu3 %v6121_v15  ;;  %v5035_v54 = vor.u32 %v5425_v52, %v5034_v51  ;;  %v5407_v15 = vld [vmem:[%s8661_s1 + $0x444] sm:$0xf0] }
  0xa5   :  { %2409 = vmatmul.bf16.gmra.mxu1 %v6123_v20  ;;  %8818 = vst [vmem:[#allocation30_spill] sm:$0xff] %v6177_v21  ;;  %v4962_v20 = vld [vmem:[%s8661_s1 + $0x440] sm:$0xf] }
  0xa6   :  { %v2045_v23 = vpop.f32.mrf.mxu2  ;;  %2714 = vmatpush.bf16.msra.mxu1 %v5035_v54 }
  0xa7   :  { %v2124_v24 = vpop.f32.mrf.mxu3 }
  0xa8   :  { %v6131_v25 = vadd.f32 %v2124_v24, %v2045_v23  ;;  %v2012_v26 = vpop.f32.mrf.mxu0  ;;  %v6179_v23 = vor.u32 %v5140_v57, %v3908_v58  ;;  %v5155_v57 = vld [vmem:[%s8662_s0 + $0x138] sm:$0xf0]  ;;  %v5150_v58 = vld [vmem:[%s8662_s0 + $0x114] sm:$0xf] }
  0xaa   :  { %v2091_v27 = vpop.f32.mrf.mxu1  ;;  %8819 = vst [vmem:[#allocation31_spill] sm:$0xff] %v6179_v23 }
  0xab   :  { %v6133_v32 = vadd.f32 %v2091_v27, %v2012_v26  ;;  %v4970_v27 = vld [vmem:[%s8661_s1 + $0x450] sm:$0xf] }
  0xac   :  { %v4971_v38 = vor.u32 %v5409_v33, %v4970_v27  ;;  %v3952_v27 = vld [vmem:[%s8662_s0 + $0x144] sm:$0xf0] }
  0xae   :  { %v2047_v59 = vpop.f32.mrf.mxu2  ;;  %2635 = vmatpush.bf16.msra.mxu0 %v4971_v38 }
  0xaf   :  { %v2126_v60 = vpop.f32.mrf.mxu3 }
  0xb0   :  { %v6175_v63 = vadd.f32 %v2126_v60, %v2047_v59  ;;  %v2015_v14 = vpop.f32.mrf.mxu0  ;;  %v3950_v59 = vld [vmem:[%s8662_s0 + $0x118] sm:$0xf]  ;;  %v5156_v60 = vld [vmem:[%s8662_s0 + $0x140] sm:$0xf0] }
  0xb2   :  { %v2094_v24 = vpop.f32.mrf.mxu1 }
  0xb3   :  { %v6181_v26 = vadd.f32 %v2094_v24, %v2015_v14  ;;  %2177 = vmatmul.bf16.gmra.mxu2 %v6171_v61  ;;  %2335 = vmatmul.bf16.gmra.mxu0 %v6173_v62  ;;  %v3944_v14 = vld [vmem:[%s8662_s0 + $0x13c] sm:$0xf0]  ;;  %v5151_v24 = vld [vmem:[%s8662_s0 + $0x11c] sm:$0xf] }
  0xb4   :  { %2256 = vmatmul.bf16.gmra.mxu3 %v6177_v21  ;;  %v6233_v52 = vor.u32 %v5150_v58, %v3944_v14  ;;  %v4834_v58 = vld [vmem:[%s8661_s1 + $0x340] sm:$0xf]  ;;  %v5375_v14 = vld [vmem:[%s8661_s1 + $0x344] sm:$0xf0] }
  0xb5   :  { %2414 = vmatmul.bf16.gmra.mxu1 %v6179_v23 }
  0xb6   :  { %v2050_v39 = vpop.f32.mrf.mxu2  ;;  %8822 = vst [vmem:[#allocation34_spill] sm:$0xff] %v6233_v52 }
  0xb7   :  { %v2129_v44 = vpop.f32.mrf.mxu3 }
  0xb8   :  { %v6193_v45 = vadd.f32 %v2129_v44, %v2050_v39  ;;  %v2017_v50 = vpop.f32.mrf.mxu0  ;;  %v6227_v39 = vor.u32 %v5155_v57, %v3942_v56  ;;  %v6229_v44 = vor.u32 %v5156_v60, %v3950_v59 }
  0xba   :  { %v2096_v53 = vpop.f32.mrf.mxu1  ;;  %8820 = vst [vmem:[#allocation32_spill] sm:$0xff] %v6227_v39 }
  0xbb   :  { %v6201_v55 = vadd.f32 %v2096_v53, %v2017_v50  ;;  %8821 = vst [vmem:[#allocation33_spill] sm:$0xff] %v6229_v44  ;;  %v6235_v53 = vor.u32 %v5151_v24, %v3952_v27  ;;  %v4898_v24 = vld [vmem:[%s8661_s1 + $0x3c0] sm:$0xf] }
  0xbd   :  { %8823 = vst [vmem:[#allocation35_spill] sm:$0xff] %v6235_v53 }
  0xbe   :  { %v2052_v33 = vpop.f32.mrf.mxu2 }
  0xbf   :  { %v2131_v38 = vpop.f32.mrf.mxu3 }
  0xc0   :  { %v6231_v50 = vadd.f32 %v2131_v38, %v2052_v33  ;;  %v2020_v51 = vpop.f32.mrf.mxu0  ;;  %v4835_v33 = vor.u32 %v5375_v14, %v4834_v58  ;;  %v5391_v38 = vld [vmem:[%s8661_s1 + $0x3c4] sm:$0xf0]  ;;  %v5161_v58 = vld [vmem:[%s8662_s0 + $0x16c] sm:$0xf]  ;;  %v3994_v14 = vld [vmem:[%s8662_s0 + $0x170] sm:$0xf] }
  0xc2   :  { %v2099_v54 = vpop.f32.mrf.mxu1  ;;  %2478 = vmatpush.bf16.msra.mxu2 %v4835_v33  ;;  %v3996_v33 = vld [vmem:[%s8662_s0 + $0x19c] sm:$0xf0] }
  0xc3   :  { %v6237_v62 = vadd.f32 %v2099_v54, %v2020_v51  ;;  %2182 = vmatmul.bf16.gmra.mxu2 %v6227_v39  ;;  %2340 = vmatmul.bf16.gmra.mxu0 %v6229_v44  ;;  %v4899_v54 = vor.u32 %v5391_v38, %v4898_v24  ;;  %v3988_v24 = vld [vmem:[%s8662_s0 + $0x194] sm:$0xf0] }
  0xc4   :  { %2261 = vmatmul.bf16.gmra.mxu3 %v6233_v52  ;;  %v6289_v21 = vor.u32 %v5161_v58, %v3988_v24  ;;  %v5423_v58 = vld [vmem:[%s8661_s1 + $0x4c4] sm:$0xf0] }
  0xc5   :  { %2419 = vmatmul.bf16.gmra.mxu1 %v6235_v53  ;;  %2557 = vmatpush.bf16.msra.mxu3 %v4899_v54 }
  0xc6   :  { %v2055_v56 = vpop.f32.mrf.mxu2  ;;  %8826 = vst [vmem:[#allocation38_spill] sm:$0xff] %v6289_v21 }
  0xc7   :  { %v2134_v57 = vpop.f32.mrf.mxu3 }
  0xc8   :  { %v6243_v59 = vadd.f32 %v2134_v57, %v2055_v56  ;;  %v2022_v60 = vpop.f32.mrf.mxu0  ;;  %v3986_v56 = vld [vmem:[%s8662_s0 + $0x168] sm:$0xf]  ;;  %v5166_v57 = vld [vmem:[%s8662_s0 + $0x190] sm:$0xf0] }
  0xc9   :  { %v6283_v53 = vor.u32 %v5166_v57, %v3986_v56  ;;  %v4963_v56 = vor.u32 %v5407_v15, %v4962_v20 }
  0xca   :  { %v2101_v27 = vpop.f32.mrf.mxu1 }
  0xcb   :  { %v6257_v51 = vadd.f32 %v2101_v27, %v2022_v60  ;;  %v5167_v60 = vld [vmem:[%s8662_s0 + $0x198] sm:$0xf0]  ;;  %v5162_v27 = vld [vmem:[%s8662_s0 + $0x174] sm:$0xf]  ;;  %8824 = vst [vmem:[#allocation36_spill] sm:$0xff] %v6283_v53  ;;  %2636 = vmatpush.bf16.msra.mxu0 %v4963_v56 }
  0xcc   :  { %v6285_v52 = vor.u32 %v5167_v60, %v3994_v14  ;;  %v6291_v7 = vor.u32 %v5162_v27, %v3996_v33  ;;  %v4030_v33 = vld [vmem:[%s8662_s0 + $0x1c0] sm:$0xf]  ;;  %v4038_v56 = vld [vmem:[%s8662_s0 + $0x1c8] sm:$0xf] }
  0xce   :  { %v2057_v38 = vpop.f32.mrf.mxu2  ;;  %8825 = vst [vmem:[#allocation37_spill] sm:$0xff] %v6285_v52 }
  0xcf   :  { %v2136_v44 = vpop.f32.mrf.mxu3  ;;  %8827 = vst [vmem:[#allocation39_spill] sm:$0xff] %v6291_v7 }
  0xd0   :  { %v6287_v23 = vadd.f32 %v2136_v44, %v2057_v38  ;;  %v2025_v54 = vpop.f32.mrf.mxu0  ;;  %v5026_v44 = vld [vmem:[%s8661_s1 + $0x4c0] sm:$0xf]  ;;  %v5177_v38 = vld [vmem:[%s8662_s0 + $0x1e8] sm:$0xf0] }
  0xd1   :  { %v5027_v15 = vor.u32 %v5423_v58, %v5026_v44  ;;  %v5178_v44 = vld [vmem:[%s8662_s0 + $0x1f0] sm:$0xf0]  ;;  %v4032_v58 = vld [vmem:[%s8662_s0 + $0x1ec] sm:$0xf0] }
  0xd2   :  { %v2104_v29 = vpop.f32.mrf.mxu1 }
  0xd3   :  { %v6299_v57 = vadd.f32 %v2104_v29, %v2025_v54  ;;  %2187 = vmatmul.bf16.gmra.mxu2 %v6283_v53  ;;  %2345 = vmatmul.bf16.gmra.mxu0 %v6285_v52  ;;  %v5172_v54 = vld [vmem:[%s8662_s0 + $0x1c4] sm:$0xf]  ;;  %v6341_v52 = vor.u32 %v5178_v44, %v4038_v56 }
  0xd4   :  { %2266 = vmatmul.bf16.gmra.mxu3 %v6289_v21  ;;  %2715 = vmatpush.bf16.msra.mxu1 %v5027_v15  ;;  %v5173_v15 = vld [vmem:[%s8662_s0 + $0x1cc] sm:$0xf]  ;;  %v6345_v31 = vor.u32 %v5172_v54, %v4032_v58  ;;  %v5389_v54 = vld [vmem:[%s8661_s1 + $0x3b4] sm:$0xf0] }
  0xd5   :  { %2424 = vmatmul.bf16.gmra.mxu1 %v6291_v7  ;;  %8829 = vst [vmem:[#allocation41_spill] sm:$0xff] %v6341_v52 }
  0xd6   :  { %v2060_v29 = vpop.f32.mrf.mxu2  ;;  %8830 = vst [vmem:[#allocation42_spill] sm:$0xff] %v6345_v31 }
  0xd7   :  { %v2139_v20 = vpop.f32.mrf.mxu3 }
  0xd8   :  { %v6311_v14 = vadd.f32 %v2139_v20, %v2060_v29  ;;  %v2027_v60 = vpop.f32.mrf.mxu0  ;;  %v4040_v29 = vld [vmem:[%s8662_s0 + $0x1f4] sm:$0xf0] }
  0xd9   :  { %v6347_v30 = vor.u32 %v5173_v15, %v4040_v29 }
  0xda   :  { %v2106_v24 = vpop.f32.mrf.mxu1 }
  0xdb   :  { %v6313_v27 = vadd.f32 %v2106_v24, %v2027_v60  ;;  %v6339_v24 = vor.u32 %v5177_v38, %v4030_v33  ;;  %8831 = vst [vmem:[#allocation43_spill] sm:$0xff] %v6347_v30  ;;  %v4826_v33 = vld [vmem:[%s8661_s1 + $0x330] sm:$0xf]  ;;  %v5373_v38 = vld [vmem:[%s8661_s1 + $0x334] sm:$0xf0] }
  0xdd   :  { %8828 = vst [vmem:[#allocation40_spill] sm:$0xff] %v6339_v24 }
  0xde   :  { %v2062_v20 = vpop.f32.mrf.mxu2 }
  0xdf   :  { %v2141_v60 = vpop.f32.mrf.mxu3 }
  0xe0   :  { %v6343_v7 = vadd.f32 %v2141_v60, %v2062_v20  ;;  %v2030_v21 = vpop.f32.mrf.mxu0 }
  0xe2   :  { %v2109_v16 = vpop.f32.mrf.mxu1 }
  0xe3   :  { %v6349_v18 = vadd.f32 %v2109_v16, %v2030_v21  ;;  %2192 = vmatmul.bf16.gmra.mxu2 %v6339_v24  ;;  %2350 = vmatmul.bf16.gmra.mxu0 %v6341_v52  ;;  %v4890_v16 = vld [vmem:[%s8661_s1 + $0x3b0] sm:$0xf]  ;;  %v4827_v21 = vor.u32 %v5373_v38, %v4826_v33  ;;  %v5405_v33 = vld [vmem:[%s8661_s1 + $0x434] sm:$0xf0] }
  0xe4   :  { %2271 = vmatmul.bf16.gmra.mxu3 %v6345_v31  ;;  %v4891_v44 = vor.u32 %v5389_v54, %v4890_v16  ;;  %v4954_v52 = vld [vmem:[%s8661_s1 + $0x430] sm:$0xf]  ;;  %v4074_v38 = vld [vmem:[%s8662_s0 + $0x218] sm:$0xf]  ;;  %v5188_v16 = vld [vmem:[%s8662_s0 + $0x240] sm:$0xf0] }
  0xe5   :  { %2429 = vmatmul.bf16.gmra.mxu1 %v6347_v30  ;;  %2479 = vmatpush.bf16.msra.mxu2 %v4827_v21  ;;  %v4955_v21 = vor.u32 %v5405_v33, %v4954_v52  ;;  %v5183_v54 = vld [vmem:[%s8662_s0 + $0x21c] sm:$0xf]  ;;  %v5184_v52 = vld [vmem:[%s8662_s0 + $0x224] sm:$0xf]  ;;  %v6401_v30 = vor.u32 %v5188_v16, %v4074_v38 }
  0xe6   :  { %v2065_v56 = vpop.f32.mrf.mxu2  ;;  %2558 = vmatpush.bf16.msra.mxu3 %v4891_v44  ;;  %v5189_v44 = vld [vmem:[%s8662_s0 + $0x248] sm:$0xf0] }
  0xe7   :  { %v2144_v58 = vpop.f32.mrf.mxu3  ;;  %2637 = vmatpush.bf16.msra.mxu0 %v4955_v21  ;;  %8832 = vst [vmem:[#allocation44_spill] sm:$0xff] %v6401_v30  ;;  %v5421_v21 = vld [vmem:[%s8661_s1 + $0x4b4] sm:$0xf0] }
  0xe8   :  { %v6367_v15 = vadd.f32 %v2144_v58, %v2065_v56  ;;  %v2032_v29 = vpop.f32.mrf.mxu0  ;;  %v4082_v56 = vld [vmem:[%s8662_s0 + $0x220] sm:$0xf]  ;;  %v4076_v58 = vld [vmem:[%s8662_s0 + $0x244] sm:$0xf0]  ;;  %v5019_v38 = vor.u32 %v5421_v21, %v5018_v34  ;;  %v4118_v34 = vld [vmem:[%s8662_s0 + $0x270] sm:$0xf] }
  0xe9   :  { %v6403_v31 = vor.u32 %v5189_v44, %v4082_v56  ;;  %v6407_v1 = vor.u32 %v5183_v54, %v4076_v58  ;;  %v4120_v21 = vld [vmem:[%s8662_s0 + $0x29c] sm:$0xf0] }
  0xea   :  { %v2111_v20 = vpop.f32.mrf.mxu1  ;;  %2716 = vmatpush.bf16.msra.mxu1 %v5019_v38  ;;  %v5195_v38 = vld [vmem:[%s8662_s0 + $0x27c] sm:$0xf] }
  0xeb   :  { %v6369_v60 = vadd.f32 %v2111_v20, %v2032_v29  ;;  %v4084_v29 = vld [vmem:[%s8662_s0 + $0x24c] sm:$0xf0]  ;;  %8833 = vst [vmem:[#allocation45_spill] sm:$0xff] %v6403_v31 }
  0xec   :  { %8834 = vst [vmem:[#allocation46_spill] sm:$0xff] %v6407_v1  ;;  %v6409_v5 = vor.u32 %v5184_v52, %v4084_v29 }
  0xee   :  { %v2067_v20 = vpop.f32.mrf.mxu2  ;;  %8835 = vst [vmem:[#allocation47_spill] sm:$0xff] %v6409_v5 }
  0xef   :  { %v2146_v33 = vpop.f32.mrf.mxu3 }
  0xf0   :  { %v6405_v40 = vadd.f32 %v2146_v33, %v2067_v20  ;;  %v2035_v42 = vpop.f32.mrf.mxu0  ;;  %v4126_v20 = vld [vmem:[%s8662_s0 + $0x278] sm:$0xf]  ;;  %v5200_v33 = vld [vmem:[%s8662_s0 + $0x2a0] sm:$0xf0] }
  0xf2   :  { %v2114_v36 = vpop.f32.mrf.mxu1 }
  0xf3   :  { %v6417_v16 = vadd.f32 %v2114_v36, %v2035_v42  ;;  %2197 = vmatmul.bf16.gmra.mxu2 %v6401_v30  ;;  %2355 = vmatmul.bf16.gmra.mxu0 %v6403_v31  ;;  %v5199_v36 = vld [vmem:[%s8662_s0 + $0x298] sm:$0xf0]  ;;  %v5194_v42 = vld [vmem:[%s8662_s0 + $0x274] sm:$0xf]  ;;  %v6453_v31 = vor.u32 %v5200_v33, %v4126_v20 }
  0xf4   :  { %2276 = vmatmul.bf16.gmra.mxu3 %v6407_v1  ;;  %v6457_v10 = vor.u32 %v5194_v42, %v4120_v21  ;;  %v4882_v42 = vld [vmem:[%s8661_s1 + $0x3a0] sm:$0xf] }
  0xf5   :  { %2434 = vmatmul.bf16.gmra.mxu1 %v6409_v5  ;;  %8837 = vst [vmem:[#allocation49_spill] sm:$0xff] %v6453_v31 }
  0xf6   :  { %v2070_v54 = vpop.f32.mrf.mxu2  ;;  %8838 = vst [vmem:[#allocation50_spill] sm:$0xff] %v6457_v10 }
  0xf7   :  { %v2149_v56 = vpop.f32.mrf.mxu3 }
  0xf8   :  { %v6423_v44 = vadd.f32 %v2149_v56, %v2070_v54  ;;  %v2037_v58 = vpop.f32.mrf.mxu0  ;;  %v4128_v54 = vld [vmem:[%s8662_s0 + $0x2a4] sm:$0xf0] }
  0xf9   :  { %v6459_v12 = vor.u32 %v5195_v38, %v4128_v54 }
  0xfa   :  { %v2116_v52 = vpop.f32.mrf.mxu1 }
  0xfb   :  { %v6425_v29 = vadd.f32 %v2116_v52, %v2037_v58  ;;  %v6451_v52 = vor.u32 %v5199_v36, %v4118_v34  ;;  %8839 = vst [vmem:[#allocation51_spill] sm:$0xff] %v6459_v12  ;;  %v4818_v34 = vld [vmem:[%s8661_s1 + $0x320] sm:$0xf]  ;;  %v5371_v36 = vld [vmem:[%s8661_s1 + $0x324] sm:$0xf0] }
  0xfd   :  { %8836 = vst [vmem:[#allocation48_spill] sm:$0xff] %v6451_v52 }
  0xfe   :  { %v2072_v56 = vpop.f32.mrf.mxu2 }
  0xff   :  { %v2151_v58 = vpop.f32.mrf.mxu3 }
 0x100   :  { %v6455_v5 = vadd.f32 %v2151_v58, %v2072_v56  ;;  %v2040_v1 = vpop.f32.mrf.mxu0 }
 0x102   :  { %v2119_v46 = vpop.f32.mrf.mxu1 }
 0x103   :  { %v6461_v48 = vadd.f32 %v2119_v46, %v2040_v1  ;;  %2202 = vmatmul.bf16.gmra.mxu2 %v6451_v52  ;;  %2360 = vmatmul.bf16.gmra.mxu0 %v6453_v31  ;;  %v4819_v46 = vor.u32 %v5371_v36, %v4818_v34  ;;  %v5387_v1 = vld [vmem:[%s8661_s1 + $0x3a4] sm:$0xf0]  ;;  %v5210_v34 = vld [vmem:[%s8662_s0 + $0x2f0] sm:$0xf0]  ;;  %v5205_v36 = vld [vmem:[%s8662_s0 + $0x2cc] sm:$0xf] }
 0x104   :  { %2281 = vmatmul.bf16.gmra.mxu3 %v6457_v10  ;;  %v4883_v20 = vor.u32 %v5387_v1, %v4882_v42  ;;  %v4162_v31 = vld [vmem:[%s8662_s0 + $0x2c8] sm:$0xf]  ;;  %v4946_v42 = vld [vmem:[%s8661_s1 + $0x420] sm:$0xf] }
 0x105   :  { %2439 = vmatmul.bf16.gmra.mxu1 %v6459_v12  ;;  %2480 = vmatpush.bf16.msra.mxu2 %v4819_v46  ;;  %v5403_v46 = vld [vmem:[%s8661_s1 + $0x424] sm:$0xf0]  ;;  %v5010_v1 = vld [vmem:[%s8661_s1 + $0x4a0] sm:$0xf]  ;;  %v5206_v12 = vld [vmem:[%s8662_s0 + $0x2d4] sm:$0xf] }
 0x106   :  { %v2075_v33 = vpop.f32.mrf.mxu2  ;;  %2559 = vmatpush.bf16.msra.mxu3 %v4883_v20  ;;  %v4170_v20 = vld [vmem:[%s8662_s0 + $0x2d0] sm:$0xf]  ;;  %v4172_v10 = vld [vmem:[%s8662_s0 + $0x2fc] sm:$0xf0] }
 0x107   :  { %v2154_v21 = vpop.f32.mrf.mxu3  ;;  %v6527_v24 = vor.u32 %v5206_v12, %v4172_v10  ;;  %v4206_v10 = vld [vmem:[%s8662_s0 + $0x320] sm:$0xf]  ;;  %v5221_v12 = vld [vmem:[%s8662_s0 + $0x348] sm:$0xf0] }
 0x108   :  { %v6479_v38 = vadd.f32 %v2154_v21, %v2075_v33  ;;  %v2042_v54 = vpop.f32.mrf.mxu0  ;;  %v5211_v33 = vld [vmem:[%s8662_s0 + $0x2f8] sm:$0xf0]  ;;  %v4947_v21 = vor.u32 %v5403_v46, %v4946_v42  ;;  %v6519_v46 = vor.u32 %v5210_v34, %v4162_v31 }
 0x109   :  { %v6521_v8 = vor.u32 %v5211_v33, %v4170_v20  ;;  %8843 = vst [vmem:[#allocation55_spill] sm:$0xff] %v6527_v24  ;;  %v5216_v33 = vld [vmem:[%s8662_s0 + $0x324] sm:$0xf] }
 0x10a   :  { %v2121_v56 = vpop.f32.mrf.mxu1  ;;  %2638 = vmatpush.bf16.msra.mxu0 %v4947_v21  ;;  %8840 = vst [vmem:[#allocation52_spill] sm:$0xff] %v6519_v46  ;;  %v5369_v21 = vld [vmem:[%s8661_s1 + $0x314] sm:$0xf0] }
 0x10b   :  { %v6481_v58 = vadd.f32 %v2121_v56, %v2042_v54  ;;  %v5419_v54 = vld [vmem:[%s8661_s1 + $0x4a4] sm:$0xf0]  ;;  %v4164_v56 = vld [vmem:[%s8662_s0 + $0x2f4] sm:$0xf0]  ;;  %8841 = vst [vmem:[#allocation53_spill] sm:$0xff] %v6521_v8 }
 0x10c   :  { %v5011_v52 = vor.u32 %v5419_v54, %v5010_v1  ;;  %v6525_v19 = vor.u32 %v5205_v36, %v4164_v56  ;;  %v4874_v54 = vld [vmem:[%s8661_s1 + $0x390] sm:$0xf]  ;;  %v5222_v56 = vld [vmem:[%s8662_s0 + $0x350] sm:$0xf0] }
 0x10e   :  { %v2077_v3 = vpop.f32.mrf.mxu2  ;;  %2717 = vmatpush.bf16.msra.mxu1 %v5011_v52  ;;  %8842 = vst [vmem:[#allocation54_spill] sm:$0xff] %v6525_v19 }
 0x10f   :  { %v2156_v42 = vpop.f32.mrf.mxu3 }
 0x110   :  { %v6523_v30 = vadd.f32 %v2156_v42, %v2077_v3  ;;  %v2326_v17 = vpop.f32.mrf.mxu0 }
 0x112   :  { %v2405_v41 = vpop.f32.mrf.mxu1 }
 0x113   :  { %2207 = vmatmul.bf16.gmra.mxu2 %v6519_v46  ;;  %2365 = vmatmul.bf16.gmra.mxu0 %v6521_v8  ;;  %v6573_v46 = vor.u32 %v5221_v12, %v4206_v10 }
 0x114   :  { %2286 = vmatmul.bf16.gmra.mxu3 %v6525_v19 }
 0x115   :  { %2444 = vmatmul.bf16.gmra.mxu1 %v6527_v24  ;;  %8844 = vst [vmem:[#allocation56_spill] sm:$0xff] %v6573_v46 }
 0x116   :  { %v2168_v31 = vpop.f32.mrf.mxu2 }
 0x117   :  { %v2169_v34 = vadd.f32 %v2168_v31, %v6125_v22  ;;  %v2247_v52 = vpop.f32.mrf.mxu3  ;;  %v4810_v22 = vld [vmem:[%s8661_s1 + $0x310] sm:$0xf]  ;;  %v5385_v31 = vld [vmem:[%s8661_s1 + $0x394] sm:$0xf0] }
 0x118   :  { %v2328_v3 = vpop.f32.mrf.mxu0  ;;  %v4811_v42 = vor.u32 %v5369_v21, %v4810_v22  ;;  %v4875_v8 = vor.u32 %v5385_v31, %v4874_v54  ;;  %v5227_v31 = vld [vmem:[%s8662_s0 + $0x37c] sm:$0xf] }
 0x119   :  { %v2248_v1 = vadd.f32 %v2247_v52, %v2169_v34  ;;  %v4208_v34 = vld [vmem:[%s8662_s0 + $0x34c] sm:$0xf0]  ;;  %v5217_v52 = vld [vmem:[%s8662_s0 + $0x32c] sm:$0xf] }
 0x11a   :  { %v2407_v20 = vpop.f32.mrf.mxu1  ;;  %2481 = vmatpush.bf16.msra.mxu2 %v4811_v42  ;;  %2560 = vmatpush.bf16.msra.mxu3 %v4875_v8  ;;  %v6577_v2 = vor.u32 %v5216_v33, %v4208_v34  ;;  %v4938_v8 = vld [vmem:[%s8661_s1 + $0x410] sm:$0xf]  ;;  %v5232_v42 = vld [vmem:[%s8662_s0 + $0x3a0] sm:$0xf0]  ;;  %v5233_v34 = vld [vmem:[%s8662_s0 + $0x3a8] sm:$0xf0] }
 0x11b   :  { %v2327_v36 = vadd.f32 %v2326_v17, %v2248_v1  ;;  %v4214_v17 = vld [vmem:[%s8662_s0 + $0x328] sm:$0xf]  ;;  %v4216_v1 = vld [vmem:[%s8662_s0 + $0x354] sm:$0xf0] }
 0x11c   :  { %v6575_v43 = vor.u32 %v5222_v56, %v4214_v17  ;;  %8846 = vst [vmem:[#allocation58_spill] sm:$0xff] %v6577_v2  ;;  %v6579_v6 = vor.u32 %v5217_v52, %v4216_v1  ;;  %v4250_v17 = vld [vmem:[%s8662_s0 + $0x378] sm:$0xf]  ;;  %v4252_v1 = vld [vmem:[%s8662_s0 + $0x3a4] sm:$0xf0] }
 0x11d   :  { %v6570_v24 = vadd.f32 %v2405_v41, %v2327_v36  ;;  %v5401_v41 = vld [vmem:[%s8661_s1 + $0x414] sm:$0xf0] }
 0x11e   :  { %v2170_v22 = vpop.f32.mrf.mxu2  ;;  %8845 = vst [vmem:[#allocation57_spill] sm:$0xff] %v6575_v43 }
 0x11f   :  { %v2171_v21 = vadd.f32 %v2170_v22, %v6133_v32  ;;  %v2249_v19 = vpop.f32.mrf.mxu3  ;;  %8847 = vst [vmem:[#allocation59_spill] sm:$0xff] %v6579_v6  ;;  %v4939_v32 = vor.u32 %v5401_v41, %v4938_v8  ;;  %v5228_v22 = vld [vmem:[%s8662_s0 + $0x384] sm:$0xf] }
 0x120   :  { %v2331_v53 = vpop.f32.mrf.mxu0 }
 0x121   :  { %v2250_v39 = vadd.f32 %v2249_v19, %v2171_v21  ;;  %2639 = vmatpush.bf16.msra.mxu0 %v4939_v32  ;;  %v4260_v21 = vld [vmem:[%s8662_s0 + $0x3ac] sm:$0xf0] }
 0x122   :  { %v2410_v35 = vpop.f32.mrf.mxu1 }
 0x123   :  { %v2329_v54 = vadd.f32 %v2328_v3, %v2250_v39  ;;  %2212 = vmatmul.bf16.gmra.mxu2 %v6573_v46  ;;  %2370 = vmatmul.bf16.gmra.mxu0 %v6575_v43 }
 0x124   :  { %2291 = vmatmul.bf16.gmra.mxu3 %v6577_v2 }
 0x125   :  { %2449 = vmatmul.bf16.gmra.mxu1 %v6579_v6  ;;  %v6591_v19 = vadd.f32 %v2407_v20, %v2329_v54  ;;  %v5002_v20 = vld [vmem:[%s8661_s1 + $0x490] sm:$0xf] }
 0x126   :  { %v2173_v39 = vpop.f32.mrf.mxu2 }
 0x127   :  { %v2174_v3 = vadd.f32 %v2173_v39, %v6181_v26  ;;  %v2252_v10 = vpop.f32.mrf.mxu3  ;;  %v5417_v26 = vld [vmem:[%s8661_s1 + $0x494] sm:$0xf0]  ;;  %v6627_v39 = vor.u32 %v5232_v42, %v4250_v17 }
 0x128   :  { %v2333_v12 = vpop.f32.mrf.mxu0  ;;  %v5003_v52 = vor.u32 %v5417_v26, %v5002_v20  ;;  %v6633_v20 = vor.u32 %v5228_v22, %v4260_v21  ;;  %v4302_v22 = vld [vmem:[%s8662_s0 + $0x3d8] sm:$0xf]  ;;  %v5244_v21 = vld [vmem:[%s8662_s0 + $0x400] sm:$0xf0] }
 0x129   :  { %v2253_v36 = vadd.f32 %v2252_v10, %v2174_v3  ;;  %8848 = vst [vmem:[#allocation60_spill] sm:$0xff] %v6627_v39 }
 0x12a   :  { %v2412_v33 = vpop.f32.mrf.mxu1  ;;  %2718 = vmatpush.bf16.msra.mxu1 %v5003_v52  ;;  %8851 = vst [vmem:[#allocation63_spill] sm:$0xff] %v6633_v20 }
 0x12b   :  { %v2332_v56 = vadd.f32 %v2331_v53, %v2253_v36  ;;  %v4258_v53 = vld [vmem:[%s8662_s0 + $0x380] sm:$0xf]  ;;  %v6631_v36 = vor.u32 %v5227_v31, %v4252_v1 }
 0x12c   :  { %v6629_v3 = vor.u32 %v5233_v34, %v4258_v53  ;;  %v5243_v34 = vld [vmem:[%s8662_s0 + $0x3f8] sm:$0xf0]  ;;  %v4866_v1 = vld [vmem:[%s8661_s1 + $0x380] sm:$0xf] }
 0x12d   :  { %v6624_v54 = vadd.f32 %v2410_v35, %v2332_v56  ;;  %8850 = vst [vmem:[#allocation62_spill] sm:$0xff] %v6631_v36 }
 0x12e   :  { %v2175_v8 = vpop.f32.mrf.mxu2  ;;  %8849 = vst [vmem:[#allocation61_spill] sm:$0xff] %v6629_v3 }
 0x12f   :  { %v2176_v41 = vadd.f32 %v2175_v8, %v6201_v55  ;;  %v2254_v32 = vpop.f32.mrf.mxu3 }
 0x130   :  { %v2336_v10 = vpop.f32.mrf.mxu0 }
 0x131   :  { %v2255_v26 = vadd.f32 %v2254_v32, %v2176_v41  ;;  %v5383_v41 = vld [vmem:[%s8661_s1 + $0x384] sm:$0xf0]  ;;  %v4296_v32 = vld [vmem:[%s8662_s0 + $0x3fc] sm:$0xf0] }
 0x132   :  { %v2415_v43 = vpop.f32.mrf.mxu1 }
 0x133   :  { %v2334_v6 = vadd.f32 %v2333_v12, %v2255_v26  ;;  %2217 = vmatmul.bf16.gmra.mxu2 %v6627_v39  ;;  %2375 = vmatmul.bf16.gmra.mxu0 %v6629_v3  ;;  %v4294_v12 = vld [vmem:[%s8662_s0 + $0x3d0] sm:$0xf]  ;;  %v4304_v26 = vld [vmem:[%s8662_s0 + $0x404] sm:$0xf0]  ;;  %v6683_v3 = vor.u32 %v5244_v21, %v4302_v22 }
 0x134   :  { %2296 = vmatmul.bf16.gmra.mxu3 %v6631_v36 }
 0x135   :  { %2454 = vmatmul.bf16.gmra.mxu1 %v6633_v20  ;;  %v6639_v35 = vadd.f32 %v2412_v33, %v2334_v6  ;;  %v5238_v6 = vld [vmem:[%s8662_s0 + $0x3d4] sm:$0xf]  ;;  %v5367_v33 = vld [vmem:[%s8661_s1 + $0x304] sm:$0xf0]  ;;  %8853 = vst [vmem:[#allocation65_spill] sm:$0xff] %v6683_v3 }
 0x136   :  { %v2178_v55 = vpop.f32.mrf.mxu2  ;;  %v6685_v36 = vor.u32 %v5238_v6, %v4296_v32 }
 0x137   :  { %v2179_v17 = vadd.f32 %v2178_v55, %v6237_v62  ;;  %v2257_v56 = vpop.f32.mrf.mxu3  ;;  %v4802_v62 = vld [vmem:[%s8661_s1 + $0x300] sm:$0xf]  ;;  %v4867_v55 = vor.u32 %v5383_v41, %v4866_v1 }
 0x138   :  { %v2338_v42 = vpop.f32.mrf.mxu0  ;;  %v4803_v8 = vor.u32 %v5367_v33, %v4802_v62  ;;  %v6681_v33 = vor.u32 %v5243_v34, %v4294_v12  ;;  %8854 = vst [vmem:[#allocation66_spill] sm:$0xff] %v6685_v36 }
 0x139   :  { %v2258_v31 = vadd.f32 %v2257_v56, %v2179_v17  ;;  %2561 = vmatpush.bf16.msra.mxu3 %v4867_v55  ;;  %v5254_v55 = vld [vmem:[%s8662_s0 + $0x450] sm:$0xf0] }
 0x13a   :  { %v2417_v53 = vpop.f32.mrf.mxu1  ;;  %2482 = vmatpush.bf16.msra.mxu2 %v4803_v8  ;;  %8852 = vst [vmem:[#allocation64_spill] sm:$0xff] %v6681_v33 }
 0x13b   :  { %v2337_v52 = vadd.f32 %v2336_v10, %v2258_v31  ;;  %v5239_v10 = vld [vmem:[%s8662_s0 + $0x3dc] sm:$0xf] }
 0x13c   :  { %v6687_v2 = vor.u32 %v5239_v10, %v4304_v26  ;;  %v4338_v26 = vld [vmem:[%s8662_s0 + $0x428] sm:$0xf] }
 0x13d   :  { %v6678_v17 = vadd.f32 %v2415_v43, %v2337_v52  ;;  %v4930_v43 = vld [vmem:[%s8661_s1 + $0x400] sm:$0xf] }
 0x13e   :  { %v2180_v56 = vpop.f32.mrf.mxu2  ;;  %8855 = vst [vmem:[#allocation67_spill] sm:$0xff] %v6687_v2 }
 0x13f   :  { %v2181_v31 = vadd.f32 %v2180_v56, %v6257_v51  ;;  %v2259_v62 = vpop.f32.mrf.mxu3  ;;  %v5399_v51 = vld [vmem:[%s8661_s1 + $0x404] sm:$0xf0]  ;;  %v4340_v56 = vld [vmem:[%s8662_s0 + $0x454] sm:$0xf0] }
 0x140   :  { %v2341_v20 = vpop.f32.mrf.mxu0  ;;  %v4931_v12 = vor.u32 %v5399_v51, %v4930_v43 }
 0x141   :  { %v2260_v39 = vadd.f32 %v2259_v62, %v2181_v31  ;;  %v5250_v31 = vld [vmem:[%s8662_s0 + $0x434] sm:$0xf]  ;;  %v4348_v62 = vld [vmem:[%s8662_s0 + $0x45c] sm:$0xf0] }
 0x142   :  { %v2420_v46 = vpop.f32.mrf.mxu1  ;;  %2640 = vmatpush.bf16.msra.mxu0 %v4931_v12 }
 0x143   :  { %v2339_v1 = vadd.f32 %v2338_v42, %v2260_v39  ;;  %2222 = vmatmul.bf16.gmra.mxu2 %v6681_v33  ;;  %2380 = vmatmul.bf16.gmra.mxu0 %v6683_v3  ;;  %v4994_v39 = vld [vmem:[%s8661_s1 + $0x480] sm:$0xf]  ;;  %v5415_v42 = vld [vmem:[%s8661_s1 + $0x484] sm:$0xf0] }
 0x144   :  { %2301 = vmatmul.bf16.gmra.mxu3 %v6685_v36  ;;  %v4995_v34 = vor.u32 %v5415_v42, %v4994_v39  ;;  %v6735_v39 = vor.u32 %v5254_v55, %v4338_v26  ;;  %v4476_v26 = vld [vmem:[%s8661_s1 + $0x78] sm:$0xf0] }
 0x145   :  { %2459 = vmatmul.bf16.gmra.mxu1 %v6687_v2  ;;  %v6705_v52 = vadd.f32 %v2417_v53, %v2339_v1  ;;  %v5249_v53 = vld [vmem:[%s8662_s0 + $0x42c] sm:$0xf] }
 0x146   :  { %v2183_v6 = vpop.f32.mrf.mxu2  ;;  %2719 = vmatpush.bf16.msra.mxu1 %v4995_v34  ;;  %8856 = vst [vmem:[#allocation68_spill] sm:$0xff] %v6735_v39 }
 0x147   :  { %v2184_v22 = vadd.f32 %v2183_v6, %v6299_v57  ;;  %v2262_v21 = vpop.f32.mrf.mxu3  ;;  %v4346_v57 = vld [vmem:[%s8662_s0 + $0x430] sm:$0xf]  ;;  %v6739_v6 = vor.u32 %v5249_v53, %v4340_v56 }
 0x148   :  { %v2343_v8 = vpop.f32.mrf.mxu0 }
 0x149   :  { %v2263_v41 = vadd.f32 %v2262_v21, %v2184_v22  ;;  %8858 = vst [vmem:[#allocation70_spill] sm:$0xff] %v6739_v6  ;;  %v6741_v22 = vor.u32 %v5250_v31, %v4348_v62 }
 0x14a   :  { %v2422_v32 = vpop.f32.mrf.mxu1 }
 0x14b   :  { %v2342_v10 = vadd.f32 %v2341_v20, %v2263_v41  ;;  %v5255_v20 = vld [vmem:[%s8662_s0 + $0x458] sm:$0xf0]  ;;  %8859 = vst [vmem:[#allocation71_spill] sm:$0xff] %v6741_v22 }
 0x14c   :  { %v6737_v42 = vor.u32 %v5255_v20, %v4346_v57 }
 0x14d   :  { %v6732_v1 = vadd.f32 %v2420_v46, %v2342_v10  ;;  %v5437_v46 = vld [vmem:[%s8661_s1 + $0x534] sm:$0xf0] }
 0x14e   :  { %v2185_v43 = vpop.f32.mrf.mxu2  ;;  %8857 = vst [vmem:[#allocation69_spill] sm:$0xff] %v6737_v42 }
 0x14f   :  { %v2186_v51 = vadd.f32 %v2185_v43, %v6313_v27  ;;  %v2264_v12 = vpop.f32.mrf.mxu3  ;;  %v5082_v27 = vld [vmem:[%s8661_s1 + $0x530] sm:$0xf] }
 0x150   :  { %v2346_v34 = vpop.f32.mrf.mxu0  ;;  %v5083_v10 = vor.u32 %v5437_v46, %v5082_v27  ;;  %v5266_v27 = vld [vmem:[%s8662_s0 + $0x4b0] sm:$0xf0] }
 0x151   :  { %v2265_v21 = vadd.f32 %v2264_v12, %v2186_v51  ;;  %v4382_v51 = vld [vmem:[%s8662_s0 + $0x480] sm:$0xf] }
 0x152   :  { %v2425_v41 = vpop.f32.mrf.mxu1  ;;  %2795 = vmatpush.bf16.msrb.mxu2 %v5083_v10  ;;  %v5261_v10 = vld [vmem:[%s8662_s0 + $0x48c] sm:$0xf] }
 0x153   :  { %v2344_v3 = vadd.f32 %v2343_v8, %v2265_v21  ;;  %2227 = vmatmul.bf16.gmra.mxu2 %v6735_v39  ;;  %2385 = vmatmul.bf16.gmra.mxu0 %v6737_v42  ;;  %v5284_v8 = vld [vmem:[%s8661_s1 + $0x74] sm:$0xf]  ;;  %v5260_v21 = vld [vmem:[%s8662_s0 + $0x484] sm:$0xf] }
 0x154   :  { %2306 = vmatmul.bf16.gmra.mxu3 %v6739_v6  ;;  %v4479_v57 = vor.u32 %v5284_v8, %v4476_v26  ;;  %v4384_v8 = vld [vmem:[%s8662_s0 + $0x4ac] sm:$0xf0]  ;;  %v4392_v26 = vld [vmem:[%s8662_s0 + $0x4b4] sm:$0xf0] }
 0x155   :  { %2464 = vmatmul.bf16.gmra.mxu1 %v6741_v22  ;;  %v6759_v55 = vadd.f32 %v2422_v32, %v2344_v3  ;;  %v5265_v3 = vld [vmem:[%s8662_s0 + $0x4a8] sm:$0xf0]  ;;  %v5300_v32 = vld [vmem:[%s8661_s1 + $0xf4] sm:$0xf]  ;;  %v6799_v42 = vor.u32 %v5260_v21, %v4384_v8  ;;  %v6801_v22 = vor.u32 %v5261_v10, %v4392_v26  ;;  %v3826_v8 = vld [vmem:[%s8662_s0 + $0x18] sm:$0xf] }
 0x156   :  { %v2188_v53 = vpop.f32.mrf.mxu2  ;;  %2870 = vmatpush.bf16.msrb.mxu3 %v4479_v57  ;;  %v5124_v10 = vld [vmem:[%s8662_s0 + $0x40] sm:$0xf0]  ;;  %v3828_v26 = vld [vmem:[%s8662_s0 + $0x44] sm:$0xf0] }
 0x157   :  { %v2189_v20 = vadd.f32 %v2188_v53, %v6349_v18  ;;  %v2267_v56 = vpop.f32.mrf.mxu3  ;;  %v4540_v18 = vld [vmem:[%s8661_s1 + $0xf8] sm:$0xf0]  ;;  %8862 = vst [vmem:[#allocation74_spill] sm:$0xff] %v6799_v42 }
 0x158   :  { %v2348_v31 = vpop.f32.mrf.mxu0  ;;  %v4543_v46 = vor.u32 %v5300_v32, %v4540_v18  ;;  %8863 = vst [vmem:[#allocation75_spill] sm:$0xff] %v6801_v22 }
 0x159   :  { %v2268_v62 = vadd.f32 %v2267_v56, %v2189_v20 }
 0x15a   :  { %v2427_v43 = vpop.f32.mrf.mxu1  ;;  %2949 = vmatpush.bf16.msrb.mxu0 %v4543_v46 }
 0x15b   :  { %v2347_v12 = vadd.f32 %v2346_v34, %v2268_v62  ;;  %v4390_v34 = vld [vmem:[%s8662_s0 + $0x488] sm:$0xf]  ;;  %v6795_v62 = vor.u32 %v5265_v3, %v4382_v51 }
 0x15c   :  { %v6797_v32 = vor.u32 %v5266_v27, %v4390_v34 }
 0x15d   :  { %v6792_v53 = vadd.f32 %v2425_v41, %v2347_v12  ;;  %8860 = vst [vmem:[#allocation72_spill] sm:$0xff] %v6795_v62  ;;  %v4604_v41 = vld [vmem:[%s8661_s1 + $0x178] sm:$0xf0] }
 0x15e   :  { %v2190_v57 = vpop.f32.mrf.mxu2  ;;  %8861 = vst [vmem:[#allocation73_spill] sm:$0xff] %v6797_v32 }
 0x15f   :  { %v2191_v20 = vadd.f32 %v2190_v57, %v6369_v60  ;;  %v2269_v56 = vpop.f32.mrf.mxu3  ;;  %v5316_v60 = vld [vmem:[%s8661_s1 + $0x174] sm:$0xf]  ;;  %v5120_v57 = vld [vmem:[%s8662_s0 + $0x24] sm:$0xf] }
 0x160   :  { %v2351_v18 = vpop.f32.mrf.mxu0  ;;  %v4607_v51 = vor.u32 %v5316_v60, %v4604_v41 }
 0x161   :  { %v2270_v6 = vadd.f32 %v2269_v56, %v2191_v20  ;;  %v3836_v20 = vld [vmem:[%s8662_s0 + $0x4c] sm:$0xf0] }
 0x162   :  { %v2430_v2 = vpop.f32.mrf.mxu1  ;;  %3028 = vmatpush.bf16.msrb.mxu1 %v4607_v51  ;;  %v6843_v51 = vor.u32 %v5124_v10, %v3826_v8 }
 0x163   :  { %v2349_v36 = vadd.f32 %v2348_v31, %v2270_v6  ;;  %2232 = vmatmul.bf16.gmra.mxu2 %v6795_v62  ;;  %2390 = vmatmul.bf16.gmra.mxu0 %v6797_v32 }
 0x164   :  { %2311 = vmatmul.bf16.gmra.mxu3 %v6799_v42  ;;  %8864 = vst [vmem:[#allocation76_spill] sm:$0xff] %v6843_v51 }
 0x165   :  { %2469 = vmatmul.bf16.gmra.mxu1 %v6801_v22  ;;  %v6813_v12 = vadd.f32 %v2427_v43, %v2349_v36  ;;  %v5119_v36 = vld [vmem:[%s8662_s0 + $0x1c] sm:$0xf]  ;;  %v5125_v43 = vld [vmem:[%s8662_s0 + $0x48] sm:$0xf0] }
 0x166   :  { %v2193_v6 = vpop.f32.mrf.mxu2 }
 0x167   :  { %v2194_v31 = vadd.f32 %v2193_v6, %v6417_v16  ;;  %v2272_v3 = vpop.f32.mrf.mxu3  ;;  %v3834_v16 = vld [vmem:[%s8662_s0 + $0x20] sm:$0xf] }
 0x168   :  { %v2353_v21 = vpop.f32.mrf.mxu0  ;;  %v6845_v6 = vor.u32 %v5125_v43, %v3834_v16 }
 0x169   :  { %v2273_v34 = vadd.f32 %v2272_v3, %v2194_v31  ;;  %v6847_v3 = vor.u32 %v5119_v36, %v3828_v26  ;;  %v3870_v26 = vld [vmem:[%s8662_s0 + $0x70] sm:$0xf] }
 0x16a   :  { %v2432_v27 = vpop.f32.mrf.mxu1  ;;  %8865 = vst [vmem:[#allocation77_spill] sm:$0xff] %v6845_v6 }
 0x16b   :  { %v2352_v46 = vadd.f32 %v2351_v18, %v2273_v34  ;;  %8866 = vst [vmem:[#allocation78_spill] sm:$0xff] %v6847_v3  ;;  %v6849_v34 = vor.u32 %v5120_v57, %v3836_v20  ;;  %v5135_v57 = vld [vmem:[%s8662_s0 + $0x98] sm:$0xf0] }
 0x16d   :  { %v6840_v56 = vadd.f32 %v2430_v2, %v2352_v46  ;;  %8867 = vst [vmem:[#allocation79_spill] sm:$0xff] %v6849_v34  ;;  %v5282_v2 = vld [vmem:[%s8661_s1 + $0x64] sm:$0xf] }
 0x16e   :  { %v2195_v18 = vpop.f32.mrf.mxu2 }
 0x16f   :  { %v2196_v60 = vadd.f32 %v2195_v18, %v6425_v29  ;;  %v2274_v41 = vpop.f32.mrf.mxu3  ;;  %v4468_v29 = vld [vmem:[%s8661_s1 + $0x68] sm:$0xf0]  ;;  %v5314_v18 = vld [vmem:[%s8661_s1 + $0x164] sm:$0xf] }
 0x170   :  { %v2356_v31 = vpop.f32.mrf.mxu0  ;;  %v4471_v46 = vor.u32 %v5282_v2, %v4468_v29  ;;  %v4596_v2 = vld [vmem:[%s8661_s1 + $0x168] sm:$0xf0]  ;;  %v3872_v29 = vld [vmem:[%s8662_s0 + $0x9c] sm:$0xf0] }
 0x171   :  { %v2275_v32 = vadd.f32 %v2274_v41, %v2196_v60  ;;  %v3878_v60 = vld [vmem:[%s8662_s0 + $0x78] sm:$0xf]  ;;  %v5136_v41 = vld [vmem:[%s8662_s0 + $0xa0] sm:$0xf0] }
 0x172   :  { %v2435_v22 = vpop.f32.mrf.mxu1  ;;  %2871 = vmatpush.bf16.msrb.mxu3 %v4471_v46  ;;  %v5131_v46 = vld [vmem:[%s8662_s0 + $0x7c] sm:$0xf] }
 0x173   :  { %v2354_v42 = vadd.f32 %v2353_v21, %v2275_v32  ;;  %2483 = vmatmul.bf16.vlgmr.msra.gmra.mxu2 %v6843_v51  ;;  %2641 = vmatmul.bf16.vlgmr.msra.gmra.mxu0 %v6845_v6  ;;  %v6903_v6 = vor.u32 %v5135_v57, %v3870_v26 }
 0x174   :  { %2562 = vmatmul.bf16.vlgmr.msra.gmra.mxu3 %v6847_v3 }
 0x175   :  { %2720 = vmatmul.bf16.vlgmr.msra.gmra.mxu1 %v6849_v34  ;;  %v6861_v8 = vadd.f32 %v2432_v27, %v2354_v42  ;;  %v5130_v42 = vld [vmem:[%s8662_s0 + $0x74] sm:$0xf]  ;;  %v4532_v27 = vld [vmem:[%s8661_s1 + $0xe8] sm:$0xf0]  ;;  %8868 = vst [vmem:[#allocation80_spill] sm:$0xff] %v6903_v6  ;;  %v6905_v34 = vor.u32 %v5136_v41, %v3878_v60 }
 0x176   :  { %v2198_v32 = vpop.f32.mrf.mxu2  ;;  %v6907_v51 = vor.u32 %v5130_v42, %v3872_v29  ;;  %v5147_v29 = vld [vmem:[%s8662_s0 + $0xf8] sm:$0xf0] }
 0x177   :  { %v2199_v21 = vadd.f32 %v2198_v32, %v6461_v48  ;;  %v2277_v10 = vpop.f32.mrf.mxu3  ;;  %v5298_v48 = vld [vmem:[%s8661_s1 + $0xe4] sm:$0xf]  ;;  %v3880_v32 = vld [vmem:[%s8662_s0 + $0xa4] sm:$0xf0]  ;;  %8869 = vst [vmem:[#allocation81_spill] sm:$0xff] %v6905_v34 }
 0x178   :  { %v2358_v36 = vpop.f32.mrf.mxu0  ;;  %8870 = vst [vmem:[#allocation82_spill] sm:$0xff] %v6907_v51  ;;  %v6909_v62 = vor.u32 %v5131_v46, %v3880_v32  ;;  %v4460_v32 = vld [vmem:[%s8661_s1 + $0x58] sm:$0xf0] }
 0x179   :  { %v2278_v16 = vadd.f32 %v2277_v10, %v2199_v21  ;;  %v4599_v21 = vor.u32 %v5314_v18, %v4596_v2  ;;  %v5280_v2 = vld [vmem:[%s8661_s1 + $0x54] sm:$0xf] }
 0x17a   :  { %v2437_v43 = vpop.f32.mrf.mxu1  ;;  %8871 = vst [vmem:[#allocation83_spill] sm:$0xff] %v6909_v62 }
 0x17b   :  { %v2357_v20 = vadd.f32 %v2356_v31, %v2278_v16  ;;  %v4535_v31 = vor.u32 %v5298_v48, %v4532_v27  ;;  %3029 = vmatpush.bf16.msrb.mxu1 %v4599_v21  ;;  %v3916_v21 = vld [vmem:[%s8662_s0 + $0xf4] sm:$0xf0] }
 0x17d   :  { %v6900_v10 = vadd.f32 %v2435_v22, %v2357_v20  ;;  %2950 = vmatpush.bf16.msrb.mxu0 %v4535_v31  ;;  %v5435_v31 = vld [vmem:[%s8661_s1 + $0x524] sm:$0xf0] }
 0x17e   :  { %v2200_v16 = vpop.f32.mrf.mxu2 }
 0x17f   :  { %v2201_v48 = vadd.f32 %v2200_v16, %v6481_v58  ;;  %v2279_v27 = vpop.f32.mrf.mxu3  ;;  %v5142_v16 = vld [vmem:[%s8662_s0 + $0xd4] sm:$0xf] }
 0x180   :  { %v2361_v3 = vpop.f32.mrf.mxu0 }
 0x181   :  { %v2280_v39 = vadd.f32 %v2279_v27, %v2201_v48  ;;  %v3924_v48 = vld [vmem:[%s8662_s0 + $0xfc] sm:$0xf0]  ;;  %v4463_v27 = vor.u32 %v5280_v2, %v4460_v32 }
 0x182   :  { %v2440_v33 = vpop.f32.mrf.mxu1 }
 0x183   :  { %v2359_v18 = vadd.f32 %v2358_v36, %v2280_v39  ;;  %2488 = vmatmul.bf16.gmra.mxu2 %v6903_v6  ;;  %2646 = vmatmul.bf16.gmra.mxu0 %v6905_v34  ;;  %v3914_v39 = vld [vmem:[%s8662_s0 + $0xc8] sm:$0xf]  ;;  %v5146_v36 = vld [vmem:[%s8662_s0 + $0xf0] sm:$0xf0] }
 0x184   :  { %2567 = vmatmul.bf16.gmra.mxu3 %v6907_v51 }
 0x185   :  { %2725 = vmatmul.bf16.gmra.mxu1 %v6909_v62  ;;  %v6915_v58 = vadd.f32 %v2437_v43, %v2359_v18  ;;  %v5141_v43 = vld [vmem:[%s8662_s0 + $0xcc] sm:$0xf]  ;;  %2872 = vmatpush.bf16.msrb.mxu3 %v4463_v27  ;;  %v6963_v62 = vor.u32 %v5142_v16, %v3924_v48  ;;  %v5152_v16 = vld [vmem:[%s8662_s0 + $0x124] sm:$0xf]  ;;  %v3966_v48 = vld [vmem:[%s8662_s0 + $0x128] sm:$0xf] }
 0x186   :  { %v2203_v22 = vpop.f32.mrf.mxu2  ;;  %v6961_v34 = vor.u32 %v5141_v43, %v3916_v21  ;;  %v5157_v21 = vld [vmem:[%s8662_s0 + $0x148] sm:$0xf0]  ;;  %v5158_v27 = vld [vmem:[%s8662_s0 + $0x150] sm:$0xf0] }
 0x187   :  { %v2204_v26 = vadd.f32 %v2203_v22, %v6131_v25  ;;  %v2282_v57 = vpop.f32.mrf.mxu3  ;;  %v5074_v25 = vld [vmem:[%s8661_s1 + $0x520] sm:$0xf]  ;;  %8875 = vst [vmem:[#allocation87_spill] sm:$0xff] %v6963_v62 }
 0x188   :  { %v2363_v20 = vpop.f32.mrf.mxu0  ;;  %v5075_v46 = vor.u32 %v5435_v31, %v5074_v25  ;;  %8874 = vst [vmem:[#allocation86_spill] sm:$0xff] %v6961_v34 }
 0x189   :  { %v2283_v42 = vadd.f32 %v2282_v57, %v2204_v26 }
 0x18a   :  { %v2442_v60 = vpop.f32.mrf.mxu1  ;;  %2796 = vmatpush.bf16.msrb.mxu2 %v5075_v46  ;;  %v3958_v46 = vld [vmem:[%s8662_s0 + $0x120] sm:$0xf] }
 0x18b   :  { %v2362_v41 = vadd.f32 %v2361_v3, %v2283_v42  ;;  %v3922_v3 = vld [vmem:[%s8662_s0 + $0xd0] sm:$0xf]  ;;  %v6957_v42 = vor.u32 %v5146_v36, %v3914_v39 }
 0x18c   :  { %v6959_v25 = vor.u32 %v5147_v29, %v3922_v3 }
 0x18d   :  { %v6954_v18 = vadd.f32 %v2440_v33, %v2362_v41  ;;  %8872 = vst [vmem:[#allocation84_spill] sm:$0xff] %v6957_v42  ;;  %v4524_v33 = vld [vmem:[%s8661_s1 + $0xd8] sm:$0xf0] }
 0x18e   :  { %v2205_v22 = vpop.f32.mrf.mxu2  ;;  %8873 = vst [vmem:[#allocation85_spill] sm:$0xff] %v6959_v25 }
 0x18f   :  { %v2206_v26 = vadd.f32 %v2205_v22, %v6175_v63  ;;  %v2284_v57 = vpop.f32.mrf.mxu3  ;;  %v5296_v63 = vld [vmem:[%s8661_s1 + $0xd4] sm:$0xf] }
 0x190   :  { %v2366_v31 = vpop.f32.mrf.mxu0  ;;  %v4527_v39 = vor.u32 %v5296_v63, %v4524_v33 }
 0x191   :  { %v2285_v51 = vadd.f32 %v2284_v57, %v2206_v26  ;;  %v3960_v26 = vld [vmem:[%s8662_s0 + $0x14c] sm:$0xf0]  ;;  %v5153_v57 = vld [vmem:[%s8662_s0 + $0x12c] sm:$0xf] }
 0x192   :  { %v2445_v6 = vpop.f32.mrf.mxu1  ;;  %2951 = vmatpush.bf16.msrb.mxu0 %v4527_v39 }
 0x193   :  { %v2364_v2 = vadd.f32 %v2363_v20, %v2285_v51  ;;  %2493 = vmatmul.bf16.gmra.mxu2 %v6957_v42  ;;  %2651 = vmatmul.bf16.gmra.mxu0 %v6959_v25 }
 0x194   :  { %2572 = vmatmul.bf16.gmra.mxu3 %v6961_v34 }
 0x195   :  { %2730 = vmatmul.bf16.gmra.mxu1 %v6963_v62  ;;  %v6975_v36 = vadd.f32 %v2442_v60, %v2364_v2  ;;  %v5312_v60 = vld [vmem:[%s8661_s1 + $0x154] sm:$0xf] }
 0x196   :  { %v2208_v51 = vpop.f32.mrf.mxu2 }
 0x197   :  { %v2209_v20 = vadd.f32 %v2208_v51, %v6193_v45  ;;  %v2287_v41 = vpop.f32.mrf.mxu3  ;;  %v4588_v45 = vld [vmem:[%s8661_s1 + $0x158] sm:$0xf0]  ;;  %v7011_v51 = vor.u32 %v5157_v21, %v3958_v46 }
 0x198   :  { %v2368_v43 = vpop.f32.mrf.mxu0  ;;  %v4591_v22 = vor.u32 %v5312_v60, %v4588_v45 }
 0x199   :  { %v2288_v3 = vadd.f32 %v2287_v41, %v2209_v20  ;;  %8876 = vst [vmem:[#allocation88_spill] sm:$0xff] %v7011_v51  ;;  %v7013_v20 = vor.u32 %v5158_v27, %v3966_v48 }
 0x19a   :  { %v2447_v29 = vpop.f32.mrf.mxu1  ;;  %3030 = vmatpush.bf16.msrb.mxu1 %v4591_v22  ;;  %v5168_v22 = vld [vmem:[%s8662_s0 + $0x1a0] sm:$0xf0] }
 0x19b   :  { %v2367_v32 = vadd.f32 %v2366_v31, %v2288_v3  ;;  %v3968_v31 = vld [vmem:[%s8662_s0 + $0x154] sm:$0xf0]  ;;  %8877 = vst [vmem:[#allocation89_spill] sm:$0xff] %v7013_v20  ;;  %v7015_v3 = vor.u32 %v5152_v16, %v3960_v26  ;;  %v4010_v26 = vld [vmem:[%s8662_s0 + $0x180] sm:$0xf] }
 0x19c   :  { %v7017_v60 = vor.u32 %v5153_v57, %v3968_v31  ;;  %v5169_v57 = vld [vmem:[%s8662_s0 + $0x1a8] sm:$0xf0] }
 0x19d   :  { %v7008_v2 = vadd.f32 %v2445_v6, %v2367_v32  ;;  %8878 = vst [vmem:[#allocation90_spill] sm:$0xff] %v7015_v3 }
 0x19e   :  { %v2210_v63 = vpop.f32.mrf.mxu2  ;;  %8879 = vst [vmem:[#allocation91_spill] sm:$0xff] %v7017_v60 }
 0x19f   :  { %v2211_v33 = vadd.f32 %v2210_v63, %v6231_v50  ;;  %v2289_v39 = vpop.f32.mrf.mxu3  ;;  %v4004_v63 = vld [vmem:[%s8662_s0 + $0x1a4] sm:$0xf0] }
 0x1a0   :  { %v2371_v41 = vpop.f32.mrf.mxu0 }
 0x1a1   :  { %v2290_v45 = vadd.f32 %v2289_v39, %v2211_v33  ;;  %v5164_v33 = vld [vmem:[%s8662_s0 + $0x184] sm:$0xf]  ;;  %v4012_v39 = vld [vmem:[%s8662_s0 + $0x1ac] sm:$0xf0] }
 0x1a2   :  { %v2450_v25 = vpop.f32.mrf.mxu1 }
 0x1a3   :  { %v2369_v62 = vadd.f32 %v2368_v43, %v2290_v45  ;;  %2498 = vmatmul.bf16.gmra.mxu2 %v7011_v51  ;;  %2656 = vmatmul.bf16.gmra.mxu0 %v7013_v20  ;;  %v4002_v43 = vld [vmem:[%s8662_s0 + $0x178] sm:$0xf]  ;;  %v7065_v20 = vor.u32 %v5164_v33, %v4012_v39 }
 0x1a4   :  { %2577 = vmatmul.bf16.gmra.mxu3 %v7015_v3 }
 0x1a5   :  { %2735 = vmatmul.bf16.gmra.mxu1 %v7017_v60  ;;  %v7023_v50 = vadd.f32 %v2447_v29, %v2369_v62  ;;  %v5278_v62 = vld [vmem:[%s8661_s1 + $0x44] sm:$0xf]  ;;  %v5163_v29 = vld [vmem:[%s8662_s0 + $0x17c] sm:$0xf]  ;;  %8883 = vst [vmem:[#allocation95_spill] sm:$0xff] %v7065_v20 }
 0x1a6   :  { %v2213_v6 = vpop.f32.mrf.mxu2 }
 0x1a7   :  { %v2214_v46 = vadd.f32 %v2213_v6, %v6243_v59  ;;  %v2292_v32 = vpop.f32.mrf.mxu3  ;;  %v4452_v59 = vld [vmem:[%s8661_s1 + $0x48] sm:$0xf0] }
 0x1a8   :  { %v2373_v21 = vpop.f32.mrf.mxu0  ;;  %v4455_v31 = vor.u32 %v5278_v62, %v4452_v59  ;;  %v7063_v59 = vor.u32 %v5163_v29, %v4004_v63 }
 0x1a9   :  { %v2293_v16 = vadd.f32 %v2292_v32, %v2214_v46  ;;  %v7059_v32 = vor.u32 %v5168_v22, %v4002_v43 }
 0x1aa   :  { %v2452_v48 = vpop.f32.mrf.mxu1  ;;  %2873 = vmatpush.bf16.msrb.mxu3 %v4455_v31  ;;  %8882 = vst [vmem:[#allocation94_spill] sm:$0xff] %v7063_v59 }
 0x1ab   :  { %v2372_v27 = vadd.f32 %v2371_v41, %v2293_v16  ;;  %8880 = vst [vmem:[#allocation92_spill] sm:$0xff] %v7059_v32  ;;  %v7061_v16 = vor.u32 %v5169_v57, %v4010_v26 }
 0x1ad   :  { %v7056_v41 = vadd.f32 %v2450_v25, %v2372_v27  ;;  %8881 = vst [vmem:[#allocation93_spill] sm:$0xff] %v7061_v16  ;;  %v4516_v25 = vld [vmem:[%s8661_s1 + $0xc8] sm:$0xf0] }
 0x1ae   :  { %v2215_v45 = vpop.f32.mrf.mxu2 }
 0x1af   :  { %v2216_v6 = vadd.f32 %v2215_v45, %v6287_v23  ;;  %v2294_v46 = vpop.f32.mrf.mxu3  ;;  %v5294_v23 = vld [vmem:[%s8661_s1 + $0xc4] sm:$0xf]  ;;  %v4046_v45 = vld [vmem:[%s8662_s0 + $0x1d0] sm:$0xf] }
 0x1b0   :  { %v2376_v62 = vpop.f32.mrf.mxu0  ;;  %v4519_v43 = vor.u32 %v5294_v23, %v4516_v25  ;;  %v4056_v23 = vld [vmem:[%s8662_s0 + $0x204] sm:$0xf0] }
 0x1b1   :  { %v2295_v60 = vadd.f32 %v2294_v46, %v2216_v6  ;;  %v5179_v6 = vld [vmem:[%s8662_s0 + $0x1f8] sm:$0xf0]  ;;  %v4048_v46 = vld [vmem:[%s8662_s0 + $0x1fc] sm:$0xf0] }
 0x1b2   :  { %v2455_v3 = vpop.f32.mrf.mxu1  ;;  %2952 = vmatpush.bf16.msrb.mxu0 %v4519_v43 }
 0x1b3   :  { %v2374_v34 = vadd.f32 %v2373_v21, %v2295_v60  ;;  %2503 = vmatmul.bf16.gmra.mxu2 %v7059_v32  ;;  %2661 = vmatmul.bf16.gmra.mxu0 %v7061_v16  ;;  %v5310_v60 = vld [vmem:[%s8661_s1 + $0x144] sm:$0xf]  ;;  %v4580_v21 = vld [vmem:[%s8661_s1 + $0x148] sm:$0xf0] }
 0x1b4   :  { %2582 = vmatmul.bf16.gmra.mxu3 %v7063_v59  ;;  %v4583_v27 = vor.u32 %v5310_v60, %v4580_v21 }
 0x1b5   :  { %2740 = vmatmul.bf16.gmra.mxu1 %v7065_v20  ;;  %v7083_v22 = vadd.f32 %v2452_v48, %v2374_v34  ;;  %v5174_v34 = vld [vmem:[%s8662_s0 + $0x1d4] sm:$0xf]  ;;  %v5180_v48 = vld [vmem:[%s8662_s0 + $0x200] sm:$0xf0] }
 0x1b6   :  { %v2218_v29 = vpop.f32.mrf.mxu2  ;;  %3031 = vmatpush.bf16.msrb.mxu1 %v4583_v27  ;;  %v7113_v27 = vor.u32 %v5179_v6, %v4046_v45 }
 0x1b7   :  { %v2219_v26 = vadd.f32 %v2218_v29, %v6311_v14  ;;  %v2297_v57 = vpop.f32.mrf.mxu3  ;;  %v4054_v14 = vld [vmem:[%s8662_s0 + $0x1d8] sm:$0xf] }
 0x1b8   :  { %v2378_v31 = vpop.f32.mrf.mxu0  ;;  %8884 = vst [vmem:[#allocation96_spill] sm:$0xff] %v7113_v27  ;;  %v7115_v29 = vor.u32 %v5180_v48, %v4054_v14 }
 0x1b9   :  { %v2298_v63 = vadd.f32 %v2297_v57, %v2219_v26  ;;  %v7117_v57 = vor.u32 %v5174_v34, %v4048_v46 }
 0x1ba   :  { %v2457_v33 = vpop.f32.mrf.mxu1  ;;  %8885 = vst [vmem:[#allocation97_spill] sm:$0xff] %v7115_v29 }
 0x1bb   :  { %v2377_v39 = vadd.f32 %v2376_v62, %v2298_v63  ;;  %v5175_v62 = vld [vmem:[%s8662_s0 + $0x1dc] sm:$0xf]  ;;  %8886 = vst [vmem:[#allocation98_spill] sm:$0xff] %v7117_v57 }
 0x1bc   :  { %v7119_v63 = vor.u32 %v5175_v62, %v4056_v23 }
 0x1bd   :  { %v7110_v25 = vadd.f32 %v2455_v3, %v2377_v39  ;;  %v5433_v3 = vld [vmem:[%s8661_s1 + $0x514] sm:$0xf0]  ;;  %v4444_v39 = vld [vmem:[%s8661_s1 + $0x38] sm:$0xf0] }
 0x1be   :  { %v2220_v43 = vpop.f32.mrf.mxu2  ;;  %8887 = vst [vmem:[#allocation99_spill] sm:$0xff] %v7119_v63 }
 0x1bf   :  { %v2221_v60 = vadd.f32 %v2220_v43, %v6343_v7  ;;  %v2299_v21 = vpop.f32.mrf.mxu3  ;;  %v5066_v7 = vld [vmem:[%s8661_s1 + $0x510] sm:$0xf]  ;;  %v4090_v43 = vld [vmem:[%s8662_s0 + $0x228] sm:$0xf] }
 0x1c0   :  { %v2381_v26 = vpop.f32.mrf.mxu0 }
 0x1c1   :  { %v2300_v16 = vadd.f32 %v2299_v21, %v2221_v60  ;;  %v5185_v21 = vld [vmem:[%s8662_s0 + $0x22c] sm:$0xf] }
 0x1c2   :  { %v2460_v20 = vpop.f32.mrf.mxu1 }
 0x1c3   :  { %v2379_v59 = vadd.f32 %v2378_v31, %v2300_v16  ;;  %2508 = vmatmul.bf16.gmra.mxu2 %v7113_v27  ;;  %2666 = vmatmul.bf16.gmra.mxu0 %v7115_v29  ;;  %v5276_v16 = vld [vmem:[%s8661_s1 + $0x34] sm:$0xf]  ;;  %v5067_v31 = vor.u32 %v5433_v3, %v5066_v7  ;;  %v5191_v7 = vld [vmem:[%s8662_s0 + $0x258] sm:$0xf0] }
 0x1c4   :  { %2587 = vmatmul.bf16.gmra.mxu3 %v7117_v57  ;;  %v4447_v34 = vor.u32 %v5276_v16, %v4444_v39  ;;  %v4092_v16 = vld [vmem:[%s8662_s0 + $0x254] sm:$0xf0]  ;;  %v4100_v39 = vld [vmem:[%s8662_s0 + $0x25c] sm:$0xf0] }
 0x1c5   :  { %2745 = vmatmul.bf16.gmra.mxu1 %v7119_v63  ;;  %v7137_v45 = vadd.f32 %v2457_v33, %v2379_v59  ;;  %2797 = vmatpush.bf16.msrb.mxu2 %v5067_v31  ;;  %v5190_v59 = vld [vmem:[%s8662_s0 + $0x250] sm:$0xf0]  ;;  %v7177_v29 = vor.u32 %v5185_v21, %v4092_v16  ;;  %v4134_v16 = vld [vmem:[%s8662_s0 + $0x280] sm:$0xf] }
 0x1c6   :  { %v2223_v6 = vpop.f32.mrf.mxu2  ;;  %2874 = vmatpush.bf16.msrb.mxu3 %v4447_v34  ;;  %v5292_v33 = vld [vmem:[%s8661_s1 + $0xb4] sm:$0xf] }
 0x1c7   :  { %v2224_v14 = vadd.f32 %v2223_v6, %v6367_v15  ;;  %v2302_v48 = vpop.f32.mrf.mxu3  ;;  %v4508_v15 = vld [vmem:[%s8661_s1 + $0xb8] sm:$0xf0]  ;;  %v5186_v31 = vld [vmem:[%s8662_s0 + $0x234] sm:$0xf]  ;;  %8890 = vst [vmem:[#allocation102_spill] sm:$0xff] %v7177_v29 }
 0x1c8   :  { %v2383_v46 = vpop.f32.mrf.mxu0  ;;  %v4511_v3 = vor.u32 %v5292_v33, %v4508_v15  ;;  %v7179_v63 = vor.u32 %v5186_v31, %v4100_v39  ;;  %v5201_v31 = vld [vmem:[%s8662_s0 + $0x2a8] sm:$0xf0]  ;;  %v4136_v39 = vld [vmem:[%s8662_s0 + $0x2ac] sm:$0xf0] }
 0x1c9   :  { %v2303_v62 = vadd.f32 %v2302_v48, %v2224_v14 }
 0x1ca   :  { %v2462_v23 = vpop.f32.mrf.mxu1  ;;  %2953 = vmatpush.bf16.msrb.mxu0 %v4511_v3  ;;  %8891 = vst [vmem:[#allocation103_spill] sm:$0xff] %v7179_v63 }
 0x1cb   :  { %v2382_v60 = vadd.f32 %v2381_v26, %v2303_v62  ;;  %v4098_v26 = vld [vmem:[%s8662_s0 + $0x230] sm:$0xf]  ;;  %v7173_v62 = vor.u32 %v5190_v59, %v4090_v43 }
 0x1cc   :  { %v7175_v33 = vor.u32 %v5191_v7, %v4098_v26 }
 0x1cd   :  { %v7170_v6 = vadd.f32 %v2460_v20, %v2382_v60  ;;  %8888 = vst [vmem:[#allocation100_spill] sm:$0xff] %v7173_v62  ;;  %v4572_v20 = vld [vmem:[%s8661_s1 + $0x138] sm:$0xf0] }
 0x1ce   :  { %v2225_v34 = vpop.f32.mrf.mxu2  ;;  %8889 = vst [vmem:[#allocation101_spill] sm:$0xff] %v7175_v33 }
 0x1cf   :  { %v2226_v14 = vadd.f32 %v2225_v34, %v6405_v40  ;;  %v2304_v48 = vpop.f32.mrf.mxu3  ;;  %v5308_v40 = vld [vmem:[%s8661_s1 + $0x134] sm:$0xf]  ;;  %v5197_v34 = vld [vmem:[%s8662_s0 + $0x28c] sm:$0xf] }
 0x1d0   :  { %v2386_v15 = vpop.f32.mrf.mxu0  ;;  %v4575_v43 = vor.u32 %v5308_v40, %v4572_v20 }
 0x1d1   :  { %v2305_v57 = vadd.f32 %v2304_v48, %v2226_v14  ;;  %v4144_v14 = vld [vmem:[%s8662_s0 + $0x2b4] sm:$0xf0] }
 0x1d2   :  { %v2465_v27 = vpop.f32.mrf.mxu1  ;;  %3032 = vmatpush.bf16.msrb.mxu1 %v4575_v43  ;;  %v7221_v43 = vor.u32 %v5201_v31, %v4134_v16 }
 0x1d3   :  { %v2384_v32 = vadd.f32 %v2383_v46, %v2305_v57  ;;  %2513 = vmatmul.bf16.gmra.mxu2 %v7173_v62  ;;  %2671 = vmatmul.bf16.gmra.mxu0 %v7175_v33 }
 0x1d4   :  { %2592 = vmatmul.bf16.gmra.mxu3 %v7177_v29  ;;  %8892 = vst [vmem:[#allocation104_spill] sm:$0xff] %v7221_v43 }
 0x1d5   :  { %2750 = vmatmul.bf16.gmra.mxu1 %v7179_v63  ;;  %v7191_v60 = vadd.f32 %v2462_v23, %v2384_v32  ;;  %v5196_v32 = vld [vmem:[%s8662_s0 + $0x284] sm:$0xf]  ;;  %v5202_v23 = vld [vmem:[%s8662_s0 + $0x2b0] sm:$0xf0] }
 0x1d6   :  { %v2228_v57 = vpop.f32.mrf.mxu2 }
 0x1d7   :  { %v2229_v46 = vadd.f32 %v2228_v57, %v6423_v44  ;;  %v2307_v59 = vpop.f32.mrf.mxu3  ;;  %v4142_v44 = vld [vmem:[%s8662_s0 + $0x288] sm:$0xf] }
 0x1d8   :  { %v2388_v21 = vpop.f32.mrf.mxu0  ;;  %v7223_v57 = vor.u32 %v5202_v23, %v4142_v44 }
 0x1d9   :  { %v2308_v26 = vadd.f32 %v2307_v59, %v2229_v46  ;;  %v7225_v59 = vor.u32 %v5196_v32, %v4136_v39  ;;  %v4178_v39 = vld [vmem:[%s8662_s0 + $0x2d8] sm:$0xf] }
 0x1da   :  { %v2467_v7 = vpop.f32.mrf.mxu1  ;;  %8893 = vst [vmem:[#allocation105_spill] sm:$0xff] %v7223_v57 }
 0x1db   :  { %v2387_v3 = vadd.f32 %v2386_v15, %v2308_v26  ;;  %8894 = vst [vmem:[#allocation106_spill] sm:$0xff] %v7225_v59  ;;  %v7227_v26 = vor.u32 %v5197_v34, %v4144_v14  ;;  %v5212_v34 = vld [vmem:[%s8662_s0 + $0x300] sm:$0xf0] }
 0x1dd   :  { %v7218_v48 = vadd.f32 %v2465_v27, %v2387_v3  ;;  %8895 = vst [vmem:[#allocation107_spill] sm:$0xff] %v7227_v26  ;;  %v4436_v27 = vld [vmem:[%s8661_s1 + $0x28] sm:$0xf0] }
 0x1de   :  { %v2230_v15 = vpop.f32.mrf.mxu2 }
 0x1df   :  { %v2231_v40 = vadd.f32 %v2230_v15, %v6455_v5  ;;  %v2309_v20 = vpop.f32.mrf.mxu3  ;;  %v5274_v5 = vld [vmem:[%s8661_s1 + $0x24] sm:$0xf] }
 0x1e0   :  { %v2391_v46 = vpop.f32.mrf.mxu0  ;;  %v4439_v3 = vor.u32 %v5274_v5, %v4436_v27  ;;  %v5306_v15 = vld [vmem:[%s8661_s1 + $0x124] sm:$0xf]  ;;  %v4564_v5 = vld [vmem:[%s8661_s1 + $0x128] sm:$0xf0]  ;;  %v4180_v27 = vld [vmem:[%s8662_s0 + $0x304] sm:$0xf0] }
 0x1e1   :  { %v2310_v33 = vadd.f32 %v2309_v20, %v2231_v40  ;;  %v4186_v40 = vld [vmem:[%s8662_s0 + $0x2e0] sm:$0xf]  ;;  %v5213_v20 = vld [vmem:[%s8662_s0 + $0x308] sm:$0xf0] }
 0x1e2   :  { %v2470_v63 = vpop.f32.mrf.mxu1  ;;  %2875 = vmatpush.bf16.msrb.mxu3 %v4439_v3  ;;  %v5208_v3 = vld [vmem:[%s8662_s0 + $0x2e4] sm:$0xf] }
 0x1e3   :  { %v2389_v29 = vadd.f32 %v2388_v21, %v2310_v33  ;;  %2518 = vmatmul.bf16.gmra.mxu2 %v7221_v43  ;;  %2676 = vmatmul.bf16.gmra.mxu0 %v7223_v57  ;;  %v7281_v57 = vor.u32 %v5212_v34, %v4178_v39 }
 0x1e4   :  { %2597 = vmatmul.bf16.gmra.mxu3 %v7225_v59 }
 0x1e5   :  { %2755 = vmatmul.bf16.gmra.mxu1 %v7227_v26  ;;  %v7239_v16 = vadd.f32 %v2467_v7, %v2389_v29  ;;  %v5207_v29 = vld [vmem:[%s8662_s0 + $0x2dc] sm:$0xf]  ;;  %v4500_v7 = vld [vmem:[%s8661_s1 + $0xa8] sm:$0xf0]  ;;  %8896 = vst [vmem:[#allocation108_spill] sm:$0xff] %v7281_v57  ;;  %v7283_v26 = vor.u32 %v5213_v20, %v4186_v40 }
 0x1e6   :  { %v2233_v33 = vpop.f32.mrf.mxu2  ;;  %v7285_v43 = vor.u32 %v5207_v29, %v4180_v27  ;;  %v5224_v27 = vld [vmem:[%s8662_s0 + $0x360] sm:$0xf0] }
 0x1e7   :  { %v2234_v21 = vadd.f32 %v2233_v33, %v6479_v38  ;;  %v2312_v31 = vpop.f32.mrf.mxu3  ;;  %v5290_v38 = vld [vmem:[%s8661_s1 + $0xa4] sm:$0xf]  ;;  %v4188_v33 = vld [vmem:[%s8662_s0 + $0x30c] sm:$0xf0]  ;;  %8897 = vst [vmem:[#allocation109_spill] sm:$0xff] %v7283_v26 }
 0x1e8   :  { %v2393_v32 = vpop.f32.mrf.mxu0  ;;  %8898 = vst [vmem:[#allocation110_spill] sm:$0xff] %v7285_v43  ;;  %v7287_v62 = vor.u32 %v5208_v3, %v4188_v33  ;;  %v4428_v33 = vld [vmem:[%s8661_s1 + $0x18] sm:$0xf0] }
 0x1e9   :  { %v2313_v44 = vadd.f32 %v2312_v31, %v2234_v21  ;;  %v4567_v21 = vor.u32 %v5306_v15, %v4564_v5  ;;  %v5272_v5 = vld [vmem:[%s8661_s1 + $0x14] sm:$0xf] }
 0x1ea   :  { %v2472_v23 = vpop.f32.mrf.mxu1  ;;  %8899 = vst [vmem:[#allocation111_spill] sm:$0xff] %v7287_v62 }
 0x1eb   :  { %v2392_v14 = vadd.f32 %v2391_v46, %v2313_v44  ;;  %v4503_v46 = vor.u32 %v5290_v38, %v4500_v7  ;;  %3033 = vmatpush.bf16.msrb.mxu1 %v4567_v21  ;;  %v4224_v21 = vld [vmem:[%s8662_s0 + $0x35c] sm:$0xf0] }
 0x1ed   :  { %v7278_v31 = vadd.f32 %v2470_v63, %v2392_v14  ;;  %2954 = vmatpush.bf16.msrb.mxu0 %v4503_v46  ;;  %v5431_v46 = vld [vmem:[%s8661_s1 + $0x504] sm:$0xf0] }
 0x1ee   :  { %v2235_v44 = vpop.f32.mrf.mxu2 }
 0x1ef   :  { %v2236_v38 = vadd.f32 %v2235_v44, %v6523_v30  ;;  %v2314_v7 = vpop.f32.mrf.mxu3  ;;  %v5219_v44 = vld [vmem:[%s8662_s0 + $0x33c] sm:$0xf] }
 0x1f0   :  { %v2642_v59 = vpop.f32.mrf.mxu0 }
 0x1f1   :  { %v2315_v51 = vadd.f32 %v2314_v7, %v2236_v38  ;;  %v4232_v38 = vld [vmem:[%s8662_s0 + $0x364] sm:$0xf0]  ;;  %v4431_v7 = vor.u32 %v5272_v5, %v4428_v33 }
 0x1f2   :  { %v2721_v42 = vpop.f32.mrf.mxu1 }
 0x1f3   :  { %v2394_v15 = vadd.f32 %v2393_v32, %v2315_v51  ;;  %2523 = vmatmul.bf16.gmra.mxu2 %v7281_v57  ;;  %2681 = vmatmul.bf16.gmra.mxu0 %v7283_v26  ;;  %v4222_v51 = vld [vmem:[%s8662_s0 + $0x330] sm:$0xf]  ;;  %v5223_v32 = vld [vmem:[%s8662_s0 + $0x358] sm:$0xf0] }
 0x1f4   :  { %2602 = vmatmul.bf16.gmra.mxu3 %v7285_v43 }
 0x1f5   :  { %2760 = vmatmul.bf16.gmra.mxu1 %v7287_v62  ;;  %v7293_v30 = vadd.f32 %v2472_v23, %v2394_v15  ;;  %v5218_v23 = vld [vmem:[%s8662_s0 + $0x334] sm:$0xf]  ;;  %2876 = vmatpush.bf16.msrb.mxu3 %v4431_v7  ;;  %v7341_v62 = vor.u32 %v5219_v44, %v4232_v38  ;;  %v5229_v44 = vld [vmem:[%s8662_s0 + $0x38c] sm:$0xf]  ;;  %v4274_v38 = vld [vmem:[%s8662_s0 + $0x390] sm:$0xf] }
 0x1f6   :  { %v2484_v63 = vpop.f32.mrf.mxu2  ;;  %v7339_v26 = vor.u32 %v5218_v23, %v4224_v21  ;;  %v5234_v21 = vld [vmem:[%s8662_s0 + $0x3b0] sm:$0xf0]  ;;  %v5235_v7 = vld [vmem:[%s8662_s0 + $0x3b8] sm:$0xf0] }
 0x1f7   :  { %v2485_v39 = vadd.f32 %v2484_v63, %v6570_v24  ;;  %v2563_v34 = vpop.f32.mrf.mxu3  ;;  %v5058_v24 = vld [vmem:[%s8661_s1 + $0x500] sm:$0xf]  ;;  %8902 = vst [vmem:[#allocation114_spill] sm:$0xff] %v7341_v62 }
 0x1f8   :  { %v2644_v14 = vpop.f32.mrf.mxu0  ;;  %v5059_v3 = vor.u32 %v5431_v46, %v5058_v24  ;;  %8901 = vst [vmem:[#allocation113_spill] sm:$0xff] %v7339_v26 }
 0x1f9   :  { %v2564_v29 = vadd.f32 %v2563_v34, %v2485_v39 }
 0x1fa   :  { %v2723_v40 = vpop.f32.mrf.mxu1  ;;  %2798 = vmatpush.bf16.msrb.mxu2 %v5059_v3  ;;  %v4266_v3 = vld [vmem:[%s8662_s0 + $0x388] sm:$0xf] }
 0x1fb   :  { %v2643_v20 = vadd.f32 %v2642_v59, %v2564_v29  ;;  %v4230_v59 = vld [vmem:[%s8662_s0 + $0x338] sm:$0xf]  ;;  %v7335_v29 = vor.u32 %v5223_v32, %v4222_v51 }
 0x1fc   :  { %v7337_v24 = vor.u32 %v5224_v27, %v4230_v59 }
 0x1fd   :  { %v7332_v15 = vadd.f32 %v2721_v42, %v2643_v20  ;;  %v4492_v42 = vld [vmem:[%s8661_s1 + $0x98] sm:$0xf0] }
 0x1fe   :  { %v2486_v63 = vpop.f32.mrf.mxu2  ;;  %8900 = vst [vmem:[#allocation112_spill] sm:$0xff] %v7337_v24 }
 0x1ff   :  { %v2487_v39 = vadd.f32 %v2486_v63, %v6591_v19  ;;  %v2565_v34 = vpop.f32.mrf.mxu3  ;;  %v5288_v19 = vld [vmem:[%s8661_s1 + $0x94] sm:$0xf] }
 0x200   :  { %v2647_v46 = vpop.f32.mrf.mxu0  ;;  %v4495_v51 = vor.u32 %v5288_v19, %v4492_v42 }
 0x201   :  { %v2566_v43 = vadd.f32 %v2565_v34, %v2487_v39  ;;  %v4268_v39 = vld [vmem:[%s8662_s0 + $0x3b4] sm:$0xf0]  ;;  %v5230_v34 = vld [vmem:[%s8662_s0 + $0x394] sm:$0xf] }
 0x202   :  { %v2726_v57 = vpop.f32.mrf.mxu1  ;;  %2955 = vmatpush.bf16.msrb.mxu0 %v4495_v51 }
 0x203   :  { %v2645_v5 = vadd.f32 %v2644_v14, %v2566_v43  ;;  %2528 = vmatmul.bf16.gmra.mxu2 %v7335_v29  ;;  %2686 = vmatmul.bf16.gmra.mxu0 %v7337_v24 }
 0x204   :  { %2607 = vmatmul.bf16.gmra.mxu3 %v7339_v26 }
 0x205   :  { %2765 = vmatmul.bf16.gmra.mxu1 %v7341_v62  ;;  %v7353_v32 = vadd.f32 %v2723_v40, %v2645_v5  ;;  %v5304_v40 = vld [vmem:[%s8661_s1 + $0x114] sm:$0xf] }
 0x206   :  { %v2489_v43 = vpop.f32.mrf.mxu2 }
 0x207   :  { %v2490_v14 = vadd.f32 %v2489_v43, %v6624_v54  ;;  %v2568_v20 = vpop.f32.mrf.mxu3  ;;  %v4556_v54 = vld [vmem:[%s8661_s1 + $0x118] sm:$0xf0]  ;;  %v7389_v43 = vor.u32 %v5234_v21, %v4266_v3 }
 0x208   :  { %v2649_v23 = vpop.f32.mrf.mxu0  ;;  %v4559_v63 = vor.u32 %v5304_v40, %v4556_v54 }
 0x209   :  { %v2569_v59 = vadd.f32 %v2568_v20, %v2490_v14  ;;  %v7391_v14 = vor.u32 %v5235_v7, %v4274_v38 }
 0x20a   :  { %v2728_v27 = vpop.f32.mrf.mxu1  ;;  %3034 = vmatpush.bf16.msrb.mxu1 %v4559_v63  ;;  %v5245_v63 = vld [vmem:[%s8662_s0 + $0x408] sm:$0xf0] }
 0x20b   :  { %v2648_v33 = vadd.f32 %v2647_v46, %v2569_v59  ;;  %v4276_v46 = vld [vmem:[%s8662_s0 + $0x3bc] sm:$0xf0]  ;;  %8903 = vst [vmem:[#allocation115_spill] sm:$0xff] %v7391_v14  ;;  %v7393_v59 = vor.u32 %v5229_v44, %v4268_v39  ;;  %v4318_v39 = vld [vmem:[%s8662_s0 + $0x3e8] sm:$0xf] }
 0x20c   :  { %v7395_v40 = vor.u32 %v5230_v34, %v4276_v46  ;;  %v5246_v34 = vld [vmem:[%s8662_s0 + $0x410] sm:$0xf0] }
 0x20d   :  { %v7386_v5 = vadd.f32 %v2726_v57, %v2648_v33  ;;  %8904 = vst [vmem:[#allocation116_spill] sm:$0xff] %v7393_v59 }
 0x20e   :  { %v2491_v19 = vpop.f32.mrf.mxu2  ;;  %8905 = vst [vmem:[#allocation117_spill] sm:$0xff] %v7395_v40 }
 0x20f   :  { %v2492_v42 = vadd.f32 %v2491_v19, %v6639_v35  ;;  %v2570_v51 = vpop.f32.mrf.mxu3  ;;  %v4312_v19 = vld [vmem:[%s8662_s0 + $0x40c] sm:$0xf0] }
 0x210   :  { %v2652_v20 = vpop.f32.mrf.mxu0 }
 0x211   :  { %v2571_v54 = vadd.f32 %v2570_v51, %v2492_v42  ;;  %v5241_v42 = vld [vmem:[%s8662_s0 + $0x3ec] sm:$0xf]  ;;  %v4320_v51 = vld [vmem:[%s8662_s0 + $0x414] sm:$0xf0] }
 0x212   :  { %v2731_v24 = vpop.f32.mrf.mxu1 }
 0x213   :  { %v2650_v62 = vadd.f32 %v2649_v23, %v2571_v54  ;;  %2533 = vmatmul.bf16.gmra.mxu2 %v7389_v43  ;;  %2691 = vmatmul.bf16.gmra.mxu0 %v7391_v14  ;;  %v4310_v23 = vld [vmem:[%s8662_s0 + $0x3e0] sm:$0xf]  ;;  %v7443_v14 = vor.u32 %v5241_v42, %v4320_v51 }
 0x214   :  { %2612 = vmatmul.bf16.gmra.mxu3 %v7393_v59 }
 0x215   :  { %2770 = vmatmul.bf16.gmra.mxu1 %v7395_v40  ;;  %v7401_v35 = vadd.f32 %v2728_v27, %v2650_v62  ;;  %v5270_v62 = vld [vmem:[%s8661_s1 + $0x4] sm:$0xf]  ;;  %8909 = vst [vmem:[#allocation121_spill] sm:$0xff] %v7443_v14 }
 0x216   :  { %v2494_v57 = vpop.f32.mrf.mxu2  ;;  %v5240_v27 = vld [vmem:[%s8662_s0 + $0x3e4] sm:$0xf] }
 0x217   :  { %v2495_v3 = vadd.f32 %v2494_v57, %v6678_v17  ;;  %v2573_v33 = vpop.f32.mrf.mxu3  ;;  %v4420_v17 = vld [vmem:[%s8661_s1 + $0x8] sm:$0xf0] }
 0x218   :  { %v2654_v21 = vpop.f32.mrf.mxu0  ;;  %v4423_v46 = vor.u32 %v5270_v62, %v4420_v17  ;;  %v7441_v17 = vor.u32 %v5240_v27, %v4312_v19 }
 0x219   :  { %v2574_v44 = vadd.f32 %v2573_v33, %v2495_v3  ;;  %v7437_v33 = vor.u32 %v5245_v63, %v4310_v23 }
 0x21a   :  { %v2733_v38 = vpop.f32.mrf.mxu1  ;;  %2877 = vmatpush.bf16.msrb.mxu3 %v4423_v46  ;;  %8908 = vst [vmem:[#allocation120_spill] sm:$0xff] %v7441_v17 }
 0x21b   :  { %v2653_v7 = vadd.f32 %v2652_v20, %v2574_v44  ;;  %8906 = vst [vmem:[#allocation118_spill] sm:$0xff] %v7437_v33  ;;  %v7439_v44 = vor.u32 %v5246_v34, %v4318_v39 }
 0x21d   :  { %v7434_v20 = vadd.f32 %v2731_v24, %v2653_v7  ;;  %8907 = vst [vmem:[#allocation119_spill] sm:$0xff] %v7439_v44  ;;  %v4484_v24 = vld [vmem:[%s8661_s1 + $0x88] sm:$0xf0] }
 0x21e   :  { %v2496_v54 = vpop.f32.mrf.mxu2 }
 0x21f   :  { %v2497_v57 = vadd.f32 %v2496_v54, %v6705_v52  ;;  %v2575_v3 = vpop.f32.mrf.mxu3  ;;  %v5286_v52 = vld [vmem:[%s8661_s1 + $0x84] sm:$0xf]  ;;  %v4354_v54 = vld [vmem:[%s8662_s0 + $0x438] sm:$0xf] }
 0x220   :  { %v2657_v62 = vpop.f32.mrf.mxu0  ;;  %v4487_v23 = vor.u32 %v5286_v52, %v4484_v24  ;;  %v4364_v52 = vld [vmem:[%s8662_s0 + $0x46c] sm:$0xf0] }
 0x221   :  { %v2576_v40 = vadd.f32 %v2575_v3, %v2497_v57  ;;  %v5256_v57 = vld [vmem:[%s8662_s0 + $0x460] sm:$0xf0]  ;;  %v4356_v3 = vld [vmem:[%s8662_s0 + $0x464] sm:$0xf0] }
 0x222   :  { %v2736_v59 = vpop.f32.mrf.mxu1  ;;  %2956 = vmatpush.bf16.msrb.mxu0 %v4487_v23 }
 0x223   :  { %v2655_v26 = vadd.f32 %v2654_v21, %v2576_v40  ;;  %2538 = vmatmul.bf16.gmra.mxu2 %v7437_v33  ;;  %2696 = vmatmul.bf16.gmra.mxu0 %v7439_v44  ;;  %v5302_v40 = vld [vmem:[%s8661_s1 + $0x104] sm:$0xf]  ;;  %v4548_v21 = vld [vmem:[%s8661_s1 + $0x108] sm:$0xf0] }
 0x224   :  { %2617 = vmatmul.bf16.gmra.mxu3 %v7441_v17  ;;  %v4551_v7 = vor.u32 %v5302_v40, %v4548_v21 }
 0x225   :  { %2775 = vmatmul.bf16.gmra.mxu1 %v7443_v14  ;;  %v7461_v63 = vadd.f32 %v2733_v38, %v2655_v26  ;;  %v5251_v26 = vld [vmem:[%s8662_s0 + $0x43c] sm:$0xf]  ;;  %v5257_v38 = vld [vmem:[%s8662_s0 + $0x468] sm:$0xf0] }
 0x226   :  { %v2499_v27 = vpop.f32.mrf.mxu2  ;;  %3035 = vmatpush.bf16.msrb.mxu1 %v4551_v7  ;;  %v7491_v7 = vor.u32 %v5256_v57, %v4354_v54 }
 0x227   :  { %v2500_v39 = vadd.f32 %v2499_v27, %v6732_v1  ;;  %v2578_v34 = vpop.f32.mrf.mxu3  ;;  %v4362_v1 = vld [vmem:[%s8662_s0 + $0x440] sm:$0xf] }
 0x228   :  { %v2659_v46 = vpop.f32.mrf.mxu0  ;;  %8910 = vst [vmem:[#allocation122_spill] sm:$0xff] %v7491_v7  ;;  %v7493_v27 = vor.u32 %v5257_v38, %v4362_v1 }
 0x229   :  { %v2579_v19 = vadd.f32 %v2578_v34, %v2500_v39  ;;  %v7495_v34 = vor.u32 %v5251_v26, %v4356_v3 }
 0x22a   :  { %v2738_v42 = vpop.f32.mrf.mxu1  ;;  %8911 = vst [vmem:[#allocation123_spill] sm:$0xff] %v7493_v27 }
 0x22b   :  { %v2658_v51 = vadd.f32 %v2657_v62, %v2579_v19  ;;  %v5252_v62 = vld [vmem:[%s8662_s0 + $0x444] sm:$0xf]  ;;  %8912 = vst [vmem:[#allocation124_spill] sm:$0xff] %v7495_v34 }
 0x22c   :  { %v7497_v19 = vor.u32 %v5252_v62, %v4364_v52 }
 0x22d   :  { %v7488_v24 = vadd.f32 %v2736_v59, %v2658_v51  ;;  %v4668_v59 = vld [vmem:[%s8661_s1 + $0x1f8] sm:$0xf0] }
 0x22e   :  { %v2501_v23 = vpop.f32.mrf.mxu2  ;;  %8913 = vst [vmem:[#allocation125_spill] sm:$0xff] %v7497_v19  ;;  %v4732_v51 = vld [vmem:[%s8661_s1 + $0x278] sm:$0xf0] }
 0x22f   :  { %v2502_v40 = vadd.f32 %v2501_v23, %v6759_v55  ;;  %v2580_v21 = vpop.f32.mrf.mxu3  ;;  %v5332_v55 = vld [vmem:[%s8661_s1 + $0x1f4] sm:$0xf]  ;;  %v4398_v23 = vld [vmem:[%s8662_s0 + $0x490] sm:$0xf] }
 0x230   :  { %v2662_v39 = vpop.f32.mrf.mxu0 }
 0x231   :  { %v2581_v44 = vadd.f32 %v2580_v21, %v2502_v40  ;;  %v5262_v21 = vld [vmem:[%s8662_s0 + $0x494] sm:$0xf] }
 0x232   :  { %v2741_v14 = vpop.f32.mrf.mxu1 }
 0x233   :  { %v2660_v17 = vadd.f32 %v2659_v46, %v2581_v44  ;;  %2543 = vmatmul.bf16.gmra.mxu2 %v7491_v7  ;;  %2701 = vmatmul.bf16.gmra.mxu0 %v7493_v27  ;;  %v5348_v44 = vld [vmem:[%s8661_s1 + $0x274] sm:$0xf]  ;;  %v4671_v46 = vor.u32 %v5332_v55, %v4668_v59  ;;  %v5268_v55 = vld [vmem:[%s8662_s0 + $0x4c0] sm:$0xf0] }
 0x234   :  { %2622 = vmatmul.bf16.gmra.mxu3 %v7495_v34  ;;  %v4735_v26 = vor.u32 %v5348_v44, %v4732_v51  ;;  %v4400_v44 = vld [vmem:[%s8662_s0 + $0x4bc] sm:$0xf0]  ;;  %v4408_v51 = vld [vmem:[%s8662_s0 + $0x4c4] sm:$0xf0] }
 0x235   :  { %2780 = vmatmul.bf16.gmra.mxu1 %v7497_v19  ;;  %v7515_v54 = vadd.f32 %v2738_v42, %v2660_v17  ;;  %3107 = vmatpush.bf16.msra.mxu2 %v4671_v46  ;;  %v5267_v17 = vld [vmem:[%s8662_s0 + $0x4b8] sm:$0xf0]  ;;  %v5364_v42 = vld [vmem:[%s8661_s1 + $0x2f4] sm:$0xf]  ;;  %v7555_v27 = vor.u32 %v5262_v21, %v4400_v44  ;;  %v3842_v44 = vld [vmem:[%s8662_s0 + $0x28] sm:$0xf] }
 0x236   :  { %v2504_v57 = vpop.f32.mrf.mxu2  ;;  %3186 = vmatpush.bf16.msra.mxu3 %v4735_v26  ;;  %v5263_v46 = vld [vmem:[%s8662_s0 + $0x49c] sm:$0xf] }
 0x237   :  { %v2505_v1 = vadd.f32 %v2504_v57, %v6792_v53  ;;  %v2583_v38 = vpop.f32.mrf.mxu3  ;;  %v4796_v53 = vld [vmem:[%s8661_s1 + $0x2f8] sm:$0xf0]  ;;  %v7557_v19 = vor.u32 %v5263_v46, %v4408_v51  ;;  %v5126_v46 = vld [vmem:[%s8662_s0 + $0x50] sm:$0xf0] }
 0x238   :  { %v2664_v3 = vpop.f32.mrf.mxu0  ;;  %v4799_v59 = vor.u32 %v5364_v42, %v4796_v53 }
 0x239   :  { %v2584_v62 = vadd.f32 %v2583_v38, %v2505_v1 }
 0x23a   :  { %v2743_v52 = vpop.f32.mrf.mxu1  ;;  %3265 = vmatpush.bf16.msra.mxu0 %v4799_v59 }
 0x23b   :  { %v2663_v40 = vadd.f32 %v2662_v39, %v2584_v62  ;;  %v4406_v39 = vld [vmem:[%s8662_s0 + $0x498] sm:$0xf]  ;;  %v7551_v62 = vor.u32 %v5267_v17, %v4398_v23 }
 0x23c   :  { %v7553_v42 = vor.u32 %v5268_v55, %v4406_v39 }
 0x23d   :  { %v7548_v57 = vadd.f32 %v2741_v14, %v2663_v40  ;;  %v4860_v14 = vld [vmem:[%s8661_s1 + $0x378] sm:$0xf0] }
 0x23e   :  { %v2506_v26 = vpop.f32.mrf.mxu2  ;;  %8914 = vst [vmem:[#allocation126_spill] sm:$0xff] %v7553_v42 }
 0x23f   :  { %v2507_v1 = vadd.f32 %v2506_v26, %v6813_v12  ;;  %v2585_v38 = vpop.f32.mrf.mxu3  ;;  %v5380_v12 = vld [vmem:[%s8661_s1 + $0x374] sm:$0xf] }
 0x240   :  { %v2667_v53 = vpop.f32.mrf.mxu0  ;;  %v4863_v23 = vor.u32 %v5380_v12, %v4860_v14  ;;  %v5346_v14 = vld [vmem:[%s8661_s1 + $0x264] sm:$0xf] }
 0x241   :  { %v2586_v34 = vadd.f32 %v2585_v38, %v2507_v1 }
 0x242   :  { %v2746_v7 = vpop.f32.mrf.mxu1  ;;  %3344 = vmatpush.bf16.msra.mxu1 %v4863_v23 }
 0x243   :  { %v2665_v33 = vadd.f32 %v2664_v3, %v2586_v34  ;;  %2548 = vmatmul.bf16.gmra.mxu2 %v7551_v62  ;;  %2706 = vmatmul.bf16.gmra.mxu0 %v7553_v42  ;;  %v8984_v42 = vld [vmem:[#allocation58_spill] sm:$0xff] }
 0x244   :  { %2627 = vmatmul.bf16.gmra.mxu3 %v7555_v27 }
 0x245   :  { %2785 = vmatmul.bf16.gmra.mxu1 %v7557_v19  ;;  %v7569_v40 = vadd.f32 %v2743_v52, %v2665_v33 }
 0x246   :  { %v2509_v34 = vpop.f32.mrf.mxu2 }
 0x247   :  { %v2510_v3 = vadd.f32 %v2509_v34, %v6840_v56  ;;  %v2588_v17 = vpop.f32.mrf.mxu3  ;;  %v7581_v56 = vor.u32 %v5126_v46, %v3842_v44 }
 0x248   :  { %v2669_v21 = vpop.f32.mrf.mxu0 }
 0x249   :  { %v2589_v39 = vadd.f32 %v2588_v17, %v2510_v3 }
 0x24a   :  { %v2748_v55 = vpop.f32.mrf.mxu1 }
 0x24b   :  { %v2668_v59 = vadd.f32 %v2667_v53, %v2589_v39 }
 0x24d   :  { %v7578_v51 = vadd.f32 %v2746_v7, %v2668_v59  ;;  %v5330_v7 = vld [vmem:[%s8661_s1 + $0x1e4] sm:$0xf] }
 0x24e   :  { %v2511_v33 = vpop.f32.mrf.mxu2 }
 0x24f   :  { %v2512_v52 = vadd.f32 %v2511_v33, %v6861_v8  ;;  %v2590_v26 = vpop.f32.mrf.mxu3  ;;  %v4660_v8 = vld [vmem:[%s8661_s1 + $0x1e8] sm:$0xf0] }
 0x250   :  { %v2672_v1 = vpop.f32.mrf.mxu0  ;;  %v4663_v23 = vor.u32 %v5330_v7, %v4660_v8  ;;  %v4788_v33 = vld [vmem:[%s8661_s1 + $0x2e8] sm:$0xf0] }
 0x251   :  { %v2591_v38 = vadd.f32 %v2590_v26, %v2512_v52  ;;  %v5137_v52 = vld [vmem:[%s8662_s0 + $0xa8] sm:$0xf0] }
 0x252   :  { %v2751_v53 = vpop.f32.mrf.mxu1  ;;  %3108 = vmatpush.bf16.msra.mxu2 %v4663_v23 }
 0x253   :  { %v2670_v12 = vadd.f32 %v2669_v21, %v2591_v38  ;;  %5088 = vmatmul.msk.bf16.vlgmr.msrb.gmra.mxu2 %vm1958_vm0, %v7581_v56  ;;  %2957 = vmatmul.bf16.vlgmr.msrb.gmra.mxu0 %v5631_v9  ;;  %v4724_v9 = vld [vmem:[%s8661_s1 + $0x268] sm:$0xf0] }
 0x254   :  { %2878 = vmatmul.bf16.vlgmr.msrb.gmra.mxu3 %v5618_v4  ;;  %v4727_v34 = vor.u32 %v5346_v14, %v4724_v9 }
 0x255   :  { %3036 = vmatmul.bf16.vlgmr.msrb.gmra.mxu1 %v6057_v28  ;;  %v7600_v3 = vadd.f32 %v2748_v55, %v2670_v12  ;;  %v5362_v28 = vld [vmem:[%s8661_s1 + $0x2e4] sm:$0xf] }
 0x256   :  { %v2514_v17 = vpop.f32.mrf.mxu2  ;;  %3187 = vmatpush.bf16.msra.mxu3 %v4727_v34  ;;  %v5378_v55 = vld [vmem:[%s8661_s1 + $0x364] sm:$0xf]  ;;  %v4791_v26 = vor.u32 %v5362_v28, %v4788_v33 }
 0x257   :  { %v2515_v21 = vadd.f32 %v2514_v17, %v6900_v10  ;;  %v2593_v39 = vpop.f32.mrf.mxu3  ;;  %v3886_v10 = vld [vmem:[%s8662_s0 + $0x80] sm:$0xf] }
 0x258   :  { %v2674_v59 = vpop.f32.mrf.mxu0  ;;  %3266 = vmatpush.bf16.msra.mxu0 %v4791_v26  ;;  %v7624_v23 = vor.u32 %v5137_v52, %v3886_v10  ;;  %v4716_v10 = vld [vmem:[%s8661_s1 + $0x258] sm:$0xf0] }
 0x259   :  { %v2594_v44 = vadd.f32 %v2593_v39, %v2515_v21 }
 0x25a   :  { %v2753_v46 = vpop.f32.mrf.mxu1 }
 0x25b   :  { %v2673_v4 = vadd.f32 %v2672_v1, %v2594_v44  ;;  %v4852_v1 = vld [vmem:[%s8661_s1 + $0x368] sm:$0xf0] }
 0x25c   :  { %v4855_v38 = vor.u32 %v5378_v55, %v4852_v1 }
 0x25d   :  { %v7621_v12 = vadd.f32 %v2751_v53, %v2673_v4 }
 0x25e   :  { %v2516_v7 = vpop.f32.mrf.mxu2  ;;  %3345 = vmatpush.bf16.msra.mxu1 %v4855_v38 }
 0x25f   :  { %v2517_v8 = vadd.f32 %v2516_v7, %v6915_v58  ;;  %v2595_v14 = vpop.f32.mrf.mxu3 }
 0x260   :  { %v2677_v9 = vpop.f32.mrf.mxu0 }
 0x261   :  { %v2596_v34 = vadd.f32 %v2595_v14, %v2517_v8 }
 0x262   :  { %v2756_v17 = vpop.f32.mrf.mxu1 }
 0x263   :  { %v2675_v21 = vadd.f32 %v2674_v59, %v2596_v34  ;;  %5089 = vmatmul.msk.bf16.gmra.mxu2 %vm1958_vm0, %v7624_v23  ;;  %2962 = vmatmul.bf16.gmra.mxu0 %v5715_v49  ;;  %v5328_v59 = vld [vmem:[%s8661_s1 + $0x1d4] sm:$0xf] }
 0x264   :  { %2883 = vmatmul.bf16.gmra.mxu3 %v5711_v47  ;;  %v4652_v47 = vld [vmem:[%s8661_s1 + $0x1d8] sm:$0xf0]  ;;  %v5344_v49 = vld [vmem:[%s8661_s1 + $0x254] sm:$0xf] }
 0x265   :  { %3041 = vmatmul.bf16.gmra.mxu1 %v6117_v0  ;;  %v7631_v53 = vadd.f32 %v2753_v46, %v2675_v21  ;;  %v3930_v0 = vld [vmem:[%s8662_s0 + $0xd8] sm:$0xf]  ;;  %v4655_v46 = vor.u32 %v5328_v59, %v4652_v47  ;;  %v4719_v52 = vor.u32 %v5344_v49, %v4716_v10  ;;  %v5376_v59 = vld [vmem:[%s8661_s1 + $0x354] sm:$0xf]  ;;  %v4844_v47 = vld [vmem:[%s8661_s1 + $0x358] sm:$0xf0] }
 0x266   :  { %v2519_v58 = vpop.f32.mrf.mxu2  ;;  %v4847_v49 = vor.u32 %v5376_v59, %v4844_v47  ;;  %v4708_v59 = vld [vmem:[%s8661_s1 + $0x248] sm:$0xf0] }
 0x267   :  { %v2520_v39 = vadd.f32 %v2519_v58, %v6954_v18  ;;  %v2598_v44 = vpop.f32.mrf.mxu3  ;;  %v5148_v18 = vld [vmem:[%s8662_s0 + $0x100] sm:$0xf0]  ;;  %3109 = vmatpush.bf16.msra.mxu2 %v4655_v46  ;;  %3188 = vmatpush.bf16.msra.mxu3 %v4719_v52 }
 0x268   :  { %v2679_v4 = vpop.f32.mrf.mxu0  ;;  %v7655_v8 = vor.u32 %v5148_v18, %v3930_v0  ;;  %3346 = vmatpush.bf16.msra.mxu1 %v4847_v49 }
 0x269   :  { %v2599_v28 = vadd.f32 %v2598_v44, %v2520_v39 }
 0x26a   :  { %v2758_v33 = vpop.f32.mrf.mxu1 }
 0x26b   :  { %v2678_v55 = vadd.f32 %v2677_v9, %v2599_v28 }
 0x26d   :  { %v7652_v26 = vadd.f32 %v2756_v17, %v2678_v55  ;;  %v4780_v17 = vld [vmem:[%s8661_s1 + $0x2d8] sm:$0xf0] }
 0x26e   :  { %v2521_v1 = vpop.f32.mrf.mxu2 }
 0x26f   :  { %v2522_v38 = vadd.f32 %v2521_v1, %v6975_v36  ;;  %v2600_v7 = vpop.f32.mrf.mxu3  ;;  %v5360_v36 = vld [vmem:[%s8661_s1 + $0x2d4] sm:$0xf] }
 0x270   :  { %v2682_v14 = vpop.f32.mrf.mxu0  ;;  %v4783_v58 = vor.u32 %v5360_v36, %v4780_v17 }
 0x271   :  { %v2601_v9 = vadd.f32 %v2600_v7, %v2522_v38 }
 0x272   :  { %v2761_v34 = vpop.f32.mrf.mxu1  ;;  %3267 = vmatpush.bf16.msra.mxu0 %v4783_v58 }
 0x273   :  { %v2680_v21 = vadd.f32 %v2679_v4, %v2601_v9  ;;  %5090 = vmatmul.msk.bf16.gmra.mxu2 %vm1958_vm0, %v7655_v8  ;;  %2967 = vmatmul.bf16.gmra.mxu0 %v5775_v13  ;;  %v8915_v9 = vld [vmem:[#allocation9_spill] sm:$0xff] }
 0x274   :  { %2888 = vmatmul.bf16.gmra.mxu3 %v5771_v11 }
 0x275   :  { %3046 = vmatmul.bf16.gmra.mxu1 %v6171_v61  ;;  %v7668_v39 = vadd.f32 %v2758_v33, %v2680_v21  ;;  %v3974_v33 = vld [vmem:[%s8662_s0 + $0x130] sm:$0xf] }
 0x276   :  { %v2524_v44 = vpop.f32.mrf.mxu2 }
 0x277   :  { %v2525_v4 = vadd.f32 %v2524_v44, %v7008_v2  ;;  %v2603_v28 = vpop.f32.mrf.mxu3  ;;  %v5159_v2 = vld [vmem:[%s8662_s0 + $0x158] sm:$0xf0] }
 0x278   :  { %v2684_v13 = vpop.f32.mrf.mxu0  ;;  %v7686_v52 = vor.u32 %v5159_v2, %v3974_v33 }
 0x279   :  { %v2604_v11 = vadd.f32 %v2603_v28, %v2525_v4 }
 0x27a   :  { %v2763_v55 = vpop.f32.mrf.mxu1 }
 0x27b   :  { %v2683_v61 = vadd.f32 %v2682_v14, %v2604_v11  ;;  %v5342_v11 = vld [vmem:[%s8661_s1 + $0x244] sm:$0xf] }
 0x27c   :  { %v4711_v47 = vor.u32 %v5342_v11, %v4708_v59 }
 0x27d   :  { %v7683_v0 = vadd.f32 %v2761_v34, %v2683_v61  ;;  %v8916_v34 = vld [vmem:[#allocation32_spill] sm:$0xff] }
 0x27e   :  { %v2526_v18 = vpop.f32.mrf.mxu2  ;;  %3189 = vmatpush.bf16.msra.mxu3 %v4711_v47  ;;  %v4062_v47 = vld [vmem:[%s8662_s0 + $0x1e0] sm:$0xf] }
 0x27f   :  { %v2527_v46 = vadd.f32 %v2526_v18, %v7023_v50  ;;  %v2605_v10 = vpop.f32.mrf.mxu3 }
 0x280   :  { %v2687_v1 = vpop.f32.mrf.mxu0 }
 0x281   :  { %v2606_v38 = vadd.f32 %v2605_v10, %v2527_v46 }
 0x282   :  { %v2766_v7 = vpop.f32.mrf.mxu1 }
 0x283   :  { %v2685_v14 = vadd.f32 %v2684_v13, %v2606_v38  ;;  %5091 = vmatmul.msk.bf16.gmra.mxu2 %vm1958_vm0, %v7686_v52  ;;  %2972 = vmatmul.bf16.gmra.mxu0 %v5835_v37  ;;  %v5326_v13 = vld [vmem:[%s8661_s1 + $0x1c4] sm:$0xf]  ;;  %v4644_v37 = vld [vmem:[%s8661_s1 + $0x1c8] sm:$0xf0] }
 0x284   :  { %2893 = vmatmul.bf16.gmra.mxu3 %v8915_v9  ;;  %v4647_v61 = vor.u32 %v5326_v13, %v4644_v37  ;;  %v8917_v9 = vld [vmem:[#allocation14_spill] sm:$0xff] }
 0x285   :  { %3051 = vmatmul.bf16.gmra.mxu1 %v8916_v34  ;;  %v7693_v21 = vadd.f32 %v2763_v55, %v2685_v14  ;;  %v5170_v55 = vld [vmem:[%s8662_s0 + $0x1b0] sm:$0xf0] }
 0x286   :  { %v2529_v36 = vpop.f32.mrf.mxu2  ;;  %3110 = vmatpush.bf16.msra.mxu2 %v4647_v61  ;;  %v8918_v34 = vld [vmem:[#allocation12_spill] sm:$0xff] }
 0x287   :  { %v2530_v50 = vadd.f32 %v2529_v36, %v7056_v41  ;;  %v2608_v17 = vpop.f32.mrf.mxu3  ;;  %v4018_v41 = vld [vmem:[%s8662_s0 + $0x188] sm:$0xf]  ;;  %v8919_v36 = vld [vmem:[#allocation36_spill] sm:$0xff] }
 0x288   :  { %v2689_v58 = vpop.f32.mrf.mxu0  ;;  %v7717_v46 = vor.u32 %v5170_v55, %v4018_v41 }
 0x289   :  { %v2609_v44 = vadd.f32 %v2608_v17, %v2530_v50  ;;  %v5374_v17 = vld [vmem:[%s8661_s1 + $0x344] sm:$0xf] }
 0x28a   :  { %v2768_v4 = vpop.f32.mrf.mxu1 }
 0x28b   :  { %v2688_v28 = vadd.f32 %v2687_v1, %v2609_v44 }
 0x28d   :  { %v7714_v33 = vadd.f32 %v2766_v7, %v2688_v28  ;;  %v5358_v7 = vld [vmem:[%s8661_s1 + $0x2c4] sm:$0xf] }
 0x28e   :  { %v2531_v2 = vpop.f32.mrf.mxu2 }
 0x28f   :  { %v2532_v49 = vadd.f32 %v2531_v2, %v7083_v22  ;;  %v2610_v18 = vpop.f32.mrf.mxu3  ;;  %v4772_v22 = vld [vmem:[%s8661_s1 + $0x2c8] sm:$0xf0] }
 0x290   :  { %v2692_v10 = vpop.f32.mrf.mxu0  ;;  %v4775_v50 = vor.u32 %v5358_v7, %v4772_v22  ;;  %v5181_v2 = vld [vmem:[%s8662_s0 + $0x208] sm:$0xf0]  ;;  %v8920_v22 = vld [vmem:[#allocation18_spill] sm:$0xff] }
 0x291   :  { %v2611_v1 = vadd.f32 %v2610_v18, %v2532_v49 }
 0x292   :  { %v2771_v38 = vpop.f32.mrf.mxu1  ;;  %3268 = vmatpush.bf16.msra.mxu0 %v4775_v50  ;;  %v5340_v50 = vld [vmem:[%s8661_s1 + $0x234] sm:$0xf] }
 0x293   :  { %v2690_v14 = vadd.f32 %v2689_v58, %v2611_v1  ;;  %5092 = vmatmul.msk.bf16.gmra.mxu2 %vm1958_vm0, %v7717_v46  ;;  %2977 = vmatmul.bf16.gmra.mxu0 %v8917_v9  ;;  %v4836_v58 = vld [vmem:[%s8661_s1 + $0x348] sm:$0xf0]  ;;  %v7748_v1 = vor.u32 %v5181_v2, %v4062_v47 }
 0x294   :  { %2898 = vmatmul.bf16.gmra.mxu3 %v8918_v34  ;;  %v4839_v44 = vor.u32 %v5374_v17, %v4836_v58  ;;  %v8921_v34 = vld [vmem:[#allocation16_spill] sm:$0xff]  ;;  %v4700_v58 = vld [vmem:[%s8661_s1 + $0x238] sm:$0xf0] }
 0x295   :  { %3056 = vmatmul.bf16.gmra.mxu1 %v8919_v36  ;;  %v7736_v28 = vadd.f32 %v2768_v4, %v2690_v14  ;;  %v8922_v36 = vld [vmem:[#allocation40_spill] sm:$0xff] }
 0x296   :  { %v2534_v13 = vpop.f32.mrf.mxu2  ;;  %3347 = vmatpush.bf16.msra.mxu1 %v4839_v44 }
 0x297   :  { %v2535_v37 = vadd.f32 %v2534_v13, %v7110_v25  ;;  %v2613_v11 = vpop.f32.mrf.mxu3 }
 0x298   :  { %v2694_v41 = vpop.f32.mrf.mxu0 }
 0x299   :  { %v2614_v55 = vadd.f32 %v2613_v11, %v2535_v37  ;;  %v4703_v37 = vor.u32 %v5340_v50, %v4700_v58  ;;  %v8924_v58 = vld [vmem:[#allocation20_spill] sm:$0xff] }
 0x29a   :  { %v2773_v61 = vpop.f32.mrf.mxu1 }
 0x29b   :  { %v2693_v59 = vadd.f32 %v2692_v10, %v2614_v55  ;;  %3190 = vmatpush.bf16.msra.mxu3 %v4703_v37 }
 0x29d   :  { %v7745_v4 = vadd.f32 %v2771_v38, %v2693_v59  ;;  %v4636_v38 = vld [vmem:[%s8661_s1 + $0x1b8] sm:$0xf0] }
 0x29e   :  { %v2536_v49 = vpop.f32.mrf.mxu2 }
 0x29f   :  { %v2537_v18 = vadd.f32 %v2536_v49, %v7137_v45  ;;  %v2615_v25 = vpop.f32.mrf.mxu3  ;;  %v5324_v45 = vld [vmem:[%s8661_s1 + $0x1b4] sm:$0xf] }
 0x2a0   :  { %v2697_v14 = vpop.f32.mrf.mxu0  ;;  %v4639_v17 = vor.u32 %v5324_v45, %v4636_v38  ;;  %v5356_v49 = vld [vmem:[%s8661_s1 + $0x2b4] sm:$0xf] }
 0x2a1   :  { %v2616_v9 = vadd.f32 %v2615_v25, %v2537_v18  ;;  %v4106_v18 = vld [vmem:[%s8662_s0 + $0x238] sm:$0xf] }
 0x2a2   :  { %v2776_v7 = vpop.f32.mrf.mxu1  ;;  %3111 = vmatpush.bf16.msra.mxu2 %v4639_v17  ;;  %v8923_v17 = vld [vmem:[#allocation22_spill] sm:$0xff] }
 0x2a3   :  { %v2695_v10 = vadd.f32 %v2694_v41, %v2616_v9  ;;  %5093 = vmatmul.msk.bf16.gmra.mxu2 %vm1958_vm0, %v7748_v1  ;;  %2982 = vmatmul.bf16.gmra.mxu0 %v8920_v22 }
 0x2a4   :  { %2903 = vmatmul.bf16.gmra.mxu3 %v8921_v34 }
 0x2a5   :  { %3061 = vmatmul.bf16.gmra.mxu1 %v8922_v36  ;;  %v7767_v44 = vadd.f32 %v2773_v61, %v2695_v10  ;;  %v4764_v61 = vld [vmem:[%s8661_s1 + $0x2b8] sm:$0xf0] }
 0x2a6   :  { %v2539_v13 = vpop.f32.mrf.mxu2  ;;  %v4767_v25 = vor.u32 %v5356_v49, %v4764_v61 }
 0x2a7   :  { %v2540_v11 = vadd.f32 %v2539_v13, %v7170_v6  ;;  %v2618_v41 = vpop.f32.mrf.mxu3  ;;  %v5192_v6 = vld [vmem:[%s8662_s0 + $0x260] sm:$0xf0]  ;;  %v8925_v13 = vld [vmem:[#allocation44_spill] sm:$0xff] }
 0x2a8   :  { %v2699_v55 = vpop.f32.mrf.mxu0  ;;  %3269 = vmatpush.bf16.msra.mxu0 %v4767_v25  ;;  %v7785_v34 = vor.u32 %v5192_v6, %v4106_v18  ;;  %v4150_v6 = vld [vmem:[%s8662_s0 + $0x290] sm:$0xf]  ;;  %v5203_v25 = vld [vmem:[%s8662_s0 + $0x2b8] sm:$0xf0] }
 0x2a9   :  { %v2619_v59 = vadd.f32 %v2618_v41, %v2540_v11 }
 0x2aa   :  { %v2778_v47 = vpop.f32.mrf.mxu1 }
 0x2ab   :  { %v2698_v2 = vadd.f32 %v2697_v14, %v2619_v59 }
 0x2ad   :  { %v7782_v9 = vadd.f32 %v2776_v7, %v2698_v2  ;;  %v5372_v7 = vld [vmem:[%s8661_s1 + $0x334] sm:$0xf] }
 0x2ae   :  { %v2541_v14 = vpop.f32.mrf.mxu2 }
 0x2af   :  { %v2542_v10 = vadd.f32 %v2541_v14, %v7191_v60  ;;  %v2620_v22 = vpop.f32.mrf.mxu3  ;;  %v4828_v60 = vld [vmem:[%s8661_s1 + $0x338] sm:$0xf0] }
 0x2b0   :  { %v2702_v36 = vpop.f32.mrf.mxu0  ;;  %v4831_v37 = vor.u32 %v5372_v7, %v4828_v60  ;;  %v4628_v7 = vld [vmem:[%s8661_s1 + $0x1a8] sm:$0xf0] }
 0x2b1   :  { %v2621_v45 = vadd.f32 %v2620_v22, %v2542_v10 }
 0x2b2   :  { %v2781_v38 = vpop.f32.mrf.mxu1  ;;  %3348 = vmatpush.bf16.msra.mxu1 %v4831_v37 }
 0x2b3   :  { %v2700_v50 = vadd.f32 %v2699_v55, %v2621_v45  ;;  %5094 = vmatmul.msk.bf16.gmra.mxu2 %vm1958_vm0, %v7785_v34  ;;  %2987 = vmatmul.bf16.gmra.mxu0 %v8923_v17 }
 0x2b4   :  { %2908 = vmatmul.bf16.gmra.mxu3 %v8924_v58 }
 0x2b5   :  { %3066 = vmatmul.bf16.gmra.mxu1 %v8925_v13  ;;  %v7798_v11 = vadd.f32 %v2778_v47, %v2700_v50  ;;  %v8926_v13 = vld [vmem:[#allocation3_spill] sm:$0xff] }
 0x2b6   :  { %v2544_v41 = vpop.f32.mrf.mxu2 }
 0x2b7   :  { %v2545_v55 = vadd.f32 %v2544_v41, %v7218_v48  ;;  %v2623_v59 = vpop.f32.mrf.mxu3  ;;  %v7810_v48 = vor.u32 %v5203_v25, %v4150_v6  ;;  %v8927_v41 = vld [vmem:[#allocation2_spill] sm:$0xff] }
 0x2b8   :  { %v2704_v2 = vpop.f32.mrf.mxu0 }
 0x2b9   :  { %v2624_v49 = vadd.f32 %v2623_v59, %v2545_v55  ;;  %v8928_v55 = vld [vmem:[#allocation48_spill] sm:$0xff] }
 0x2ba   :  { %v2783_v61 = vpop.f32.mrf.mxu1 }
 0x2bb   :  { %v2703_v18 = vadd.f32 %v2702_v36, %v2624_v49  ;;  %v5322_v36 = vld [vmem:[%s8661_s1 + $0x1a4] sm:$0xf] }
 0x2bc   :  { %v4631_v60 = vor.u32 %v5322_v36, %v4628_v7 }
 0x2bd   :  { %v7807_v14 = vadd.f32 %v2781_v38, %v2703_v18  ;;  %v5338_v38 = vld [vmem:[%s8661_s1 + $0x224] sm:$0xf] }
 0x2be   :  { %v2546_v47 = vpop.f32.mrf.mxu2  ;;  %3112 = vmatpush.bf16.msra.mxu2 %v4631_v60  ;;  %v5214_v60 = vld [vmem:[%s8662_s0 + $0x310] sm:$0xf0] }
 0x2bf   :  { %v2547_v10 = vadd.f32 %v2546_v47, %v7239_v16  ;;  %v2625_v22 = vpop.f32.mrf.mxu3  ;;  %v4692_v16 = vld [vmem:[%s8661_s1 + $0x228] sm:$0xf0] }
 0x2c0   :  { %v2707_v45 = vpop.f32.mrf.mxu0  ;;  %v4695_v37 = vor.u32 %v5338_v38, %v4692_v16  ;;  %v4194_v38 = vld [vmem:[%s8662_s0 + $0x2e8] sm:$0xf] }
 0x2c1   :  { %v2626_v50 = vadd.f32 %v2625_v22, %v2547_v10  ;;  %v5354_v10 = vld [vmem:[%s8661_s1 + $0x2a4] sm:$0xf]  ;;  %v4756_v22 = vld [vmem:[%s8661_s1 + $0x2a8] sm:$0xf0] }
 0x2c2   :  { %v2786_v17 = vpop.f32.mrf.mxu1  ;;  %3191 = vmatpush.bf16.msra.mxu3 %v4695_v37 }
 0x2c3   :  { %v2705_v58 = vadd.f32 %v2704_v2, %v2626_v50  ;;  %5095 = vmatmul.msk.bf16.gmra.mxu2 %vm1958_vm0, %v7810_v48  ;;  %2992 = vmatmul.bf16.gmra.mxu0 %v8926_v13  ;;  %v4759_v50 = vor.u32 %v5354_v10, %v4756_v22  ;;  %v8931_v10 = vld [vmem:[#allocation52_spill] sm:$0xff] }
 0x2c4   :  { %2913 = vmatmul.bf16.gmra.mxu3 %v8927_v41  ;;  %v7853_v41 = vor.u32 %v5214_v60, %v4194_v38  ;;  %v4684_v38 = vld [vmem:[%s8661_s1 + $0x218] sm:$0xf0] }
 0x2c5   :  { %3071 = vmatmul.bf16.gmra.mxu1 %v8928_v55  ;;  %v7829_v59 = vadd.f32 %v2783_v61, %v2705_v58  ;;  %v5370_v61 = vld [vmem:[%s8661_s1 + $0x324] sm:$0xf]  ;;  %3270 = vmatpush.bf16.msra.mxu0 %v4759_v50 }
 0x2c6   :  { %v2549_v49 = vpop.f32.mrf.mxu2 }
 0x2c7   :  { %v2550_v18 = vadd.f32 %v2549_v49, %v7278_v31  ;;  %v2628_v6 = vpop.f32.mrf.mxu3  ;;  %v4820_v31 = vld [vmem:[%s8661_s1 + $0x328] sm:$0xf0] }
 0x2c8   :  { %v2709_v25 = vpop.f32.mrf.mxu0  ;;  %v4823_v7 = vor.u32 %v5370_v61, %v4820_v31 }
 0x2c9   :  { %v2629_v2 = vadd.f32 %v2628_v6, %v2550_v18  ;;  %v8929_v6 = vld [vmem:[#allocation5_spill] sm:$0xff] }
 0x2ca   :  { %v2788_v47 = vpop.f32.mrf.mxu1  ;;  %3349 = vmatpush.bf16.msra.mxu1 %v4823_v7 }
 0x2cb   :  { %v2708_v36 = vadd.f32 %v2707_v45, %v2629_v2  ;;  %v8930_v2 = vld [vmem:[#allocation4_spill] sm:$0xff] }
 0x2cd   :  { %v7850_v16 = vadd.f32 %v2786_v17, %v2708_v36  ;;  %v5320_v36 = vld [vmem:[%s8661_s1 + $0x194] sm:$0xf] }
 0x2ce   :  { %v2551_v58 = vpop.f32.mrf.mxu2 }
 0x2cf   :  { %v2552_v13 = vadd.f32 %v2551_v58, %v7293_v30  ;;  %v2630_v37 = vpop.f32.mrf.mxu3 }
 0x2d0   :  { %v2958_v45 = vpop.f32.mrf.mxu0 }
 0x2d1   :  { %v2631_v55 = vadd.f32 %v2630_v37, %v2552_v13  ;;  %v4238_v13 = vld [vmem:[%s8662_s0 + $0x340] sm:$0xf]  ;;  %v5225_v37 = vld [vmem:[%s8662_s0 + $0x368] sm:$0xf0] }
 0x2d2   :  { %v3037_v49 = vpop.f32.mrf.mxu1 }
 0x2d3   :  { %v2710_v18 = vadd.f32 %v2709_v25, %v2631_v55  ;;  %5096 = vmatmul.msk.bf16.gmra.mxu2 %vm1958_vm0, %v7853_v41  ;;  %2997 = vmatmul.bf16.gmra.mxu0 %v8929_v6  ;;  %v7887_v6 = vor.u32 %v5225_v37, %v4238_v13  ;;  %v5368_v13 = vld [vmem:[%s8661_s1 + $0x314] sm:$0xf]  ;;  %v4812_v37 = vld [vmem:[%s8661_s1 + $0x318] sm:$0xf0] }
 0x2d4   :  { %2918 = vmatmul.bf16.gmra.mxu3 %v8930_v2 }
 0x2d5   :  { %3076 = vmatmul.bf16.gmra.mxu1 %v8931_v10  ;;  %v7860_v17 = vadd.f32 %v2788_v47, %v2710_v18  ;;  %v4620_v47 = vld [vmem:[%s8661_s1 + $0x198] sm:$0xf0] }
 0x2d6   :  { %v2800_v22 = vpop.f32.mrf.mxu2  ;;  %v4623_v7 = vor.u32 %v5320_v36, %v4620_v47 }
 0x2d7   :  { %v2801_v30 = vadd.f32 %v2800_v22, %v7332_v15  ;;  %v2879_v61 = vpop.f32.mrf.mxu3  ;;  %v5336_v15 = vld [vmem:[%s8661_s1 + $0x214] sm:$0xf] }
 0x2d8   :  { %v2959_v50 = vadd.f32 %v2958_v45, %v2879_v61  ;;  %v2960_v31 = vpop.f32.mrf.mxu0  ;;  %v4687_v58 = vor.u32 %v5336_v15, %v4684_v38  ;;  %3113 = vmatpush.bf16.msra.mxu2 %v4623_v7  ;;  %v8933_v61 = vld [vmem:[#allocation6_spill] sm:$0xff] }
 0x2d9   :  { %3739 = vst [vmem:[%s8663_s2] sm:$0xff] %v2801_v30  ;;  %v8932_v30 = vld [vmem:[#allocation7_spill] sm:$0xff] }
 0x2da   :  { %v3039_v25 = vpop.f32.mrf.mxu1  ;;  %v7878_v60 = vadd.f32 %v3037_v49, %v2959_v50  ;;  %3192 = vmatpush.bf16.msra.mxu3 %v4687_v58  ;;  %v5352_v50 = vld [vmem:[%s8661_s1 + $0x294] sm:$0xf] }
 0x2de   :  { %v2802_v45 = vpop.f32.mrf.mxu2 }
 0x2df   :  { %v2803_v55 = vadd.f32 %v2802_v45, %v7353_v32  ;;  %v2881_v18 = vpop.f32.mrf.mxu3  ;;  %v8934_v32 = vld [vmem:[#allocation56_spill] sm:$0xff]  ;;  %v4815_v45 = vor.u32 %v5368_v13, %v4812_v37  ;;  %v5318_v37 = vld [vmem:[%s8661_s1 + $0x184] sm:$0xf] }
 0x2e0   :  { %v2961_v2 = vadd.f32 %v2960_v31, %v2881_v18  ;;  %v2963_v49 = vpop.f32.mrf.mxu0  ;;  %v4748_v31 = vld [vmem:[%s8661_s1 + $0x298] sm:$0xf0]  ;;  %v5236_v18 = vld [vmem:[%s8662_s0 + $0x3c0] sm:$0xf0] }
 0x2e1   :  { %3742 = vst [vmem:[%s8663_s2 + $0x10] sm:$0xff] %v2803_v55  ;;  %v4751_v36 = vor.u32 %v5352_v50, %v4748_v31  ;;  %3350 = vmatpush.bf16.msra.mxu1 %v4815_v45  ;;  %v4612_v45 = vld [vmem:[%s8661_s1 + $0x188] sm:$0xf0] }
 0x2e2   :  { %v3042_v10 = vpop.f32.mrf.mxu1  ;;  %v7892_v22 = vadd.f32 %v3039_v25, %v2961_v2 }
 0x2e3   :  { %5097 = vmatmul.msk.bf16.gmra.mxu2 %vm1958_vm0, %v7887_v6  ;;  %3002 = vmatmul.bf16.gmra.mxu0 %v8932_v30 }
 0x2e4   :  { %2923 = vmatmul.bf16.gmra.mxu3 %v8933_v61  ;;  %3271 = vmatpush.bf16.msra.mxu0 %v4751_v36  ;;  %v8935_v36 = vld [vmem:[#allocation10_spill] sm:$0xff] }
 0x2e5   :  { %3081 = vmatmul.bf16.gmra.mxu1 %v8934_v32 }
 0x2e6   :  { %v2805_v25 = vpop.f32.mrf.mxu2 }
 0x2e7   :  { %v2806_v47 = vadd.f32 %v2805_v25, %v7386_v5  ;;  %v2884_v15 = vpop.f32.mrf.mxu3  ;;  %v4282_v5 = vld [vmem:[%s8662_s0 + $0x398] sm:$0xf]  ;;  %v8936_v25 = vld [vmem:[#allocation8_spill] sm:$0xff] }
 0x2e8   :  { %v2964_v7 = vadd.f32 %v2963_v49, %v2884_v15  ;;  %v2965_v38 = vpop.f32.mrf.mxu0  ;;  %v7924_v61 = vor.u32 %v5236_v18, %v4282_v5  ;;  %v4615_v5 = vor.u32 %v5318_v37, %v4612_v45  ;;  %v4676_v18 = vld [vmem:[%s8661_s1 + $0x208] sm:$0xf0] }
 0x2e9   :  { %3744 = vst [vmem:[%s8663_s2 + $0x20] sm:$0xff] %v2806_v47  ;;  %v8939_v45 = vld [vmem:[#allocation11_spill] sm:$0xff] }
 0x2ea   :  { %v3044_v58 = vpop.f32.mrf.mxu1  ;;  %v7915_v55 = vadd.f32 %v3042_v10, %v2964_v7  ;;  %3114 = vmatpush.bf16.msra.mxu2 %v4615_v5  ;;  %v8940_v5 = vld [vmem:[#allocation64_spill] sm:$0xff] }
 0x2ee   :  { %v2807_v2 = vpop.f32.mrf.mxu2 }
 0x2ef   :  { %v2808_v49 = vadd.f32 %v2807_v2, %v7401_v35  ;;  %v2886_v30 = vpop.f32.mrf.mxu3  ;;  %v8937_v35 = vld [vmem:[#allocation60_spill] sm:$0xff] }
 0x2f0   :  { %v2966_v32 = vadd.f32 %v2965_v38, %v2886_v30  ;;  %v2968_v50 = vpop.f32.mrf.mxu0  ;;  %v4326_v30 = vld [vmem:[%s8662_s0 + $0x3f0] sm:$0xf] }
 0x2f1   :  { %3746 = vst [vmem:[%s8663_s2 + $0x30] sm:$0xff] %v2808_v49 }
 0x2f2   :  { %v3047_v10 = vpop.f32.mrf.mxu1  ;;  %v7929_v31 = vadd.f32 %v3044_v58, %v2966_v32  ;;  %v5247_v32 = vld [vmem:[%s8662_s0 + $0x418] sm:$0xf0] }
 0x2f3   :  { %5098 = vmatmul.msk.bf16.gmra.mxu2 %vm1958_vm0, %v7924_v61  ;;  %3007 = vmatmul.bf16.gmra.mxu0 %v8935_v36 }
 0x2f4   :  { %2928 = vmatmul.bf16.gmra.mxu3 %v8936_v25 }
 0x2f5   :  { %3086 = vmatmul.bf16.gmra.mxu1 %v8937_v35  ;;  %v7961_v35 = vor.u32 %v5247_v32, %v4326_v30 }
 0x2f6   :  { %v2810_v47 = vpop.f32.mrf.mxu2 }
 0x2f7   :  { %v2811_v15 = vadd.f32 %v2810_v47, %v7434_v20  ;;  %v2889_v7 = vpop.f32.mrf.mxu3  ;;  %v5334_v20 = vld [vmem:[%s8661_s1 + $0x204] sm:$0xf] }
 0x2f8   :  { %v2969_v38 = vadd.f32 %v2968_v50, %v2889_v7  ;;  %v2970_v13 = vpop.f32.mrf.mxu0  ;;  %v4679_v49 = vor.u32 %v5334_v20, %v4676_v18  ;;  %v5350_v7 = vld [vmem:[%s8661_s1 + $0x284] sm:$0xf]  ;;  %v4804_v18 = vld [vmem:[%s8661_s1 + $0x308] sm:$0xf0] }
 0x2f9   :  { %3748 = vst [vmem:[%s8663_s2 + $0x40] sm:$0xff] %v2811_v15  ;;  %v5366_v20 = vld [vmem:[%s8661_s1 + $0x304] sm:$0xf] }
 0x2fa   :  { %v3049_v58 = vpop.f32.mrf.mxu1  ;;  %v7952_v2 = vadd.f32 %v3047_v10, %v2969_v38  ;;  %3193 = vmatpush.bf16.msra.mxu3 %v4679_v49  ;;  %v4740_v38 = vld [vmem:[%s8661_s1 + $0x288] sm:$0xf0] }
 0x2fb   :  { %v4743_v37 = vor.u32 %v5350_v7, %v4740_v38  ;;  %v4370_v7 = vld [vmem:[%s8662_s0 + $0x448] sm:$0xf]  ;;  %v5258_v38 = vld [vmem:[%s8662_s0 + $0x470] sm:$0xf0] }
 0x2fd   :  { %3272 = vmatpush.bf16.msra.mxu0 %v4743_v37 }
 0x2fe   :  { %v2812_v50 = vpop.f32.mrf.mxu2 }
 0x2ff   :  { %v2813_v36 = vadd.f32 %v2812_v50, %v7461_v63  ;;  %v2891_v25 = vpop.f32.mrf.mxu3 }
 0x300   :  { %v2971_v47 = vadd.f32 %v2970_v13, %v2891_v25  ;;  %v2973_v10 = vpop.f32.mrf.mxu0  ;;  %v8938_v13 = vld [vmem:[#allocation13_spill] sm:$0xff] }
 0x301   :  { %3750 = vst [vmem:[%s8663_s2 + $0x50] sm:$0xff] %v2813_v36 }
 0x302   :  { %v3052_v15 = vpop.f32.mrf.mxu1  ;;  %v7972_v63 = vadd.f32 %v3049_v58, %v2971_v47  ;;  %v4807_v58 = vor.u32 %v5366_v20, %v4804_v18  ;;  %v8941_v18 = vld [vmem:[#allocation17_spill] sm:$0xff] }
 0x303   :  { %5099 = vmatmul.msk.bf16.gmra.mxu2 %vm1958_vm0, %v7961_v35  ;;  %3012 = vmatmul.bf16.gmra.mxu0 %v8938_v13  ;;  %v7998_v13 = vor.u32 %v5258_v38, %v4370_v7 }
 0x304   :  { %2933 = vmatmul.bf16.gmra.mxu3 %v8939_v45  ;;  %3351 = vmatpush.bf16.msra.mxu1 %v4807_v58  ;;  %v8942_v58 = vld [vmem:[#allocation15_spill] sm:$0xff] }
 0x305   :  { %3091 = vmatmul.bf16.gmra.mxu1 %v8940_v5 }
 0x306   :  { %v2815_v49 = vpop.f32.mrf.mxu2 }
 0x307   :  { %v2816_v30 = vadd.f32 %v2815_v49, %v7488_v24  ;;  %v2894_v32 = vpop.f32.mrf.mxu3  ;;  %v5396_v49 = vld [vmem:[%s8661_s1 + $0x3f4] sm:$0xf] }
 0x308   :  { %v2974_v50 = vadd.f32 %v2973_v10, %v2894_v32  ;;  %v2975_v36 = vpop.f32.mrf.mxu0  ;;  %v5412_v32 = vld [vmem:[%s8661_s1 + $0x474] sm:$0xf] }
 0x309   :  { %3752 = vst [vmem:[%s8663_s2 + $0x60] sm:$0xff] %v2816_v30  ;;  %v4924_v30 = vld [vmem:[%s8661_s1 + $0x3f8] sm:$0xf0] }
 0x30a   :  { %v3054_v25 = vpop.f32.mrf.mxu1  ;;  %v7989_v47 = vadd.f32 %v3052_v15, %v2974_v50  ;;  %v4927_v50 = vor.u32 %v5396_v49, %v4924_v30  ;;  %v5269_v49 = vld [vmem:[%s8662_s0 + $0x4c8] sm:$0xf0] }
 0x30c   :  { %3423 = vmatpush.bf16.msrb.mxu2 %v4927_v50 }
 0x30e   :  { %v2817_v24 = vpop.f32.mrf.mxu2 }
 0x30f   :  { %v2818_v37 = vadd.f32 %v2817_v24, %v7515_v54  ;;  %v2896_v10 = vpop.f32.mrf.mxu3  ;;  %v8943_v54 = vld [vmem:[#allocation68_spill] sm:$0xff] }
 0x310   :  { %v2976_v45 = vadd.f32 %v2975_v36, %v2896_v10  ;;  %v2978_v5 = vpop.f32.mrf.mxu0  ;;  %v4988_v36 = vld [vmem:[%s8661_s1 + $0x478] sm:$0xf0] }
 0x311   :  { %3754 = vst [vmem:[%s8663_s2 + $0x70] sm:$0xff] %v2818_v37  ;;  %v4991_v7 = vor.u32 %v5412_v32, %v4988_v36 }
 0x312   :  { %v3057_v15 = vpop.f32.mrf.mxu1  ;;  %v8003_v20 = vadd.f32 %v3054_v25, %v2976_v45 }
 0x313   :  { %5100 = vmatmul.msk.bf16.gmra.mxu2 %vm1958_vm0, %v7998_v13  ;;  %3017 = vmatmul.bf16.gmra.mxu0 %v8941_v18  ;;  %v5428_v18 = vld [vmem:[%s8661_s1 + $0x4f4] sm:$0xf] }
 0x314   :  { %2938 = vmatmul.bf16.gmra.mxu3 %v8942_v58  ;;  %v5052_v58 = vld [vmem:[%s8661_s1 + $0x4f8] sm:$0xf0] }
 0x315   :  { %3096 = vmatmul.bf16.gmra.mxu1 %v8943_v54  ;;  %3502 = vmatpush.bf16.msrb.mxu3 %v4991_v7  ;;  %v5055_v54 = vor.u32 %v5428_v18, %v5052_v58  ;;  %v8946_v18 = vld [vmem:[#allocation19_spill] sm:$0xff]  ;;  %v8947_v58 = vld [vmem:[#allocation72_spill] sm:$0xff] }
 0x316   :  { %v2820_v25 = vpop.f32.mrf.mxu2 }
 0x317   :  { %v2821_v38 = vadd.f32 %v2820_v25, %v7548_v57  ;;  %v2899_v24 = vpop.f32.mrf.mxu3  ;;  %3581 = vmatpush.bf16.msrb.mxu0 %v5055_v54 }
 0x318   :  { %v2979_v37 = vadd.f32 %v2978_v5, %v2899_v24  ;;  %v2980_v10 = vpop.f32.mrf.mxu0  ;;  %v4414_v5 = vld [vmem:[%s8662_s0 + $0x4a0] sm:$0xf]  ;;  %v5084_v24 = vld [vmem:[%s8661_s1 + $0x538] sm:$0xf0] }
 0x319   :  { %3756 = vst [vmem:[%s8663_s2 + $0x80] sm:$0xff] %v2821_v38  ;;  %v8041_v36 = vor.u32 %v5269_v49, %v4414_v5  ;;  %v5436_v38 = vld [vmem:[%s8661_s1 + $0x534] sm:$0xf] }
 0x31a   :  { %v3059_v45 = vpop.f32.mrf.mxu1  ;;  %v8032_v57 = vadd.f32 %v3057_v15, %v2979_v37  ;;  %v5087_v37 = vor.u32 %v5436_v38, %v5084_v24 }
 0x31b   :  { %8944 = vst [vmem:[#allocation9_spill] sm:$0xff] %v8041_v36 }
 0x31c   :  { %3664 = vmatpush.bf16.msrb.mxu1 %v5087_v37 }
 0x31e   :  { %v2822_v30 = vpop.f32.mrf.mxu2 }
 0x31f   :  { %v2823_v32 = vadd.f32 %v2822_v30, %v7569_v40  ;;  %v2901_v50 = vpop.f32.mrf.mxu3 }
 0x320   :  { %v2981_v25 = vadd.f32 %v2980_v10, %v2901_v50  ;;  %v2983_v7 = vpop.f32.mrf.mxu0  ;;  %v8945_v10 = vld [vmem:[#allocation21_spill] sm:$0xff] }
 0x321   :  { %3758 = vst [vmem:[%s8663_s2 + $0x90] sm:$0xff] %v2823_v32 }
 0x322   :  { %v3062_v15 = vpop.f32.mrf.mxu1  ;;  %v8052_v40 = vadd.f32 %v3059_v45, %v2981_v25 }
 0x323   :  { %5101 = vmatmul.msk.bf16.gmra.mxu2 %vm1958_vm0, %v8041_v36  ;;  %3022 = vmatmul.bf16.gmra.mxu0 %v8945_v10 }
 0x324   :  { %2943 = vmatmul.bf16.gmra.mxu3 %v8946_v18 }
 0x325   :  { %3101 = vmatmul.bf16.gmra.mxu1 %v8947_v58  ;;  %v4980_v58 = vld [vmem:[%s8661_s1 + $0x468] sm:$0xf0] }
 0x326   :  { %v2825_v54 = vpop.f32.mrf.mxu2 }
 0x327   :  { %v2826_v5 = vadd.f32 %v2825_v54, %v7578_v51  ;;  %v2904_v49 = vpop.f32.mrf.mxu3 }
 0x328   :  { %v2984_v30 = vadd.f32 %v2983_v7, %v2904_v49  ;;  %v2985_v32 = vpop.f32.mrf.mxu0  ;;  %v5394_v7 = vld [vmem:[%s8661_s1 + $0x3e4] sm:$0xf]  ;;  %v8949_v49 = vld [vmem:[#allocation25_spill] sm:$0xff] }
 0x329   :  { %3760 = vst [vmem:[%s8663_s2 + $0xa0] sm:$0xff] %v2826_v5  ;;  %v8948_v5 = vld [vmem:[#allocation24_spill] sm:$0xff] }
 0x32a   :  { %v3064_v45 = vpop.f32.mrf.mxu1  ;;  %v8063_v50 = vadd.f32 %v3062_v15, %v2984_v30  ;;  %v4916_v15 = vld [vmem:[%s8661_s1 + $0x3e8] sm:$0xf0] }
 0x32b   :  { %v4919_v37 = vor.u32 %v5394_v7, %v4916_v15 }
 0x32d   :  { %3424 = vmatpush.bf16.msrb.mxu2 %v4919_v37  ;;  %v5044_v37 = vld [vmem:[%s8661_s1 + $0x4e8] sm:$0xf0] }
 0x32e   :  { %v2827_v25 = vpop.f32.mrf.mxu2 }
 0x32f   :  { %v2828_v38 = vadd.f32 %v2827_v25, %v7600_v3  ;;  %v2906_v24 = vpop.f32.mrf.mxu3  ;;  %v5410_v3 = vld [vmem:[%s8661_s1 + $0x464] sm:$0xf]  ;;  %v8951_v25 = vld [vmem:[#allocation76_spill] sm:$0xff] }
 0x330   :  { %v2986_v10 = vadd.f32 %v2985_v32, %v2906_v24  ;;  %v2988_v18 = vpop.f32.mrf.mxu0  ;;  %v4983_v30 = vor.u32 %v5410_v3, %v4980_v58  ;;  %v8950_v32 = vld [vmem:[#allocation23_spill] sm:$0xff] }
 0x331   :  { %3762 = vst [vmem:[%s8663_s2 + $0xb0] sm:$0xff] %v2828_v38 }
 0x332   :  { %v3067_v51 = vpop.f32.mrf.mxu1  ;;  %v8081_v54 = vadd.f32 %v3064_v45, %v2986_v10  ;;  %3503 = vmatpush.bf16.msrb.mxu3 %v4983_v30  ;;  %v5426_v10 = vld [vmem:[%s8661_s1 + $0x4e4] sm:$0xf] }
 0x333   :  { %3115 = vmatmul.bf16.vlgmr.msra.gmra.mxu2 %v8948_v5  ;;  %3273 = vmatmul.bf16.vlgmr.msra.gmra.mxu0 %v8949_v49  ;;  %v5047_v3 = vor.u32 %v5426_v10, %v5044_v37 }
 0x334   :  { %3194 = vmatmul.bf16.vlgmr.msra.gmra.mxu3 %v8950_v32 }
 0x335   :  { %3352 = vmatmul.bf16.vlgmr.msra.gmra.mxu1 %v8951_v25  ;;  %3582 = vmatpush.bf16.msrb.mxu0 %v5047_v3  ;;  %v5392_v3 = vld [vmem:[%s8661_s1 + $0x3d4] sm:$0xf] }
 0x336   :  { %v2830_v38 = vpop.f32.mrf.mxu2 }
 0x337   :  { %v2831_v24 = vadd.f32 %v2830_v38, %v7621_v12  ;;  %v2909_v7 = vpop.f32.mrf.mxu3  ;;  %v8952_v38 = vld [vmem:[#allocation27_spill] sm:$0xff] }
 0x338   :  { %v2989_v15 = vadd.f32 %v2988_v18, %v2909_v7  ;;  %v2990_v36 = vpop.f32.mrf.mxu0  ;;  %v8955_v7 = vld [vmem:[#allocation80_spill] sm:$0xff] }
 0x339   :  { %3764 = vst [vmem:[%s8663_s2 + $0xc0] sm:$0xff] %v2831_v24  ;;  %v8953_v24 = vld [vmem:[#allocation28_spill] sm:$0xff] }
 0x33a   :  { %v3069_v45 = vpop.f32.mrf.mxu1  ;;  %v8097_v58 = vadd.f32 %v3067_v51, %v2989_v15  ;;  %v8954_v51 = vld [vmem:[#allocation26_spill] sm:$0xff] }
 0x33e   :  { %v2832_v12 = vpop.f32.mrf.mxu2 }
 0x33f   :  { %v2833_v18 = vadd.f32 %v2832_v12, %v7631_v53  ;;  %v2911_v5 = vpop.f32.mrf.mxu3  ;;  %v4908_v12 = vld [vmem:[%s8661_s1 + $0x3d8] sm:$0xf0] }
 0x340   :  { %v2991_v49 = vadd.f32 %v2990_v36, %v2911_v5  ;;  %v2993_v30 = vpop.f32.mrf.mxu0  ;;  %v4972_v5 = vld [vmem:[%s8661_s1 + $0x458] sm:$0xf0] }
 0x341   :  { %3766 = vst [vmem:[%s8663_s2 + $0xd0] sm:$0xff] %v2833_v18  ;;  %v4911_v18 = vor.u32 %v5392_v3, %v4908_v12  ;;  %v8956_v3 = vld [vmem:[#allocation30_spill] sm:$0xff]  ;;  %v8959_v12 = vld [vmem:[#allocation84_spill] sm:$0xff] }
 0x342   :  { %v3072_v32 = vpop.f32.mrf.mxu1  ;;  %v8103_v25 = vadd.f32 %v3069_v45, %v2991_v49 }
 0x343   :  { %3120 = vmatmul.bf16.gmra.mxu2 %v8952_v38  ;;  %3278 = vmatmul.bf16.gmra.mxu0 %v8953_v24 }
 0x344   :  { %3199 = vmatmul.bf16.gmra.mxu3 %v8954_v51  ;;  %3425 = vmatpush.bf16.msrb.mxu2 %v4911_v18 }
 0x345   :  { %3357 = vmatmul.bf16.gmra.mxu1 %v8955_v7 }
 0x346   :  { %v2835_v15 = vpop.f32.mrf.mxu2 }
 0x347   :  { %v2836_v53 = vadd.f32 %v2835_v15, %v7652_v26  ;;  %v2914_v36 = vpop.f32.mrf.mxu3  ;;  %v5408_v26 = vld [vmem:[%s8661_s1 + $0x454] sm:$0xf] }
 0x348   :  { %v2994_v10 = vadd.f32 %v2993_v30, %v2914_v36  ;;  %v2995_v37 = vpop.f32.mrf.mxu0  ;;  %v4975_v30 = vor.u32 %v5408_v26, %v4972_v5 }
 0x349   :  { %3768 = vst [vmem:[%s8663_s2 + $0xe0] sm:$0xff] %v2836_v53 }
 0x34a   :  { %v3074_v45 = vpop.f32.mrf.mxu1  ;;  %v8125_v49 = vadd.f32 %v3072_v32, %v2994_v10  ;;  %3504 = vmatpush.bf16.msrb.mxu3 %v4975_v30  ;;  %v8957_v32 = vld [vmem:[#allocation31_spill] sm:$0xff]  ;;  %v8958_v10 = vld [vmem:[#allocation29_spill] sm:$0xff] }
 0x34e   :  { %v2837_v38 = vpop.f32.mrf.mxu2 }
 0x34f   :  { %v2838_v24 = vadd.f32 %v2837_v38, %v7668_v39  ;;  %v2916_v51 = vpop.f32.mrf.mxu3  ;;  %v5424_v39 = vld [vmem:[%s8661_s1 + $0x4d4] sm:$0xf] }
 0x350   :  { %v2996_v7 = vadd.f32 %v2995_v37, %v2916_v51  ;;  %v2998_v15 = vpop.f32.mrf.mxu0  ;;  %v5036_v37 = vld [vmem:[%s8661_s1 + $0x4d8] sm:$0xf0]  ;;  %v5434_v51 = vld [vmem:[%s8661_s1 + $0x524] sm:$0xf] }
 0x351   :  { %3770 = vst [vmem:[%s8663_s2 + $0xf0] sm:$0xff] %v2838_v24  ;;  %v5039_v18 = vor.u32 %v5424_v39, %v5036_v37 }
 0x352   :  { %v3077_v53 = vpop.f32.mrf.mxu1  ;;  %v8131_v36 = vadd.f32 %v3074_v45, %v2996_v7  ;;  %v5076_v7 = vld [vmem:[%s8661_s1 + $0x528] sm:$0xf0] }
 0x353   :  { %3125 = vmatmul.bf16.gmra.mxu2 %v8956_v3  ;;  %3283 = vmatmul.bf16.gmra.mxu0 %v8957_v32  ;;  %v5079_v3 = vor.u32 %v5434_v51, %v5076_v7 }
 0x354   :  { %3204 = vmatmul.bf16.gmra.mxu3 %v8958_v10  ;;  %3583 = vmatpush.bf16.msrb.mxu0 %v5039_v18 }
 0x355   :  { %3362 = vmatmul.bf16.gmra.mxu1 %v8959_v12 }
 0x356   :  { %v2840_v26 = vpop.f32.mrf.mxu2  ;;  %3665 = vmatpush.bf16.msrb.mxu1 %v5079_v3  ;;  %v5390_v3 = vld [vmem:[%s8661_s1 + $0x3c4] sm:$0xf] }
 0x357   :  { %v2841_v45 = vadd.f32 %v2840_v26, %v7683_v0  ;;  %v2919_v5 = vpop.f32.mrf.mxu3  ;;  %v8960_v26 = vld [vmem:[#allocation34_spill] sm:$0xff] }
 0x358   :  { %v2999_v30 = vadd.f32 %v2998_v15, %v2919_v5  ;;  %v3000_v38 = vpop.f32.mrf.mxu0  ;;  %v8963_v5 = vld [vmem:[#allocation88_spill] sm:$0xff] }
 0x359   :  { %3772 = vst [vmem:[%s8663_s2 + $0x100] sm:$0xff] %v2841_v45  ;;  %v8961_v45 = vld [vmem:[#allocation35_spill] sm:$0xff] }
 0x35a   :  { %v3079_v24 = vpop.f32.mrf.mxu1  ;;  %v8153_v32 = vadd.f32 %v3077_v53, %v2999_v30  ;;  %v8962_v53 = vld [vmem:[#allocation33_spill] sm:$0xff] }
 0x35e   :  { %v2842_v0 = vpop.f32.mrf.mxu2 }
 0x35f   :  { %v2843_v15 = vadd.f32 %v2842_v0, %v7693_v21  ;;  %v2921_v10 = vpop.f32.mrf.mxu3  ;;  %v4900_v0 = vld [vmem:[%s8661_s1 + $0x3c8] sm:$0xf0] }
 0x360   :  { %v3001_v12 = vadd.f32 %v3000_v38, %v2921_v10  ;;  %v3003_v39 = vpop.f32.mrf.mxu0  ;;  %v4964_v10 = vld [vmem:[%s8661_s1 + $0x448] sm:$0xf0] }
 0x361   :  { %3774 = vst [vmem:[%s8663_s2 + $0x110] sm:$0xff] %v2843_v15  ;;  %v4903_v15 = vor.u32 %v5390_v3, %v4900_v0  ;;  %v8966_v0 = vld [vmem:[#allocation37_spill] sm:$0xff] }
 0x362   :  { %v3082_v37 = vpop.f32.mrf.mxu1  ;;  %v8159_v18 = vadd.f32 %v3079_v24, %v3001_v12 }
 0x363   :  { %3130 = vmatmul.bf16.gmra.mxu2 %v8960_v26  ;;  %3288 = vmatmul.bf16.gmra.mxu0 %v8961_v45 }
 0x364   :  { %3209 = vmatmul.bf16.gmra.mxu3 %v8962_v53  ;;  %3426 = vmatpush.bf16.msrb.mxu2 %v4903_v15  ;;  %v8967_v15 = vld [vmem:[#allocation92_spill] sm:$0xff] }
 0x365   :  { %3367 = vmatmul.bf16.gmra.mxu1 %v8963_v5 }
 0x366   :  { %v2845_v30 = vpop.f32.mrf.mxu2 }
 0x367   :  { %v2846_v21 = vadd.f32 %v2845_v30, %v7714_v33  ;;  %v2924_v38 = vpop.f32.mrf.mxu3  ;;  %v5406_v33 = vld [vmem:[%s8661_s1 + $0x444] sm:$0xf] }
 0x368   :  { %v3004_v51 = vadd.f32 %v3003_v39, %v2924_v38  ;;  %v3005_v7 = vpop.f32.mrf.mxu0  ;;  %v4967_v39 = vor.u32 %v5406_v33, %v4964_v10  ;;  %v5422_v38 = vld [vmem:[%s8661_s1 + $0x4c4] sm:$0xf] }
 0x369   :  { %3776 = vst [vmem:[%s8663_s2 + $0x120] sm:$0xff] %v2846_v21 }
 0x36a   :  { %v3084_v24 = vpop.f32.mrf.mxu1  ;;  %v8181_v12 = vadd.f32 %v3082_v37, %v3004_v51  ;;  %3505 = vmatpush.bf16.msrb.mxu3 %v4967_v39  ;;  %v5028_v37 = vld [vmem:[%s8661_s1 + $0x4c8] sm:$0xf0] }
 0x36b   :  { %v5031_v51 = vor.u32 %v5422_v38, %v5028_v37 }
 0x36d   :  { %3584 = vmatpush.bf16.msrb.mxu0 %v5031_v51  ;;  %v8968_v51 = vld [vmem:[#allocation42_spill] sm:$0xff] }
 0x36e   :  { %v2847_v26 = vpop.f32.mrf.mxu2 }
 0x36f   :  { %v2848_v45 = vadd.f32 %v2847_v26, %v7736_v28  ;;  %v2926_v53 = vpop.f32.mrf.mxu3  ;;  %v8964_v28 = vld [vmem:[#allocation38_spill] sm:$0xff] }
 0x370   :  { %v3006_v5 = vadd.f32 %v3005_v7, %v2926_v53  ;;  %v3008_v30 = vpop.f32.mrf.mxu0  ;;  %v8965_v7 = vld [vmem:[#allocation39_spill] sm:$0xff] }
 0x371   :  { %3778 = vst [vmem:[%s8663_s2 + $0x130] sm:$0xff] %v2848_v45 }
 0x372   :  { %v3087_v21 = vpop.f32.mrf.mxu1  ;;  %v8193_v3 = vadd.f32 %v3084_v24, %v3006_v5 }
 0x373   :  { %3135 = vmatmul.bf16.gmra.mxu2 %v8964_v28  ;;  %3293 = vmatmul.bf16.gmra.mxu0 %v8965_v7 }
 0x374   :  { %3214 = vmatmul.bf16.gmra.mxu3 %v8966_v0  ;;  %v8969_v0 = vld [vmem:[#allocation43_spill] sm:$0xff] }
 0x375   :  { %3372 = vmatmul.bf16.gmra.mxu1 %v8967_v15  ;;  %v8970_v15 = vld [vmem:[#allocation41_spill] sm:$0xff] }
 0x376   :  { %v2850_v33 = vpop.f32.mrf.mxu2 }
 0x377   :  { %v2851_v10 = vadd.f32 %v2850_v33, %v7745_v4  ;;  %v2929_v39 = vpop.f32.mrf.mxu3  ;;  %v4892_v33 = vld [vmem:[%s8661_s1 + $0x3b8] sm:$0xf0] }
 0x378   :  { %v3009_v26 = vadd.f32 %v3008_v30, %v2929_v39  ;;  %v3010_v45 = vpop.f32.mrf.mxu0 }
 0x379   :  { %3780 = vst [vmem:[%s8663_s2 + $0x140] sm:$0xff] %v2851_v10  ;;  %v5404_v10 = vld [vmem:[%s8661_s1 + $0x434] sm:$0xf] }
 0x37a   :  { %v3089_v24 = vpop.f32.mrf.mxu1  ;;  %v8203_v53 = vadd.f32 %v3087_v21, %v3009_v26  ;;  %v8971_v21 = vld [vmem:[#allocation96_spill] sm:$0xff]  ;;  %v4956_v26 = vld [vmem:[%s8661_s1 + $0x438] sm:$0xf0] }
 0x37e   :  { %v2852_v5 = vpop.f32.mrf.mxu2 }
 0x37f   :  { %v2853_v38 = vadd.f32 %v2852_v5, %v7767_v44  ;;  %v2931_v37 = vpop.f32.mrf.mxu3  ;;  %v5388_v44 = vld [vmem:[%s8661_s1 + $0x3b4] sm:$0xf] }
 0x380   :  { %v3011_v28 = vadd.f32 %v3010_v45, %v2931_v37  ;;  %v3013_v7 = vpop.f32.mrf.mxu0  ;;  %v4895_v39 = vor.u32 %v5388_v44, %v4892_v33 }
 0x381   :  { %3782 = vst [vmem:[%s8663_s2 + $0x150] sm:$0xff] %v2853_v38 }
 0x382   :  { %v3092_v4 = vpop.f32.mrf.mxu1  ;;  %v8209_v30 = vadd.f32 %v3089_v24, %v3011_v28  ;;  %v4959_v24 = vor.u32 %v5404_v10, %v4956_v26  ;;  %3427 = vmatpush.bf16.msrb.mxu2 %v4895_v39 }
 0x383   :  { %3140 = vmatmul.bf16.gmra.mxu2 %v8968_v51  ;;  %3298 = vmatmul.bf16.gmra.mxu0 %v8969_v0  ;;  %v5420_v0 = vld [vmem:[%s8661_s1 + $0x4b4] sm:$0xf] }
 0x384   :  { %3219 = vmatmul.bf16.gmra.mxu3 %v8970_v15  ;;  %v5020_v15 = vld [vmem:[%s8661_s1 + $0x4b8] sm:$0xf0] }
 0x385   :  { %3377 = vmatmul.bf16.gmra.mxu1 %v8971_v21  ;;  %3506 = vmatpush.bf16.msrb.mxu3 %v4959_v24  ;;  %v5023_v21 = vor.u32 %v5420_v0, %v5020_v15 }
 0x386   :  { %v2855_v45 = vpop.f32.mrf.mxu2 }
 0x387   :  { %v2856_v5 = vadd.f32 %v2855_v45, %v7782_v9  ;;  %v2934_v38 = vpop.f32.mrf.mxu3  ;;  %3585 = vmatpush.bf16.msrb.mxu0 %v5023_v21  ;;  %v5432_v45 = vld [vmem:[%s8661_s1 + $0x514] sm:$0xf] }
 0x388   :  { %v3014_v37 = vadd.f32 %v3013_v7, %v2934_v38  ;;  %v3015_v28 = vpop.f32.mrf.mxu0  ;;  %v8973_v38 = vld [vmem:[#allocation47_spill] sm:$0xff] }
 0x389   :  { %3784 = vst [vmem:[%s8663_s2 + $0x160] sm:$0xff] %v2856_v5 }
 0x38a   :  { %v3094_v51 = vpop.f32.mrf.mxu1  ;;  %v8237_v9 = vadd.f32 %v3092_v4, %v3014_v37  ;;  %v5068_v4 = vld [vmem:[%s8661_s1 + $0x518] sm:$0xf0] }
 0x38b   :  { %v5071_v24 = vor.u32 %v5432_v45, %v5068_v4  ;;  %v8974_v37 = vld [vmem:[#allocation45_spill] sm:$0xff] }
 0x38d   :  { %3666 = vmatpush.bf16.msrb.mxu1 %v5071_v24  ;;  %v8976_v24 = vld [vmem:[#allocation50_spill] sm:$0xff] }
 0x38e   :  { %v2857_v7 = vpop.f32.mrf.mxu2 }
 0x38f   :  { %v2858_v44 = vadd.f32 %v2857_v7, %v7798_v11  ;;  %v2936_v33 = vpop.f32.mrf.mxu3  ;;  %v8972_v11 = vld [vmem:[#allocation46_spill] sm:$0xff] }
 0x390   :  { %v3016_v10 = vadd.f32 %v3015_v28, %v2936_v33  ;;  %v3018_v39 = vpop.f32.mrf.mxu0  ;;  %v8975_v28 = vld [vmem:[#allocation100_spill] sm:$0xff] }
 0x391   :  { %3786 = vst [vmem:[%s8663_s2 + $0x170] sm:$0xff] %v2858_v44 }
 0x392   :  { %v3097_v26 = vpop.f32.mrf.mxu1  ;;  %v8249_v5 = vadd.f32 %v3094_v51, %v3016_v10 }
 0x393   :  { %3145 = vmatmul.bf16.gmra.mxu2 %v8972_v11  ;;  %3303 = vmatmul.bf16.gmra.mxu0 %v8973_v38 }
 0x394   :  { %3224 = vmatmul.bf16.gmra.mxu3 %v8974_v37  ;;  %v8977_v37 = vld [vmem:[#allocation51_spill] sm:$0xff] }
 0x395   :  { %3382 = vmatmul.bf16.gmra.mxu1 %v8975_v28  ;;  %v5402_v28 = vld [vmem:[%s8661_s1 + $0x424] sm:$0xf] }
 0x396   :  { %v2860_v0 = vpop.f32.mrf.mxu2 }
 0x397   :  { %v2861_v15 = vadd.f32 %v2860_v0, %v7807_v14  ;;  %v2939_v21 = vpop.f32.mrf.mxu3  ;;  %v8978_v0 = vld [vmem:[#allocation49_spill] sm:$0xff] }
 0x398   :  { %v3019_v7 = vadd.f32 %v3018_v39, %v2939_v21  ;;  %v3020_v44 = vpop.f32.mrf.mxu0 }
 0x399   :  { %3788 = vst [vmem:[%s8663_s2 + $0x180] sm:$0xff] %v2861_v15  ;;  %v8979_v15 = vld [vmem:[#allocation104_spill] sm:$0xff] }
 0x39a   :  { %v3099_v51 = vpop.f32.mrf.mxu1  ;;  %v8259_v33 = vadd.f32 %v3097_v26, %v3019_v7  ;;  %v5386_v26 = vld [vmem:[%s8661_s1 + $0x3a4] sm:$0xf]  ;;  %v4948_v7 = vld [vmem:[%s8661_s1 + $0x428] sm:$0xf0] }
 0x39e   :  { %v2862_v10 = vpop.f32.mrf.mxu2 }
 0x39f   :  { %v2863_v45 = vadd.f32 %v2862_v10, %v7829_v59  ;;  %v2941_v4 = vpop.f32.mrf.mxu3  ;;  %v4884_v59 = vld [vmem:[%s8661_s1 + $0x3a8] sm:$0xf0] }
 0x3a0   :  { %v3021_v11 = vadd.f32 %v3020_v44, %v2941_v4  ;;  %v3023_v38 = vpop.f32.mrf.mxu0  ;;  %v4887_v21 = vor.u32 %v5386_v26, %v4884_v59  ;;  %v4951_v44 = vor.u32 %v5402_v28, %v4948_v7  ;;  %v5418_v26 = vld [vmem:[%s8661_s1 + $0x4a4] sm:$0xf]  ;;  %v5012_v59 = vld [vmem:[%s8661_s1 + $0x4a8] sm:$0xf0] }
 0x3a1   :  { %3790 = vst [vmem:[%s8663_s2 + $0x190] sm:$0xff] %v2863_v45 }
 0x3a2   :  { %v3102_v14 = vpop.f32.mrf.mxu1  ;;  %v8265_v39 = vadd.f32 %v3099_v51, %v3021_v11  ;;  %3428 = vmatpush.bf16.msrb.mxu2 %v4887_v21  ;;  %3507 = vmatpush.bf16.msrb.mxu3 %v4951_v44  ;;  %v8980_v44 = vld [vmem:[#allocation54_spill] sm:$0xff] }
 0x3a3   :  { %3150 = vmatmul.bf16.gmra.mxu2 %v8976_v24  ;;  %3308 = vmatmul.bf16.gmra.mxu0 %v8977_v37 }
 0x3a4   :  { %3229 = vmatmul.bf16.gmra.mxu3 %v8978_v0 }
 0x3a5   :  { %3387 = vmatmul.bf16.gmra.mxu1 %v8979_v15 }
 0x3a6   :  { %v2865_v51 = vpop.f32.mrf.mxu2 }
 0x3a7   :  { %v2866_v10 = vadd.f32 %v2865_v51, %v7850_v16  ;;  %v2944_v45 = vpop.f32.mrf.mxu3  ;;  %v5015_v16 = vor.u32 %v5418_v26, %v5012_v59  ;;  %v8981_v51 = vld [vmem:[#allocation55_spill] sm:$0xff] }
 0x3a8   :  { %v3024_v4 = vadd.f32 %v3023_v38, %v2944_v45  ;;  %v3025_v11 = vpop.f32.mrf.mxu0  ;;  %v8983_v45 = vld [vmem:[#allocation108_spill] sm:$0xff] }
 0x3a9   :  { %3792 = vst [vmem:[%s8663_s2 + $0x1a0] sm:$0xff] %v2866_v10  ;;  %3586 = vmatpush.bf16.msrb.mxu0 %v5015_v16  ;;  %v8982_v10 = vld [vmem:[#allocation53_spill] sm:$0xff] }
 0x3aa   :  { %v3104_v24 = vpop.f32.mrf.mxu1  ;;  %v8287_v37 = vadd.f32 %v3102_v14, %v3024_v4 }
 0x3ae   :  { %v2867_v28 = vpop.f32.mrf.mxu2 }
 0x3af   :  { %v2868_v38 = vadd.f32 %v2867_v28, %v7860_v17  ;;  %v2946_v0 = vpop.f32.mrf.mxu3 }
 0x3b0   :  { %v3026_v15 = vadd.f32 %v3025_v11, %v2946_v0  ;;  %v3274_v21 = vpop.f32.mrf.mxu0  ;;  %v5400_v0 = vld [vmem:[%s8661_s1 + $0x414] sm:$0xf] }
 0x3b1   :  { %3794 = vst [vmem:[%s8663_s2 + $0x1b0] sm:$0xff] %v2868_v38  ;;  %v4876_v38 = vld [vmem:[%s8661_s1 + $0x398] sm:$0xf0] }
 0x3b2   :  { %v3353_v14 = vpop.f32.mrf.mxu1  ;;  %v8299_v7 = vadd.f32 %v3104_v24, %v3026_v15  ;;  %v5384_v24 = vld [vmem:[%s8661_s1 + $0x394] sm:$0xf] }
 0x3b3   :  { %3155 = vmatmul.bf16.gmra.mxu2 %v8980_v44  ;;  %3313 = vmatmul.bf16.gmra.mxu0 %v8981_v51  ;;  %v4879_v15 = vor.u32 %v5384_v24, %v4876_v38  ;;  %v8985_v24 = vld [vmem:[#allocation59_spill] sm:$0xff]  ;;  %v8986_v38 = vld [vmem:[#allocation57_spill] sm:$0xff] }
 0x3b4   :  { %3234 = vmatmul.bf16.gmra.mxu3 %v8982_v10 }
 0x3b5   :  { %3392 = vmatmul.bf16.gmra.mxu1 %v8983_v45  ;;  %3429 = vmatpush.bf16.msrb.mxu2 %v4879_v15 }
 0x3b6   :  { %v3116_v4 = vpop.f32.mrf.mxu2 }
 0x3b7   :  { %v3117_v17 = vadd.f32 %v3116_v4, %v7878_v60  ;;  %v3195_v11 = vpop.f32.mrf.mxu3  ;;  %v4940_v60 = vld [vmem:[%s8661_s1 + $0x418] sm:$0xf0] }
 0x3b8   :  { %v3276_v26 = vpop.f32.mrf.mxu0  ;;  %v4943_v44 = vor.u32 %v5400_v0, %v4940_v60 }
 0x3b9   :  { %v3196_v59 = vadd.f32 %v3195_v11, %v3117_v17 }
 0x3ba   :  { %v3355_v16 = vpop.f32.mrf.mxu1  ;;  %3508 = vmatpush.bf16.msrb.mxu3 %v4943_v44 }
 0x3bb   :  { %v3275_v28 = vadd.f32 %v3274_v21, %v3196_v59 }
 0x3bd   :  { %v8318_v51 = vadd.f32 %v3353_v14, %v3275_v28  ;;  %v5416_v14 = vld [vmem:[%s8661_s1 + $0x494] sm:$0xf] }
 0x3be   :  { %v3118_v21 = vpop.f32.mrf.mxu2 }
 0x3bf   :  { %v3119_v10 = vadd.f32 %v3118_v21, %v7892_v22  ;;  %v3197_v45 = vpop.f32.mrf.mxu3  ;;  %v5004_v22 = vld [vmem:[%s8661_s1 + $0x498] sm:$0xf0] }
 0x3c0   :  { %v3279_v4 = vpop.f32.mrf.mxu0  ;;  %v5007_v28 = vor.u32 %v5416_v14, %v5004_v22 }
 0x3c1   :  { %v3198_v17 = vadd.f32 %v3197_v45, %v3119_v10  ;;  %v5430_v10 = vld [vmem:[%s8661_s1 + $0x504] sm:$0xf]  ;;  %v5060_v45 = vld [vmem:[%s8661_s1 + $0x508] sm:$0xf0] }
 0x3c2   :  { %v3358_v11 = vpop.f32.mrf.mxu1  ;;  %3587 = vmatpush.bf16.msrb.mxu0 %v5007_v28  ;;  %v8987_v28 = vld [vmem:[#allocation62_spill] sm:$0xff] }
 0x3c3   :  { %v3277_v59 = vadd.f32 %v3276_v26, %v3198_v17  ;;  %3160 = vmatmul.bf16.gmra.mxu2 %v8984_v42  ;;  %3318 = vmatmul.bf16.gmra.mxu0 %v8985_v24  ;;  %v5063_v17 = vor.u32 %v5430_v10, %v5060_v45 }
 0x3c4   :  { %3239 = vmatmul.bf16.gmra.mxu3 %v8986_v38 }
 0x3c5   :  { %3397 = vmatmul.bf16.gmra.mxu1 %v7335_v29  ;;  %v8331_v0 = vadd.f32 %v3355_v16, %v3277_v59 }
 0x3c6   :  { %v3121_v26 = vpop.f32.mrf.mxu2  ;;  %3667 = vmatpush.bf16.msrb.mxu1 %v5063_v17 }
 0x3c7   :  { %v3122_v42 = vadd.f32 %v3121_v26, %v7915_v55  ;;  %v3200_v15 = vpop.f32.mrf.mxu3  ;;  %v8988_v26 = vld [vmem:[#allocation63_spill] sm:$0xff] }
 0x3c8   :  { %v3281_v60 = vpop.f32.mrf.mxu0 }
 0x3c9   :  { %v3201_v44 = vadd.f32 %v3200_v15, %v3122_v42  ;;  %v8989_v42 = vld [vmem:[#allocation61_spill] sm:$0xff] }
 0x3ca   :  { %v3360_v21 = vpop.f32.mrf.mxu1 }
 0x3cb   :  { %v3280_v29 = vadd.f32 %v3279_v4, %v3201_v44 }
 0x3cd   :  { %v8340_v16 = vadd.f32 %v3358_v11, %v3280_v29 }
 0x3ce   :  { %v3123_v59 = vpop.f32.mrf.mxu2 }
 0x3cf   :  { %v3124_v55 = vadd.f32 %v3123_v59, %v7929_v31  ;;  %v3202_v24 = vpop.f32.mrf.mxu3  ;;  %v4868_v59 = vld [vmem:[%s8661_s1 + $0x388] sm:$0xf0] }
 0x3d0   :  { %v3284_v38 = vpop.f32.mrf.mxu0 }
 0x3d1   :  { %v3203_v14 = vadd.f32 %v3202_v24, %v3124_v55 }
 0x3d2   :  { %v3363_v22 = vpop.f32.mrf.mxu1 }
 0x3d3   :  { %v3282_v4 = vadd.f32 %v3281_v60, %v3203_v14  ;;  %3165 = vmatmul.bf16.gmra.mxu2 %v8987_v28  ;;  %3323 = vmatmul.bf16.gmra.mxu0 %v8988_v26  ;;  %v5382_v60 = vld [vmem:[%s8661_s1 + $0x384] sm:$0xf] }
 0x3d4   :  { %3244 = vmatmul.bf16.gmra.mxu3 %v8989_v42 }
 0x3d5   :  { %3402 = vmatmul.bf16.gmra.mxu1 %v7389_v43  ;;  %v8347_v15 = vadd.f32 %v3360_v21, %v3282_v4  ;;  %v5398_v43 = vld [vmem:[%s8661_s1 + $0x404] sm:$0xf]  ;;  %v4871_v21 = vor.u32 %v5382_v60, %v4868_v59 }
 0x3d6   :  { %v3126_v11 = vpop.f32.mrf.mxu2 }
 0x3d7   :  { %v3127_v44 = vadd.f32 %v3126_v11, %v7952_v2  ;;  %v3205_v29 = vpop.f32.mrf.mxu3  ;;  %v4932_v2 = vld [vmem:[%s8661_s1 + $0x408] sm:$0xf0]  ;;  %3430 = vmatpush.bf16.msrb.mxu2 %v4871_v21 }
 0x3d8   :  { %v3286_v31 = vpop.f32.mrf.mxu0  ;;  %v4935_v55 = vor.u32 %v5398_v43, %v4932_v2 }
 0x3d9   :  { %v3206_v10 = vadd.f32 %v3205_v29, %v3127_v44  ;;  %v8990_v44 = vld [vmem:[#allocation66_spill] sm:$0xff]  ;;  %v8991_v29 = vld [vmem:[#allocation67_spill] sm:$0xff] }
 0x3da   :  { %v3365_v45 = vpop.f32.mrf.mxu1  ;;  %3509 = vmatpush.bf16.msrb.mxu3 %v4935_v55 }
 0x3db   :  { %v3285_v17 = vadd.f32 %v3284_v38, %v3206_v10  ;;  %v5414_v10 = vld [vmem:[%s8661_s1 + $0x484] sm:$0xf] }
 0x3dd   :  { %v8362_v24 = vadd.f32 %v3363_v22, %v3285_v17  ;;  %v4996_v22 = vld [vmem:[%s8661_s1 + $0x488] sm:$0xf0]  ;;  %v8992_v17 = vld [vmem:[#allocation65_spill] sm:$0xff] }
 0x3de   :  { %v3128_v38 = vpop.f32.mrf.mxu2  ;;  %v4999_v60 = vor.u32 %v5414_v10, %v4996_v22  ;;  %v8995_v22 = vld [vmem:[#allocation71_spill] sm:$0xff] }
 0x3df   :  { %v3129_v14 = vadd.f32 %v3128_v38, %v7972_v63  ;;  %v3207_v4 = vpop.f32.mrf.mxu3  ;;  %v8993_v63 = vld [vmem:[#allocation118_spill] sm:$0xff] }
 0x3e0   :  { %v3289_v28 = vpop.f32.mrf.mxu0  ;;  %3588 = vmatpush.bf16.msrb.mxu0 %v4999_v60  ;;  %v8997_v60 = vld [vmem:[#allocation122_spill] sm:$0xff] }
 0x3e1   :  { %v3208_v26 = vadd.f32 %v3207_v4, %v3129_v14 }
 0x3e2   :  { %v3368_v42 = vpop.f32.mrf.mxu1 }
 0x3e3   :  { %v3287_v11 = vadd.f32 %v3286_v31, %v3208_v26  ;;  %3170 = vmatmul.bf16.gmra.mxu2 %v8990_v44  ;;  %3328 = vmatmul.bf16.gmra.mxu0 %v8991_v29 }
 0x3e4   :  { %3249 = vmatmul.bf16.gmra.mxu3 %v8992_v17 }
 0x3e5   :  { %3407 = vmatmul.bf16.gmra.mxu1 %v8993_v63  ;;  %v8375_v59 = vadd.f32 %v3365_v45, %v3287_v11  ;;  %v8994_v11 = vld [vmem:[#allocation70_spill] sm:$0xff] }
 0x3e6   :  { %v3131_v31 = vpop.f32.mrf.mxu2 }
 0x3e7   :  { %v3132_v43 = vadd.f32 %v3131_v31, %v7989_v47  ;;  %v3210_v21 = vpop.f32.mrf.mxu3  ;;  %v8996_v47 = vld [vmem:[#allocation69_spill] sm:$0xff] }
 0x3e8   :  { %v3291_v2 = vpop.f32.mrf.mxu0 }
 0x3e9   :  { %v3211_v55 = vadd.f32 %v3210_v21, %v3132_v43 }
 0x3ea   :  { %v3370_v38 = vpop.f32.mrf.mxu1 }
 0x3eb   :  { %v3290_v14 = vadd.f32 %v3289_v28, %v3211_v55 }
 0x3ed   :  { %v8378_v4 = vadd.f32 %v3368_v42, %v3290_v14 }
 0x3ee   :  { %v3133_v26 = vpop.f32.mrf.mxu2 }
 0x3ef   :  { %v3134_v44 = vadd.f32 %v3133_v26, %v8003_v20  ;;  %v3212_v29 = vpop.f32.mrf.mxu3 }
 0x3f0   :  { %v3294_v17 = vpop.f32.mrf.mxu0 }
 0x3f1   :  { %v3213_v63 = vadd.f32 %v3212_v29, %v3134_v44 }
 0x3f2   :  { %v3373_v10 = vpop.f32.mrf.mxu1 }
 0x3f3   :  { %v3292_v45 = vadd.f32 %v3291_v2, %v3213_v63  ;;  %3175 = vmatmul.bf16.gmra.mxu2 %v8994_v11  ;;  %3333 = vmatmul.bf16.gmra.mxu0 %v8995_v22 }
 0x3f4   :  { %3254 = vmatmul.bf16.gmra.mxu3 %v8996_v47 }
 0x3f5   :  { %3412 = vmatmul.bf16.gmra.mxu1 %v8997_v60  ;;  %v8385_v31 = vadd.f32 %v3370_v38, %v3292_v45  ;;  %v8998_v38 = vld [vmem:[#allocation74_spill] sm:$0xff]  ;;  %v8999_v45 = vld [vmem:[#allocation75_spill] sm:$0xff] }
 0x3f6   :  { %v3136_v28 = vpop.f32.mrf.mxu2 }
 0x3f7   :  { %v3137_v42 = vadd.f32 %v3136_v28, %v8032_v57  ;;  %v3215_v43 = vpop.f32.mrf.mxu3  ;;  %v9000_v57 = vld [vmem:[#allocation73_spill] sm:$0xff] }
 0x3f8   :  { %v3296_v20 = vpop.f32.mrf.mxu0 }
 0x3f9   :  { %v3216_v21 = vadd.f32 %v3215_v43, %v3137_v42 }
 0x3fa   :  { %v3375_v55 = vpop.f32.mrf.mxu1 }
 0x3fb   :  { %v3295_v14 = vadd.f32 %v3294_v17, %v3216_v21 }
 0x3fd   :  { %v8388_v26 = vadd.f32 %v3373_v10, %v3295_v14 }
 0x3fe   :  { %v3138_v2 = vpop.f32.mrf.mxu2 }
 0x3ff   :  { %v3139_v44 = vadd.f32 %v3138_v2, %v8052_v40  ;;  %v3217_v29 = vpop.f32.mrf.mxu3 }
 0x400   :  { %v3299_v63 = vpop.f32.mrf.mxu0 }
 0x401   :  { %v3218_v11 = vadd.f32 %v3217_v29, %v3139_v44 }
 0x402   :  { %v3378_v22 = vpop.f32.mrf.mxu1 }
 0x403   :  { %v3297_v47 = vadd.f32 %v3296_v20, %v3218_v11  ;;  %3180 = vmatmul.bf16.gmra.mxu2 %v8998_v38  ;;  %3338 = vmatmul.bf16.gmra.mxu0 %v8999_v45 }
 0x404   :  { %3259 = vmatmul.bf16.gmra.mxu3 %v9000_v57 }
 0x405   :  { %3417 = vmatmul.bf16.gmra.mxu1 %v7551_v62  ;;  %v8395_v60 = vadd.f32 %v3375_v55, %v3297_v47  ;;  %v9001_v55 = vld [vmem:[#allocation78_spill] sm:$0xff]  ;;  %v9002_v47 = vld [vmem:[#allocation79_spill] sm:$0xff] }
 0x406   :  { %v3141_v17 = vpop.f32.mrf.mxu2 }
 0x407   :  { %v3142_v10 = vadd.f32 %v3141_v17, %v8063_v50  ;;  %v3220_v28 = vpop.f32.mrf.mxu3  ;;  %v9003_v50 = vld [vmem:[#allocation77_spill] sm:$0xff] }
 0x408   :  { %v3301_v40 = vpop.f32.mrf.mxu0 }
 0x409   :  { %v3221_v42 = vadd.f32 %v3220_v28, %v3142_v10 }
 0x40a   :  { %v3380_v43 = vpop.f32.mrf.mxu1 }
 0x40b   :  { %v3300_v21 = vadd.f32 %v3299_v63, %v3221_v42 }
 0x40d   :  { %v8398_v14 = vadd.f32 %v3378_v22, %v3300_v21 }
 0x40e   :  { %v3143_v20 = vpop.f32.mrf.mxu2 }
 0x40f   :  { %v3144_v2 = vadd.f32 %v3143_v20, %v8081_v54  ;;  %v3222_v44 = vpop.f32.mrf.mxu3 }
 0x410   :  { %v3304_v29 = vpop.f32.mrf.mxu0 }
 0x411   :  { %v3223_v11 = vadd.f32 %v3222_v44, %v3144_v2 }
 0x412   :  { %v3383_v38 = vpop.f32.mrf.mxu1 }
 0x413   :  { %v3302_v62 = vadd.f32 %v3301_v40, %v3223_v11  ;;  %3431 = vmatmul.bf16.vlgmr.msrb.gmra.mxu2 %v9001_v55  ;;  %3589 = vmatmul.bf16.vlgmr.msrb.gmra.mxu0 %v9002_v47 }
 0x414   :  { %3510 = vmatmul.bf16.vlgmr.msrb.gmra.mxu3 %v9003_v50 }
 0x415   :  { %5102 = vmatmul.msk.bf16.vlgmr.msrb.gmra.mxu1 %vm1958_vm0, %v7581_v56  ;;  %v8406_v63 = vadd.f32 %v3380_v43, %v3302_v62  ;;  %v9004_v43 = vld [vmem:[#allocation82_spill] sm:$0xff]  ;;  %v9005_v62 = vld [vmem:[#allocation83_spill] sm:$0xff] }
 0x416   :  { %v3146_v22 = vpop.f32.mrf.mxu2 }
 0x417   :  { %v3147_v45 = vadd.f32 %v3146_v22, %v8097_v58  ;;  %v3225_v54 = vpop.f32.mrf.mxu3  ;;  %v9006_v58 = vld [vmem:[#allocation81_spill] sm:$0xff] }
 0x418   :  { %v3306_v57 = vpop.f32.mrf.mxu0 }
 0x419   :  { %v3226_v17 = vadd.f32 %v3225_v54, %v3147_v45 }
 0x41a   :  { %v3385_v10 = vpop.f32.mrf.mxu1 }
 0x41b   :  { %v3305_v28 = vadd.f32 %v3304_v29, %v3226_v17 }
 0x41d   :  { %v8409_v40 = vadd.f32 %v3383_v38, %v3305_v28 }
 0x41e   :  { %v3148_v42 = vpop.f32.mrf.mxu2 }
 0x41f   :  { %v3149_v21 = vadd.f32 %v3148_v42, %v8103_v25  ;;  %v3227_v20 = vpop.f32.mrf.mxu3 }
 0x420   :  { %v3309_v2 = vpop.f32.mrf.mxu0 }
 0x421   :  { %v3228_v44 = vadd.f32 %v3227_v20, %v3149_v21 }
 0x422   :  { %v3388_v11 = vpop.f32.mrf.mxu1 }
 0x423   :  { %v3307_v56 = vadd.f32 %v3306_v57, %v3228_v44  ;;  %3436 = vmatmul.bf16.gmra.mxu2 %v9004_v43  ;;  %3594 = vmatmul.bf16.gmra.mxu0 %v9005_v62  ;;  %v9008_v44 = vld [vmem:[#allocation87_spill] sm:$0xff] }
 0x424   :  { %3515 = vmatmul.bf16.gmra.mxu3 %v9006_v58 }
 0x425   :  { %5103 = vmatmul.msk.bf16.gmra.mxu1 %vm1958_vm0, %v7624_v23  ;;  %v8417_v29 = vadd.f32 %v3385_v10, %v3307_v56  ;;  %v9007_v10 = vld [vmem:[#allocation86_spill] sm:$0xff] }
 0x426   :  { %v3151_v38 = vpop.f32.mrf.mxu2 }
 0x427   :  { %v3152_v55 = vadd.f32 %v3151_v38, %v8125_v49  ;;  %v3230_v25 = vpop.f32.mrf.mxu3  ;;  %v9009_v49 = vld [vmem:[#allocation85_spill] sm:$0xff] }
 0x428   :  { %v3311_v47 = vpop.f32.mrf.mxu0 }
 0x429   :  { %v3231_v50 = vadd.f32 %v3230_v25, %v3152_v55 }
 0x42a   :  { %v3390_v22 = vpop.f32.mrf.mxu1 }
 0x42b   :  { %v3310_v45 = vadd.f32 %v3309_v2, %v3231_v50 }
 0x42d   :  { %v8420_v54 = vadd.f32 %v3388_v11, %v3310_v45 }
 0x42e   :  { %v3153_v57 = vpop.f32.mrf.mxu2 }
 0x42f   :  { %v3154_v17 = vadd.f32 %v3153_v57, %v8131_v36  ;;  %v3232_v28 = vpop.f32.mrf.mxu3 }
 0x430   :  { %v3314_v42 = vpop.f32.mrf.mxu0 }
 0x431   :  { %v3233_v21 = vadd.f32 %v3232_v28, %v3154_v17  ;;  %v9011_v28 = vld [vmem:[#allocation91_spill] sm:$0xff] }
 0x432   :  { %v3393_v20 = vpop.f32.mrf.mxu1 }
 0x433   :  { %v3312_v23 = vadd.f32 %v3311_v47, %v3233_v21  ;;  %3441 = vmatmul.bf16.gmra.mxu2 %v9007_v10  ;;  %3599 = vmatmul.bf16.gmra.mxu0 %v9008_v44 }
 0x434   :  { %3520 = vmatmul.bf16.gmra.mxu3 %v9009_v49 }
 0x435   :  { %5104 = vmatmul.msk.bf16.gmra.mxu1 %vm1958_vm0, %v7655_v8  ;;  %v8428_v2 = vadd.f32 %v3390_v22, %v3312_v23  ;;  %v9010_v22 = vld [vmem:[#allocation90_spill] sm:$0xff] }
 0x436   :  { %v3156_v11 = vpop.f32.mrf.mxu2 }
 0x437   :  { %v3157_v56 = vadd.f32 %v3156_v11, %v8153_v32  ;;  %v3235_v36 = vpop.f32.mrf.mxu3  ;;  %v9012_v32 = vld [vmem:[#allocation89_spill] sm:$0xff] }
 0x438   :  { %v3316_v43 = vpop.f32.mrf.mxu0 }
 0x439   :  { %v3236_v62 = vadd.f32 %v3235_v36, %v3157_v56 }
 0x43a   :  { %v3395_v58 = vpop.f32.mrf.mxu1 }
 0x43b   :  { %v3315_v38 = vadd.f32 %v3314_v42, %v3236_v62 }
 0x43d   :  { %v8431_v55 = vadd.f32 %v3393_v20, %v3315_v38 }
 0x43e   :  { %v3158_v25 = vpop.f32.mrf.mxu2 }
 0x43f   :  { %v3159_v47 = vadd.f32 %v3158_v25, %v8159_v18  ;;  %v3237_v50 = vpop.f32.mrf.mxu3 }
 0x440   :  { %v3319_v45 = vpop.f32.mrf.mxu0 }
 0x441   :  { %v3238_v57 = vadd.f32 %v3237_v50, %v3159_v47  ;;  %v9014_v47 = vld [vmem:[#allocation95_spill] sm:$0xff] }
 0x442   :  { %v3398_v17 = vpop.f32.mrf.mxu1 }
 0x443   :  { %v3317_v8 = vadd.f32 %v3316_v43, %v3238_v57  ;;  %3446 = vmatmul.bf16.gmra.mxu2 %v9010_v22  ;;  %3604 = vmatmul.bf16.gmra.mxu0 %v9011_v28 }
 0x444   :  { %3525 = vmatmul.bf16.gmra.mxu3 %v9012_v32 }
 0x445   :  { %5105 = vmatmul.msk.bf16.gmra.mxu1 %vm1958_vm0, %v7686_v52  ;;  %v8439_v42 = vadd.f32 %v3395_v58, %v3317_v8  ;;  %v9013_v58 = vld [vmem:[#allocation94_spill] sm:$0xff] }
 0x446   :  { %v3161_v21 = vpop.f32.mrf.mxu2 }
 0x447   :  { %v3162_v20 = vadd.f32 %v3161_v21, %v8181_v12  ;;  %v3240_v18 = vpop.f32.mrf.mxu3  ;;  %v9015_v12 = vld [vmem:[#allocation93_spill] sm:$0xff] }
 0x448   :  { %v3321_v23 = vpop.f32.mrf.mxu0 }
 0x449   :  { %v3241_v10 = vadd.f32 %v3240_v18, %v3162_v20 }
 0x44a   :  { %v3400_v44 = vpop.f32.mrf.mxu1 }
 0x44b   :  { %v3320_v49 = vadd.f32 %v3319_v45, %v3241_v10 }
 0x44d   :  { %v8442_v11 = vadd.f32 %v3398_v17, %v3320_v49 }
 0x44e   :  { %v3163_v56 = vpop.f32.mrf.mxu2 }
 0x44f   :  { %v3164_v36 = vadd.f32 %v3163_v56, %v8193_v3  ;;  %v3242_v43 = vpop.f32.mrf.mxu3  ;;  %v9017_v56 = vld [vmem:[#allocation99_spill] sm:$0xff] }
 0x450   :  { %v3324_v62 = vpop.f32.mrf.mxu0 }
 0x451   :  { %v3243_v38 = vadd.f32 %v3242_v43, %v3164_v36 }
 0x452   :  { %v3403_v25 = vpop.f32.mrf.mxu1 }
 0x453   :  { %v3322_v52 = vadd.f32 %v3321_v23, %v3243_v38  ;;  %3451 = vmatmul.bf16.gmra.mxu2 %v9013_v58  ;;  %3609 = vmatmul.bf16.gmra.mxu0 %v9014_v47 }
 0x454   :  { %3530 = vmatmul.bf16.gmra.mxu3 %v9015_v12 }
 0x455   :  { %5106 = vmatmul.msk.bf16.gmra.mxu1 %vm1958_vm0, %v7717_v46  ;;  %v8450_v50 = vadd.f32 %v3400_v44, %v3322_v52  ;;  %v9016_v44 = vld [vmem:[#allocation98_spill] sm:$0xff] }
 0x456   :  { %v3166_v45 = vpop.f32.mrf.mxu2 }
 0x457   :  { %v3167_v57 = vadd.f32 %v3166_v45, %v8203_v53  ;;  %v3245_v3 = vpop.f32.mrf.mxu3  ;;  %v9018_v53 = vld [vmem:[#allocation97_spill] sm:$0xff] }
 0x458   :  { %v3326_v17 = vpop.f32.mrf.mxu0 }
 0x459   :  { %v3246_v8 = vadd.f32 %v3245_v3, %v3167_v57 }
 0x45a   :  { %v3405_v22 = vpop.f32.mrf.mxu1 }
 0x45b   :  { %v3325_v28 = vadd.f32 %v3324_v62, %v3246_v8 }
 0x45d   :  { %v8453_v32 = vadd.f32 %v3403_v25, %v3325_v28  ;;  %v9020_v28 = vld [vmem:[#allocation103_spill] sm:$0xff] }
 0x45e   :  { %v3168_v21 = vpop.f32.mrf.mxu2 }
 0x45f   :  { %v3169_v20 = vadd.f32 %v3168_v21, %v8209_v30  ;;  %v3247_v18 = vpop.f32.mrf.mxu3 }
 0x460   :  { %v3329_v23 = vpop.f32.mrf.mxu0 }
 0x461   :  { %v3248_v10 = vadd.f32 %v3247_v18, %v3169_v20 }
 0x462   :  { %v3408_v49 = vpop.f32.mrf.mxu1 }
 0x463   :  { %v3327_v46 = vadd.f32 %v3326_v17, %v3248_v10  ;;  %3456 = vmatmul.bf16.gmra.mxu2 %v9016_v44  ;;  %3614 = vmatmul.bf16.gmra.mxu0 %v9017_v56 }
 0x464   :  { %3535 = vmatmul.bf16.gmra.mxu3 %v9018_v53 }
 0x465   :  { %5107 = vmatmul.msk.bf16.gmra.mxu1 %vm1958_vm0, %v7748_v1  ;;  %v8461_v36 = vadd.f32 %v3405_v22, %v3327_v46  ;;  %v9019_v22 = vld [vmem:[#allocation102_spill] sm:$0xff] }
 0x466   :  { %v3171_v43 = vpop.f32.mrf.mxu2 }
 0x467   :  { %v3172_v62 = vadd.f32 %v3171_v43, %v8237_v9  ;;  %v3250_v30 = vpop.f32.mrf.mxu3  ;;  %v9021_v9 = vld [vmem:[#allocation101_spill] sm:$0xff] }
 0x468   :  { %v3331_v38 = vpop.f32.mrf.mxu0 }
 0x469   :  { %v3251_v25 = vadd.f32 %v3250_v30, %v3172_v62 }
 0x46a   :  { %v3410_v52 = vpop.f32.mrf.mxu1 }
 0x46b   :  { %v3330_v58 = vadd.f32 %v3329_v23, %v3251_v25  ;;  %v9022_v25 = vld [vmem:[#allocation106_spill] sm:$0xff] }
 0x46d   :  { %v8464_v47 = vadd.f32 %v3408_v49, %v3330_v58 }
 0x46e   :  { %v3173_v12 = vpop.f32.mrf.mxu2 }
 0x46f   :  { %v3174_v45 = vadd.f32 %v3173_v12, %v8249_v5  ;;  %v3252_v57 = vpop.f32.mrf.mxu3 }
 0x470   :  { %v3334_v3 = vpop.f32.mrf.mxu0 }
 0x471   :  { %v3253_v17 = vadd.f32 %v3252_v57, %v3174_v45 }
 0x472   :  { %v3413_v8 = vpop.f32.mrf.mxu1 }
 0x473   :  { %v3332_v1 = vadd.f32 %v3331_v38, %v3253_v17  ;;  %3461 = vmatmul.bf16.gmra.mxu2 %v9019_v22  ;;  %3619 = vmatmul.bf16.gmra.mxu0 %v9020_v28 }
 0x474   :  { %3540 = vmatmul.bf16.gmra.mxu3 %v9021_v9 }
 0x475   :  { %5108 = vmatmul.msk.bf16.gmra.mxu1 %vm1958_vm0, %v7785_v34  ;;  %v8472_v21 = vadd.f32 %v3410_v52, %v3332_v1  ;;  %v9023_v52 = vld [vmem:[#allocation107_spill] sm:$0xff] }
 0x476   :  { %v3176_v20 = vpop.f32.mrf.mxu2 }
 0x477   :  { %v3177_v18 = vadd.f32 %v3176_v20, %v8259_v33  ;;  %v3255_v5 = vpop.f32.mrf.mxu3  ;;  %v9024_v33 = vld [vmem:[#allocation105_spill] sm:$0xff] }
 0x478   :  { %v3336_v23 = vpop.f32.mrf.mxu0 }
 0x479   :  { %v3256_v10 = vadd.f32 %v3255_v5, %v3177_v18 }
 0x47a   :  { %v3415_v49 = vpop.f32.mrf.mxu1 }
 0x47b   :  { %v3335_v46 = vadd.f32 %v3334_v3, %v3256_v10  ;;  %v9026_v10 = vld [vmem:[#allocation111_spill] sm:$0xff] }
 0x47d   :  { %v8475_v44 = vadd.f32 %v3413_v8, %v3335_v46 }
 0x47e   :  { %v3178_v56 = vpop.f32.mrf.mxu2 }
 0x47f   :  { %v3179_v53 = vadd.f32 %v3178_v56, %v8265_v39  ;;  %v3257_v43 = vpop.f32.mrf.mxu3 }
 0x480   :  { %v3339_v62 = vpop.f32.mrf.mxu0 }
 0x481   :  { %v3258_v30 = vadd.f32 %v3257_v43, %v3179_v53 }
 0x482   :  { %v3418_v38 = vpop.f32.mrf.mxu1 }
 0x483   :  { %v3337_v34 = vadd.f32 %v3336_v23, %v3258_v30  ;;  %3466 = vmatmul.bf16.gmra.mxu2 %v9022_v25  ;;  %3624 = vmatmul.bf16.gmra.mxu0 %v9023_v52  ;;  %v9025_v23 = vld [vmem:[#allocation110_spill] sm:$0xff] }
 0x484   :  { %3545 = vmatmul.bf16.gmra.mxu3 %v9024_v33 }
 0x485   :  { %5109 = vmatmul.msk.bf16.gmra.mxu1 %vm1958_vm0, %v7810_v48  ;;  %v8483_v58 = vadd.f32 %v3415_v49, %v3337_v34 }
 0x486   :  { %v3181_v12 = vpop.f32.mrf.mxu2 }
 0x487   :  { %v3182_v45 = vadd.f32 %v3181_v12, %v8287_v37  ;;  %v3260_v39 = vpop.f32.mrf.mxu3  ;;  %v9027_v37 = vld [vmem:[#allocation109_spill] sm:$0xff] }
 0x488   :  { %v3341_v57 = vpop.f32.mrf.mxu0 }
 0x489   :  { %v3261_v3 = vadd.f32 %v3260_v39, %v3182_v45  ;;  %v9028_v45 = vld [vmem:[#allocation113_spill] sm:$0xff]  ;;  %v9029_v39 = vld [vmem:[#allocation114_spill] sm:$0xff] }
 0x48a   :  { %v3420_v17 = vpop.f32.mrf.mxu1 }
 0x48b   :  { %v3340_v8 = vadd.f32 %v3339_v62, %v3261_v3 }
 0x48d   :  { %v8486_v1 = vadd.f32 %v3418_v38, %v3340_v8 }
 0x48e   :  { %v3183_v22 = vpop.f32.mrf.mxu2 }
 0x48f   :  { %v3184_v28 = vadd.f32 %v3183_v22, %v8299_v7  ;;  %v3262_v9 = vpop.f32.mrf.mxu3 }
 0x490   :  { %v3590_v20 = vpop.f32.mrf.mxu0 }
 0x491   :  { %v3263_v18 = vadd.f32 %v3262_v9, %v3184_v28 }
 0x492   :  { %v3669_v5 = vpop.f32.mrf.mxu1 }
 0x493   :  { %v3342_v48 = vadd.f32 %v3341_v57, %v3263_v18  ;;  %3471 = vmatmul.bf16.gmra.mxu2 %v9025_v23  ;;  %3629 = vmatmul.bf16.gmra.mxu0 %v9026_v10  ;;  %v9030_v57 = vld [vmem:[#allocation112_spill] sm:$0xff] }
 0x494   :  { %3550 = vmatmul.bf16.gmra.mxu3 %v9027_v37 }
 0x495   :  { %5110 = vmatmul.msk.bf16.gmra.mxu1 %vm1958_vm0, %v7853_v41  ;;  %v8494_v49 = vadd.f32 %v3420_v17, %v3342_v48 }
 0x496   :  { %v3432_v46 = vpop.f32.mrf.mxu2 }
 0x497   :  { %v3433_v56 = vadd.f32 %v3432_v46, %v8318_v51  ;;  %v3511_v7 = vpop.f32.mrf.mxu3 }
 0x498   :  { %v3592_v53 = vpop.f32.mrf.mxu0 }
 0x499   :  { %v3512_v43 = vadd.f32 %v3511_v7, %v3433_v56  ;;  %v9032_v56 = vld [vmem:[#allocation117_spill] sm:$0xff]  ;;  %v9033_v7 = vld [vmem:[#allocation115_spill] sm:$0xff] }
 0x49a   :  { %v3671_v62 = vpop.f32.mrf.mxu1 }
 0x49b   :  { %v3591_v30 = vadd.f32 %v3590_v20, %v3512_v43 }
 0x49d   :  { %v3670_v38 = vadd.f32 %v3669_v5, %v3591_v30 }
 0x49e   :  { %v3434_v34 = vpop.f32.mrf.mxu2 }
 0x49f   :  { %3741 = vst.msk [vmem:[%s8663_s2 + $0x8] sm:$0xff] %vm3740_vm1, %v3670_v38  ;;  %v3435_v41 = vadd.f32 %v3434_v34, %v8331_v0  ;;  %v3513_v25 = vpop.f32.mrf.mxu3 }
 0x4a0   :  { %v3595_v52 = vpop.f32.mrf.mxu0 }
 0x4a1   :  { %v3514_v33 = vadd.f32 %v3513_v25, %v3435_v41 }
 0x4a2   :  { %v3674_v12 = vpop.f32.mrf.mxu1 }
 0x4a3   :  { %v3593_v51 = vadd.f32 %v3592_v53, %v3514_v33  ;;  %3476 = vmatmul.bf16.gmra.mxu2 %v9028_v45  ;;  %3634 = vmatmul.bf16.gmra.mxu0 %v9029_v39 }
 0x4a4   :  { %3555 = vmatmul.bf16.gmra.mxu3 %v9030_v57  ;;  %v9035_v57 = vld [vmem:[#allocation121_spill] sm:$0xff] }
 0x4a5   :  { %5111 = vmatmul.msk.bf16.gmra.mxu1 %vm1958_vm0, %v7887_v6  ;;  %v3672_v3 = vadd.f32 %v3671_v62, %v3593_v51 }
 0x4a6   :  { %v3437_v17 = vpop.f32.mrf.mxu2 }
 0x4a7   :  { %3743 = vst.msk [vmem:[%s8663_s2 + $0x18] sm:$0xff] %vm3740_vm1, %v3672_v3  ;;  %v3438_v0 = vadd.f32 %v3437_v17, %v8340_v16  ;;  %v3516_v8 = vpop.f32.mrf.mxu3  ;;  %v9031_v16 = vld [vmem:[#allocation116_spill] sm:$0xff]  ;;  %v9036_v3 = vld [vmem:[#allocation119_spill] sm:$0xff] }
 0x4a8   :  { %v3597_v22 = vpop.f32.mrf.mxu0 }
 0x4a9   :  { %v3517_v28 = vadd.f32 %v3516_v8, %v3438_v0 }
 0x4aa   :  { %v3676_v9 = vpop.f32.mrf.mxu1 }
 0x4ab   :  { %v3596_v20 = vadd.f32 %v3595_v52, %v3517_v28 }
 0x4ad   :  { %v3675_v18 = vadd.f32 %v3674_v12, %v3596_v20 }
 0x4ae   :  { %v3439_v5 = vpop.f32.mrf.mxu2 }
 0x4af   :  { %3745 = vst.msk [vmem:[%s8663_s2 + $0x28] sm:$0xff] %vm3740_vm1, %v3675_v18  ;;  %v3440_v6 = vadd.f32 %v3439_v5, %v8347_v15  ;;  %v3518_v48 = vpop.f32.mrf.mxu3 }
 0x4b0   :  { %v3600_v23 = vpop.f32.mrf.mxu0 }
 0x4b1   :  { %v3519_v10 = vadd.f32 %v3518_v48, %v3440_v6 }
 0x4b2   :  { %v3679_v37 = vpop.f32.mrf.mxu1 }
 0x4b3   :  { %v3598_v46 = vadd.f32 %v3597_v22, %v3519_v10  ;;  %3481 = vmatmul.bf16.gmra.mxu2 %v9031_v16  ;;  %3639 = vmatmul.bf16.gmra.mxu0 %v9032_v56  ;;  %v9039_v16 = vld [vmem:[#allocation123_spill] sm:$0xff] }
 0x4b4   :  { %3560 = vmatmul.bf16.gmra.mxu3 %v9033_v7 }
 0x4b5   :  { %5112 = vmatmul.msk.bf16.gmra.mxu1 %vm1958_vm0, %v7924_v61  ;;  %v3677_v53 = vadd.f32 %v3676_v9, %v3598_v46  ;;  %v9038_v46 = vld [vmem:[#allocation125_spill] sm:$0xff] }
 0x4b6   :  { %v3442_v43 = vpop.f32.mrf.mxu2 }
 0x4b7   :  { %3747 = vst.msk [vmem:[%s8663_s2 + $0x38] sm:$0xff] %vm3740_vm1, %v3677_v53  ;;  %v3443_v15 = vadd.f32 %v3442_v43, %v8362_v24  ;;  %v3521_v62 = vpop.f32.mrf.mxu3  ;;  %v9034_v24 = vld [vmem:[#allocation120_spill] sm:$0xff] }
 0x4b8   :  { %v3602_v30 = vpop.f32.mrf.mxu0 }
 0x4b9   :  { %v3522_v38 = vadd.f32 %v3521_v62, %v3443_v15 }
 0x4ba   :  { %v3681_v34 = vpop.f32.mrf.mxu1 }
 0x4bb   :  { %v3601_v41 = vadd.f32 %v3600_v23, %v3522_v38 }
 0x4bd   :  { %v3680_v25 = vadd.f32 %v3679_v37, %v3601_v41 }
 0x4be   :  { %v3444_v52 = vpop.f32.mrf.mxu2 }
 0x4bf   :  { %3749 = vst.msk [vmem:[%s8663_s2 + $0x48] sm:$0xff] %vm3740_vm1, %v3680_v25  ;;  %v3445_v61 = vadd.f32 %v3444_v52, %v8375_v59  ;;  %v3523_v33 = vpop.f32.mrf.mxu3 }
 0x4c0   :  { %v3605_v12 = vpop.f32.mrf.mxu0 }
 0x4c1   :  { %v3524_v51 = vadd.f32 %v3523_v33, %v3445_v61 }
 0x4c2   :  { %v3684_v45 = vpop.f32.mrf.mxu1 }
 0x4c3   :  { %v3603_v39 = vadd.f32 %v3602_v30, %v3524_v51  ;;  %3486 = vmatmul.bf16.gmra.mxu2 %v9034_v24  ;;  %3644 = vmatmul.bf16.gmra.mxu0 %v9035_v57 }
 0x4c4   :  { %3565 = vmatmul.bf16.gmra.mxu3 %v9036_v3 }
 0x4c5   :  { %5113 = vmatmul.msk.bf16.gmra.mxu1 %vm1958_vm0, %v7961_v35  ;;  %v3682_v17 = vadd.f32 %v3681_v34, %v3603_v39 }
 0x4c6   :  { %v3447_v0 = vpop.f32.mrf.mxu2 }
 0x4c7   :  { %3751 = vst.msk [vmem:[%s8663_s2 + $0x58] sm:$0xff] %vm3740_vm1, %v3682_v17  ;;  %v3448_v59 = vadd.f32 %v3447_v0, %v8378_v4  ;;  %v3526_v8 = vpop.f32.mrf.mxu3  ;;  %v9037_v4 = vld [vmem:[#allocation124_spill] sm:$0xff] }
 0x4c8   :  { %v3607_v22 = vpop.f32.mrf.mxu0 }
 0x4c9   :  { %v3527_v28 = vadd.f32 %v3526_v8, %v3448_v59 }
 0x4ca   :  { %v3686_v9 = vpop.f32.mrf.mxu1 }
 0x4cb   :  { %v3606_v20 = vadd.f32 %v3605_v12, %v3527_v28  ;;  %v9041_v12 = vld [vmem:[#allocation9_spill] sm:$0xff] }
 0x4cd   :  { %v3685_v18 = vadd.f32 %v3684_v45, %v3606_v20 }
 0x4ce   :  { %v3449_v5 = vpop.f32.mrf.mxu2 }
 0x4cf   :  { %3753 = vst.msk [vmem:[%s8663_s2 + $0x68] sm:$0xff] %vm3740_vm1, %v3685_v18  ;;  %v3450_v35 = vadd.f32 %v3449_v5, %v8385_v31  ;;  %v3528_v6 = vpop.f32.mrf.mxu3 }
 0x4d0   :  { %v3610_v48 = vpop.f32.mrf.mxu0 }
 0x4d1   :  { %v3529_v23 = vadd.f32 %v3528_v6, %v3450_v35 }
 0x4d2   :  { %v3689_v10 = vpop.f32.mrf.mxu1 }
 0x4d3   :  { %v3608_v37 = vadd.f32 %v3607_v22, %v3529_v23  ;;  %3491 = vmatmul.bf16.gmra.mxu2 %v9037_v4  ;;  %3649 = vmatmul.bf16.gmra.mxu0 %v9038_v46 }
 0x4d4   :  { %3570 = vmatmul.bf16.gmra.mxu3 %v9039_v16 }
 0x4d5   :  { %5114 = vmatmul.msk.bf16.gmra.mxu1 %vm1958_vm0, %v7998_v13  ;;  %v3687_v56 = vadd.f32 %v3686_v9, %v3608_v37 }
 0x4d6   :  { %v3452_v7 = vpop.f32.mrf.mxu2 }
 0x4d7   :  { %3755 = vst.msk [vmem:[%s8663_s2 + $0x78] sm:$0xff] %vm3740_vm1, %v3687_v56  ;;  %v3453_v31 = vadd.f32 %v3452_v7, %v8388_v26  ;;  %v3531_v53 = vpop.f32.mrf.mxu3  ;;  %v9040_v26 = vld [vmem:[#allocation126_spill] sm:$0xff] }
 0x4d8   :  { %v3612_v43 = vpop.f32.mrf.mxu0 }
 0x4d9   :  { %v3532_v15 = vadd.f32 %v3531_v53, %v3453_v31 }
 0x4da   :  { %v3691_v62 = vpop.f32.mrf.mxu1 }
 0x4db   :  { %v3611_v30 = vadd.f32 %v3610_v48, %v3532_v15 }
 0x4dd   :  { %v3690_v38 = vadd.f32 %v3689_v10, %v3611_v30 }
 0x4de   :  { %v3454_v34 = vpop.f32.mrf.mxu2 }
 0x4df   :  { %3757 = vst.msk [vmem:[%s8663_s2 + $0x88] sm:$0xff] %vm3740_vm1, %v3690_v38  ;;  %v3455_v13 = vadd.f32 %v3454_v34, %v8395_v60  ;;  %v3533_v41 = vpop.f32.mrf.mxu3 }
 0x4e0   :  { %v3615_v25 = vpop.f32.mrf.mxu0 }
 0x4e1   :  { %v3534_v52 = vadd.f32 %v3533_v41, %v3455_v13 }
 0x4e2   :  { %v3694_v61 = vpop.f32.mrf.mxu1 }
 0x4e3   :  { %v3613_v33 = vadd.f32 %v3612_v43, %v3534_v52  ;;  %3496 = vmatmul.bf16.gmra.mxu2 %v7555_v27  ;;  %3654 = vmatmul.bf16.gmra.mxu0 %v7557_v19 }
 0x4e4   :  { %3575 = vmatmul.bf16.gmra.mxu3 %v9040_v26 }
 0x4e5   :  { %5115 = vmatmul.msk.bf16.gmra.mxu1 %vm1958_vm0, %v9041_v12  ;;  %v3692_v51 = vadd.f32 %v3691_v62, %v3613_v33 }
 0x4e6   :  { %v3457_v45 = vpop.f32.mrf.mxu2 }
 0x4e7   :  { %3759 = vst.msk [vmem:[%s8663_s2 + $0x98] sm:$0xff] %vm3740_vm1, %v3692_v51  ;;  %v3458_v60 = vadd.f32 %v3457_v45, %v8398_v14  ;;  %v3536_v39 = vpop.f32.mrf.mxu3 }
 0x4e8   :  { %v3617_v24 = vpop.f32.mrf.mxu0 }
 0x4e9   :  { %v3537_v57 = vadd.f32 %v3536_v39, %v3458_v60 }
 0x4ea   :  { %v3696_v27 = vpop.f32.mrf.mxu1 }
 0x4eb   :  { %v3616_v3 = vadd.f32 %v3615_v25, %v3537_v57 }
 0x4ed   :  { %v3695_v19 = vadd.f32 %v3694_v61, %v3616_v3 }
 0x4ee   :  { %v3459_v17 = vpop.f32.mrf.mxu2 }
 0x4ef   :  { %3761 = vst.msk [vmem:[%s8663_s2 + $0xa8] sm:$0xff] %vm3740_vm1, %v3695_v19  ;;  %v3460_v0 = vadd.f32 %v3459_v17, %v8406_v63  ;;  %v3538_v59 = vpop.f32.mrf.mxu3 }
 0x4f0   :  { %v3620_v8 = vpop.f32.mrf.mxu0 }
 0x4f1   :  { %v3539_v22 = vadd.f32 %v3538_v59, %v3460_v0 }
 0x4f2   :  { %v3699_v28 = vpop.f32.mrf.mxu1 }
 0x4f3   :  { %v3618_v9 = vadd.f32 %v3617_v24, %v3539_v22 }
 0x4f5   :  { %v3697_v14 = vadd.f32 %v3696_v27, %v3618_v9 }
 0x4f6   :  { %v3462_v20 = vpop.f32.mrf.mxu2 }
 0x4f7   :  { %3763 = vst.msk [vmem:[%s8663_s2 + $0xb8] sm:$0xff] %vm3740_vm1, %v3697_v14  ;;  %v3463_v18 = vadd.f32 %v3462_v20, %v8409_v40  ;;  %v3541_v5 = vpop.f32.mrf.mxu3 }
 0x4f8   :  { %v3622_v35 = vpop.f32.mrf.mxu0 }
 0x4f9   :  { %v3542_v6 = vadd.f32 %v3541_v5, %v3463_v18 }
 0x4fa   :  { %v3701_v48 = vpop.f32.mrf.mxu1 }
 0x4fb   :  { %v3621_v23 = vadd.f32 %v3620_v8, %v3542_v6 }
 0x4fd   :  { %v3700_v63 = vadd.f32 %v3699_v28, %v3621_v23 }
 0x4fe   :  { %v3464_v10 = vpop.f32.mrf.mxu2 }
 0x4ff   :  { %3765 = vst.msk [vmem:[%s8663_s2 + $0xc8] sm:$0xff] %vm3740_vm1, %v3700_v63  ;;  %v3465_v37 = vadd.f32 %v3464_v10, %v8417_v29  ;;  %v3543_v4 = vpop.f32.mrf.mxu3 }
 0x500   :  { %v3625_v46 = vpop.f32.mrf.mxu0 }
 0x501   :  { %v3544_v16 = vadd.f32 %v3543_v4, %v3465_v37 }
 0x502   :  { %v3704_v56 = vpop.f32.mrf.mxu1 }
 0x503   :  { %v3623_v7 = vadd.f32 %v3622_v35, %v3544_v16 }
 0x505   :  { %v3702_v40 = vadd.f32 %v3701_v48, %v3623_v7 }
 0x506   :  { %v3467_v31 = vpop.f32.mrf.mxu2 }
 0x507   :  { %3767 = vst.msk [vmem:[%s8663_s2 + $0xd8] sm:$0xff] %vm3740_vm1, %v3702_v40  ;;  %v3468_v53 = vadd.f32 %v3467_v31, %v8420_v54  ;;  %v3546_v43 = vpop.f32.mrf.mxu3 }
 0x508   :  { %v3627_v15 = vpop.f32.mrf.mxu0 }
 0x509   :  { %v3547_v62 = vadd.f32 %v3546_v43, %v3468_v53 }
 0x50a   :  { %v3706_v30 = vpop.f32.mrf.mxu1 }
 0x50b   :  { %v3626_v38 = vadd.f32 %v3625_v46, %v3547_v62 }
 0x50d   :  { %v3705_v29 = vadd.f32 %v3704_v56, %v3626_v38 }
 0x50e   :  { %v3469_v34 = vpop.f32.mrf.mxu2 }
 0x50f   :  { %3769 = vst.msk [vmem:[%s8663_s2 + $0xe8] sm:$0xff] %vm3740_vm1, %v3705_v29  ;;  %v3470_v13 = vadd.f32 %v3469_v34, %v8428_v2  ;;  %v3548_v41 = vpop.f32.mrf.mxu3 }
 0x510   :  { %v3630_v25 = vpop.f32.mrf.mxu0 }
 0x511   :  { %v3549_v52 = vadd.f32 %v3548_v41, %v3470_v13 }
 0x512   :  { %v3709_v61 = vpop.f32.mrf.mxu1 }
 0x513   :  { %v3628_v33 = vadd.f32 %v3627_v15, %v3549_v52 }
 0x515   :  { %v3707_v54 = vadd.f32 %v3706_v30, %v3628_v33 }
 0x516   :  { %v3472_v26 = vpop.f32.mrf.mxu2 }
 0x517   :  { %3771 = vst.msk [vmem:[%s8663_s2 + $0xf8] sm:$0xff] %vm3740_vm1, %v3707_v54  ;;  %v3473_v12 = vadd.f32 %v3472_v26, %v8431_v55  ;;  %v3551_v51 = vpop.f32.mrf.mxu3 }
 0x518   :  { %v3632_v45 = vpop.f32.mrf.mxu0 }
 0x519   :  { %v3552_v60 = vadd.f32 %v3551_v51, %v3473_v12 }
 0x51a   :  { %v3711_v39 = vpop.f32.mrf.mxu1 }
 0x51b   :  { %v3631_v24 = vadd.f32 %v3630_v25, %v3552_v60 }
 0x51d   :  { %v3710_v2 = vadd.f32 %v3709_v61, %v3631_v24 }
 0x51e   :  { %v3474_v57 = vpop.f32.mrf.mxu2 }
 0x51f   :  { %3773 = vst.msk [vmem:[%s8663_s2 + $0x108] sm:$0xff] %vm3740_vm1, %v3710_v2  ;;  %v3475_v27 = vadd.f32 %v3474_v57, %v8439_v42  ;;  %v3553_v3 = vpop.f32.mrf.mxu3 }
 0x520   :  { %v3635_v19 = vpop.f32.mrf.mxu0 }
 0x521   :  { %v3554_v17 = vadd.f32 %v3553_v3, %v3475_v27 }
 0x522   :  { %v3714_v0 = vpop.f32.mrf.mxu1 }
 0x523   :  { %v3633_v59 = vadd.f32 %v3632_v45, %v3554_v17 }
 0x525   :  { %v3712_v55 = vadd.f32 %v3711_v39, %v3633_v59 }
 0x526   :  { %v3477_v8 = vpop.f32.mrf.mxu2 }
 0x527   :  { %3775 = vst.msk [vmem:[%s8663_s2 + $0x118] sm:$0xff] %vm3740_vm1, %v3712_v55  ;;  %v3478_v22 = vadd.f32 %v3477_v8, %v8442_v11  ;;  %v3556_v28 = vpop.f32.mrf.mxu3 }
 0x528   :  { %v3637_v9 = vpop.f32.mrf.mxu0 }
 0x529   :  { %v3557_v14 = vadd.f32 %v3556_v28, %v3478_v22 }
 0x52a   :  { %v3716_v20 = vpop.f32.mrf.mxu1 }
 0x52b   :  { %v3636_v18 = vadd.f32 %v3635_v19, %v3557_v14 }
 0x52d   :  { %v3715_v42 = vadd.f32 %v3714_v0, %v3636_v18 }
 0x52e   :  { %v3479_v5 = vpop.f32.mrf.mxu2 }
 0x52f   :  { %3777 = vst.msk [vmem:[%s8663_s2 + $0x128] sm:$0xff] %vm3740_vm1, %v3715_v42  ;;  %v3480_v35 = vadd.f32 %v3479_v5, %v8450_v50  ;;  %v3558_v6 = vpop.f32.mrf.mxu3 }
 0x530   :  { %v3640_v48 = vpop.f32.mrf.mxu0 }
 0x531   :  { %v3559_v23 = vadd.f32 %v3558_v6, %v3480_v35 }
 0x532   :  { %v3719_v63 = vpop.f32.mrf.mxu1 }
 0x533   :  { %v3638_v10 = vadd.f32 %v3637_v9, %v3559_v23 }
 0x535   :  { %v3717_v11 = vadd.f32 %v3716_v20, %v3638_v10 }
 0x536   :  { %v3482_v37 = vpop.f32.mrf.mxu2 }
 0x537   :  { %3779 = vst.msk [vmem:[%s8663_s2 + $0x138] sm:$0xff] %vm3740_vm1, %v3717_v11  ;;  %v3483_v4 = vadd.f32 %v3482_v37, %v8453_v32  ;;  %v3561_v46 = vpop.f32.mrf.mxu3 }
 0x538   :  { %v3642_v16 = vpop.f32.mrf.mxu0 }
 0x539   :  { %v3562_v56 = vadd.f32 %v3561_v46, %v3483_v4 }
 0x53a   :  { %v3721_v7 = vpop.f32.mrf.mxu1 }
 0x53b   :  { %v3641_v40 = vadd.f32 %v3640_v48, %v3562_v56 }
 0x53d   :  { %v3720_v50 = vadd.f32 %v3719_v63, %v3641_v40 }
 0x53e   :  { %v3484_v31 = vpop.f32.mrf.mxu2 }
 0x53f   :  { %3781 = vst.msk [vmem:[%s8663_s2 + $0x148] sm:$0xff] %vm3740_vm1, %v3720_v50  ;;  %v3485_v53 = vadd.f32 %v3484_v31, %v8461_v36  ;;  %v3563_v43 = vpop.f32.mrf.mxu3 }
 0x540   :  { %v3645_v15 = vpop.f32.mrf.mxu0 }
 0x541   :  { %v3564_v62 = vadd.f32 %v3563_v43, %v3485_v53 }
 0x542   :  { %v3724_v30 = vpop.f32.mrf.mxu1 }
 0x543   :  { %v3643_v38 = vadd.f32 %v3642_v16, %v3564_v62 }
 0x545   :  { %v3722_v32 = vadd.f32 %v3721_v7, %v3643_v38 }
 0x546   :  { %v3487_v29 = vpop.f32.mrf.mxu2 }
 0x547   :  { %3783 = vst.msk [vmem:[%s8663_s2 + $0x158] sm:$0xff] %vm3740_vm1, %v3722_v32  ;;  %v3488_v34 = vadd.f32 %v3487_v29, %v8464_v47  ;;  %v3566_v13 = vpop.f32.mrf.mxu3 }
 0x548   :  { %v3647_v25 = vpop.f32.mrf.mxu0 }
 0x549   :  { %v3567_v41 = vadd.f32 %v3566_v13, %v3488_v34 }
 0x54a   :  { %v3726_v61 = vpop.f32.mrf.mxu1 }
 0x54b   :  { %v3646_v52 = vadd.f32 %v3645_v15, %v3567_v41 }
 0x54d   :  { %v3725_v36 = vadd.f32 %v3724_v30, %v3646_v52 }
 0x54e   :  { %v3489_v33 = vpop.f32.mrf.mxu2 }
 0x54f   :  { %3785 = vst.msk [vmem:[%s8663_s2 + $0x168] sm:$0xff] %vm3740_vm1, %v3725_v36  ;;  %v3490_v54 = vadd.f32 %v3489_v33, %v8472_v21  ;;  %v3568_v26 = vpop.f32.mrf.mxu3 }
 0x550   :  { %v3650_v45 = vpop.f32.mrf.mxu0 }
 0x551   :  { %v3569_v12 = vadd.f32 %v3568_v26, %v3490_v54 }
 0x552   :  { %v3729_v47 = vpop.f32.mrf.mxu1 }
 0x553   :  { %v3648_v51 = vadd.f32 %v3647_v25, %v3569_v12 }
 0x555   :  { %v3727_v60 = vadd.f32 %v3726_v61, %v3648_v51 }
 0x556   :  { %v3492_v39 = vpop.f32.mrf.mxu2 }
 0x557   :  { %3787 = vst.msk [vmem:[%s8663_s2 + $0x178] sm:$0xff] %vm3740_vm1, %v3727_v60  ;;  %v3493_v24 = vadd.f32 %v3492_v39, %v8475_v44  ;;  %v3571_v2 = vpop.f32.mrf.mxu3 }
 0x558   :  { %v3652_v19 = vpop.f32.mrf.mxu0 }
 0x559   :  { %v3572_v57 = vadd.f32 %v3571_v2, %v3493_v24 }
 0x55a   :  { %v3731_v59 = vpop.f32.mrf.mxu1 }
 0x55b   :  { %v3651_v27 = vadd.f32 %v3650_v45, %v3572_v57 }
 0x55d   :  { %v3730_v3 = vadd.f32 %v3729_v47, %v3651_v27 }
 0x55e   :  { %v3494_v21 = vpop.f32.mrf.mxu2 }
 0x55f   :  { %3789 = vst.msk [vmem:[%s8663_s2 + $0x188] sm:$0xff] %vm3740_vm1, %v3730_v3  ;;  %v3495_v17 = vadd.f32 %v3494_v21, %v8483_v58  ;;  %v3573_v0 = vpop.f32.mrf.mxu3 }
 0x560   :  { %v3655_v14 = vpop.f32.mrf.mxu0 }
 0x561   :  { %v3574_v55 = vadd.f32 %v3573_v0, %v3495_v17 }
 0x562   :  { %v3734_v18 = vpop.f32.mrf.mxu1 }
 0x563   :  { %v3653_v8 = vadd.f32 %v3652_v19, %v3574_v55 }
 0x565   :  { %v3732_v22 = vadd.f32 %v3731_v59, %v3653_v8 }
 0x566   :  { %v3497_v28 = vpop.f32.mrf.mxu2 }
 0x567   :  { %3791 = vst.msk [vmem:[%s8663_s2 + $0x198] sm:$0xff] %vm3740_vm1, %v3732_v22  ;;  %v3498_v44 = vadd.f32 %v3497_v28, %v8486_v1  ;;  %v3576_v9 = vpop.f32.mrf.mxu3 }
 0x568   :  { %v3657_v23 = vpop.f32.mrf.mxu0 }
 0x569   :  { %v3577_v20 = vadd.f32 %v3576_v9, %v3498_v44 }
 0x56a   :  { %v3736_v10 = vpop.f32.mrf.mxu1 }
 0x56b   :  { %v3656_v42 = vadd.f32 %v3655_v14, %v3577_v20 }
 0x56d   :  { %v3735_v5 = vadd.f32 %v3734_v18, %v3656_v42 }
 0x56e   :  { %v3499_v58 = vpop.f32.mrf.mxu2 }
 0x56f   :  { %3793 = vst.msk [vmem:[%s8663_s2 + $0x1a8] sm:$0xff] %vm3740_vm1, %v3735_v5  ;;  %v3500_v35 = vadd.f32 %v3499_v58, %v8494_v49  ;;  %v3578_v6 = vpop.f32.mrf.mxu3 }
 0x571   :  { %v3579_v48 = vadd.f32 %v3578_v6, %v3500_v35 }
 0x573   :  { %v3658_v63 = vadd.f32 %v3657_v23, %v3579_v48 }
 0x575   :  { %v3737_v1 = vadd.f32 %v3736_v10, %v3658_v63 }
 0x577   :  { %3795 = vst.msk [vmem:[%s8663_s2 + $0x1b8] sm:$0xff] %vm3740_vm1, %v3737_v1 }

</bundles_post_ra>
